<compile_context>
chip_gen: v7x
topology: tpu7x:2x2x1
jax: 0.10.0
libtpu: 0.0.40
codegen_flags: <defaults>
</compile_context>

<pallas_src>
import functools

import jax
import jax.numpy as jnp
from jax import lax
from jax.experimental import pallas as pl
from jax.experimental.pallas import tpu as pltpu

EPS = 1e-5
LANE = 128                       # channel padding; use 256 for real Cp>=256 on v6e/v7x
UP_TILE_CAP = 8                  # input rows per upsample grid step
CONV_TILE_CAP = 8                # output rows per conv grid step (toy shapes; raise to
                                 # 16-32 for production sizes together with the VMEM limit)
VMEM_LIMIT_BYTES = 48 * 1024 * 1024   # <= 64 MiB physical on v7x, plenty on v5e/v6e


# ------------------------------ small helpers ------------------------------

def _round_up(v, m):
    return (v + m - 1) // m * m


def _pick_tile(extent, cap):
    # NOTE: silently degrades to 1 if `extent` has no divisor <= cap (correct,
    # just slow) -- keep spatial extents power-of-two-ish.
    cap = max(1, min(cap, extent))
    for t in range(cap, 0, -1):
        if extent % t == 0:
            return t
    return 1


def _pad_axis(a, axis, target):
    if a.shape[axis] == target:
        return a
    pads = [(0, 0)] * a.ndim
    pads[axis] = (0, target - a.shape[axis])
    return jnp.pad(a, pads)


# --------------------------- in-kernel conv helpers -------------------------

def _halo_copies(src_hbm, dst_buf, sem, n, row_tile, slot, *, th, h_total):
    """Three DMA descriptors: body rows + (clamped) top / bottom halo rows.

    The clamped halo fetches are always in-bounds; rows that fall outside the
    image are zeroed in-kernel (`_zero_border_rows`), so the first / last row
    tile never reads out of range.  The same function (same indices) is used
    to build the descriptors for .start() and .wait().
    """
    top = jnp.maximum(row_tile * th - 1, 0)
    bot = jnp.minimum(row_tile * th + th, h_total - 1)
    return [
        pltpu.make_async_copy(src_hbm.at[n, pl.ds(row_tile * th, th)],
                              dst_buf.at[slot, pl.ds(1, th)], sem),
        pltpu.make_async_copy(src_hbm.at[n, pl.ds(top, 1)],
                              dst_buf.at[slot, pl.ds(0, 1)], sem),
        pltpu.make_async_copy(src_hbm.at[n, pl.ds(bot, 1)],
                              dst_buf.at[slot, pl.ds(th + 1, 1)], sem),
    ]


def _zero_border_rows(x, tile_idx, n_tiles, th):
    """Zero the halo rows that lie outside the image (conv 'SAME' zero pad)."""
    row = lax.broadcasted_iota(jnp.int32, x.shape, 0)
    is_pad = ((tile_idx == 0) & (row == 0)) | \
             ((tile_idx == n_tiles - 1) & (row == th + 1))
    return jnp.where(is_pad, jnp.zeros_like(x), x)


def _kw_concat(x):
    """(R, W, C) -> (R, W, 3C): columns [x(w-1) | x(w) | x(w+1)], zero at borders.

    Built once per tile and reused across the three kh taps; the kw shift is
    then absorbed into the matmul K dimension (K = 3*C).
    """
    r, w, c = x.shape
    zcol = jnp.zeros((r, 1, c), x.dtype)
    xp = jnp.concatenate([zcol, x, zcol], axis=1)          # (R, W+2, C)
    return jnp.concatenate([xp[:, :w, :], x, xp[:, 2:, :]], axis=2)


def _conv3x3_acc(xc, w_ref, th, w_out, cp_in, cp_out, acc):
    """acc += 3x3 conv of the kw-expanded tile `xc` with weight slab `w_ref`."""
    for kh in range(3):
        patch = xc[kh:kh + th].reshape(th * w_out, 3 * cp_in)
        acc = acc + jnp.dot(patch, w_ref[kh], preferred_element_type=jnp.float32)
    return acc


# ------------------- kernel 1: ConvTranspose2d(k=2, s=2) --------------------

def _upsample_kernel(x_ref, w_ref, b_ref, up_ref, *, th, w_in, cp):
    ci_p = x_ref.shape[3]
    a = x_ref[0].reshape(th * w_in, ci_p)                          # bf16 rows = (h, w)
    # one wide matmul: columns ordered (dh, dw, co)
    y = jnp.dot(a, w_ref[...], preferred_element_type=jnp.float32) + b_ref[...]
    for dh in range(2):                                            # two block stores
        z = y[:, dh * 2 * cp:(dh + 1) * 2 * cp]                    # lane-aligned slice
        up_ref[0, :, dh, :, :] = z.reshape(th, w_in, 2 * cp).astype(up_ref.dtype)


def upsample_k2s2(x_nhwc, w_up_r, b_up_r, *, tile_h):
    """x: (N,H,W,Ci_p) bf16 -> (N, H, 2, W, 2*Cp) bf16 (free reshape to (N,2H,2W,Cp))."""
    N, H, W, Cip = x_nhwc.shape
    four_cp = w_up_r.shape[1]
    cp = four_cp // 4
    T = H // tile_h
    kernel = functools.partial(_upsample_kernel, th=tile_h, w_in=W, cp=cp)
    return pl.pallas_call(
        kernel,
        out_shape=jax.ShapeDtypeStruct((N, H, 2, W, 2 * cp), jnp.bfloat16),
        grid=(N, T),
        in_specs=[
            pl.BlockSpec((1, tile_h, W, Cip), lambda n, i: (n, i, 0, 0)),
            pl.BlockSpec((Cip, four_cp), lambda n, i: (0, 0)),     # resident weights
            pl.BlockSpec((1, four_cp), lambda n, i: (0, 0)),       # resident bias
        ],
        out_specs=pl.BlockSpec((1, tile_h, 2, W, 2 * cp),
                               lambda n, i: (n, i, 0, 0, 0)),
        compiler_params=pltpu.CompilerParams(
            dimension_semantics=("parallel", "parallel")),
    )(x_nhwc, w_up_r, b_up_r)


# ----------- kernel 2: conv1 = 3x3 conv over fused [up | skip] + stats -------

def _conv1_kernel(up_hbm, skip_hbm, wu_ref, ws_ref, y_ref, s_ref,
                  ubuf, sbuf, sem, *, th, w_out, cp_in, cp_out, n_tiles, h_total):
    n = pl.program_id(0)
    i = pl.program_id(1)
    slot = i % 2

    def copies(row_tile, buf_slot):
        return (_halo_copies(up_hbm, ubuf, sem.at[0, buf_slot], n, row_tile,
                             buf_slot, th=th, h_total=h_total)
                + _halo_copies(skip_hbm, sbuf, sem.at[1, buf_slot], n, row_tile,
                               buf_slot, th=th, h_total=h_total))

    @pl.when(i == 0)                       # prime the double buffer per image
    def _():
        for c in copies(i, slot):
            c.start()

    @pl.when(i + 1 < n_tiles)              # prefetch the next row tile
    def _():
        for c in copies(i + 1, 1 - slot):
            c.start()

    for c in copies(i, slot):              # wait for the current halo'd tile
        c.wait()

    u = _zero_border_rows(ubuf[slot], i, n_tiles, th)
    sk = _zero_border_rows(sbuf[slot], i, n_tiles, th)

    acc = jnp.zeros((th * w_out, cp_out), jnp.float32)
    acc = _conv3x3_acc(_kw_concat(u), wu_ref, th, w_out, cp_in, cp_out, acc)
    acc = _conv3x3_acc(_kw_concat(sk), ws_ref, th, w_out, cp_in, cp_out, acc)

    y_ref[0] = acc.reshape(th, w_out, cp_out).astype(y_ref.dtype)      # bf16 writeback
    # per-tile sum / sum-of-squares for the exact cross-tile BatchNorm reduction
    s_ref[0, 0, 0:1, :] = jnp.sum(acc, axis=0, keepdims=True)
    s_ref[0, 0, 1:2, :] = jnp.sum(acc * acc, axis=0, keepdims=True)


def conv1_concat_stats(up, skip, w_up_slab, w_skip_slab, *, tile_h):
    N, Ho, Wo, cp_in = up.shape
    cp_out = w_up_slab.shape[2]
    T = Ho // tile_h
    kernel = functools.partial(_conv1_kernel, th=tile_h, w_out=Wo, cp_in=cp_in,
                               cp_out=cp_out, n_tiles=T, h_total=Ho)
    return pl.pallas_call(
        kernel,
        out_shape=(jax.ShapeDtypeStruct((N, Ho, Wo, cp_out), jnp.bfloat16),
                   jax.ShapeDtypeStruct((N, T, 2, cp_out), jnp.float32)),
        grid=(N, T),
        in_specs=[
            pl.BlockSpec(memory_space=pl.ANY),                     # up (manual halo DMA)
            pl.BlockSpec(memory_space=pl.ANY),                     # skip (manual halo DMA)
            pl.BlockSpec((3, 3 * cp_in, cp_out), lambda n, i: (0, 0, 0)),
            pl.BlockSpec((3, 3 * cp_in, cp_out), lambda n, i: (0, 0, 0)),
        ],
        out_specs=(
            pl.BlockSpec((1, tile_h, Wo, cp_out), lambda n, i: (n, i, 0, 0)),
            pl.BlockSpec((1, 1, 2, cp_out), lambda n, i: (n, i, 0, 0)),
        ),
        scratch_shapes=[
            pltpu.VMEM((2, tile_h + 2, Wo, cp_in), jnp.bfloat16),  # up double buffer
            pltpu.VMEM((2, tile_h + 2, Wo, cp_in), jnp.bfloat16),  # skip double buffer
            pltpu.SemaphoreType.DMA((2, 2)),                       # (stream, slot)
        ],
        compiler_params=pltpu.CompilerParams(
            # row axis carries the manual prefetch chain -> "arbitrary";
            # batch axis is independent -> "parallel" (megacore).
            dimension_semantics=("parallel", "arbitrary"),
            vmem_limit_bytes=VMEM_LIMIT_BYTES),
    )(up, skip, w_up_slab, w_skip_slab)


# ------- kernel 3: conv2 = BN1+ReLU (fused on input) -> 3x3 conv + stats -----

def _conv2_kernel(x_hbm, sc_ref, sh_ref, w_ref, y_ref, s_ref, xbuf, sem, *,
                  th, w_out, cp_in, cp_out, n_tiles, h_total):
    n = pl.program_id(0)
    i = pl.program_id(1)
    slot = i % 2

    def copies(row_tile, buf_slot):
        return _halo_copies(x_hbm, xbuf, sem.at[buf_slot], n, row_tile, buf_slot,
                            th=th, h_total=h_total)

    @pl.when(i == 0)
    def _():
        for c in copies(i, slot):
            c.start()

    @pl.when(i + 1 < n_tiles)
    def _():
        for c in copies(i + 1, 1 - slot):
            c.start()

    for c in copies(i, slot):
        c.wait()

    # fused BN1 scale/shift + ReLU on the raw conv1 tile (rides idle VPU slots)
    scale = sc_ref[...].reshape(1, 1, cp_in)
    shift = sh_ref[...].reshape(1, 1, cp_in)
    x = jnp.maximum(xbuf[slot].astype(jnp.float32) * scale + shift, 0.0)
    # zero-pad border rows AFTER the BN apply (conv pads the activation, not bn(0))
    x = _zero_border_rows(x, i, n_tiles, th).astype(jnp.bfloat16)

    acc = jnp.zeros((th * w_out, cp_out), jnp.float32)
    acc = _conv3x3_acc(_kw_concat(x), w_ref, th, w_out, cp_in, cp_out, acc)

    y_ref[0] = acc.reshape(th, w_out, cp_out).astype(y_ref.dtype)
    s_ref[0, 0, 0:1, :] = jnp.sum(acc, axis=0, keepdims=True)
    s_ref[0, 0, 1:2, :] = jnp.sum(acc * acc, axis=0, keepdims=True)


def conv2_bnin_stats(x, scale, shift, w_slab, *, tile_h):
    N, Ho, Wo, cp_in = x.shape
    cp_out = w_slab.shape[2]
    T = Ho // tile_h
    kernel = functools.partial(_conv2_kernel, th=tile_h, w_out=Wo, cp_in=cp_in,
                               cp_out=cp_out, n_tiles=T, h_total=Ho)
    return pl.pallas_call(
        kernel,
        out_shape=(jax.ShapeDtypeStruct((N, Ho, Wo, cp_out), jnp.bfloat16),
                   jax.ShapeDtypeStruct((N, T, 2, cp_out), jnp.float32)),
        grid=(N, T),
        in_specs=[
            pl.BlockSpec(memory_space=pl.ANY),                     # raw conv1 out (bf16)
            pl.BlockSpec((1, cp_in), lambda n, i: (0, 0)),         # BN1 scale
            pl.BlockSpec((1, cp_in), lambda n, i: (0, 0)),         # BN1 shift
            pl.BlockSpec((3, 3 * cp_in, cp_out), lambda n, i: (0, 0, 0)),
        ],
        out_specs=(
            pl.BlockSpec((1, tile_h, Wo, cp_out), lambda n, i: (n, i, 0, 0)),
            pl.BlockSpec((1, 1, 2, cp_out), lambda n, i: (n, i, 0, 0)),
        ),
        scratch_shapes=[
            pltpu.VMEM((2, tile_h + 2, Wo, cp_in), jnp.bfloat16),
            pltpu.SemaphoreType.DMA((2,)),
        ],
        compiler_params=pltpu.CompilerParams(
            dimension_semantics=("parallel", "arbitrary"),
            vmem_limit_bytes=VMEM_LIMIT_BYTES),
    )(x, scale.reshape(1, cp_in), shift.reshape(1, cp_in), w_slab)


# -------------------- kernel 4: final BN scale/shift + ReLU ------------------

def _bn_relu_kernel(y_ref, sc_ref, sh_ref, o_ref):
    cp = y_ref.shape[3]
    scale = sc_ref[...].reshape(1, 1, cp)
    shift = sh_ref[...].reshape(1, 1, cp)
    o_ref[0] = jnp.maximum(y_ref[0].astype(jnp.float32) * scale + shift, 0.0
                           ).astype(o_ref.dtype)


def bn_relu_apply(y, scale, shift, *, tile_h, out_dtype):
    N, H, W, Cp = y.shape
    T = H // tile_h
    return pl.pallas_call(
        _bn_relu_kernel,
        out_shape=jax.ShapeDtypeStruct((N, H, W, Cp), out_dtype),
        grid=(N, T),
        in_specs=[
            pl.BlockSpec((1, tile_h, W, Cp), lambda n, i: (n, i, 0, 0)),
            pl.BlockSpec((1, Cp), lambda n, i: (0, 0)),
            pl.BlockSpec((1, Cp), lambda n, i: (0, 0)),
        ],
        out_specs=pl.BlockSpec((1, tile_h, W, Cp), lambda n, i: (n, i, 0, 0)),
        compiler_params=pltpu.CompilerParams(
            dimension_semantics=("parallel", "parallel")),
    )(y, scale.reshape(1, Cp), shift.reshape(1, Cp))


# ------------------------------- glue (JAX) ---------------------------------

def _bn_scale_shift(stats, gamma, beta, cp, count):
    """Reduce per-tile (sum, sumsq) to per-channel (scale, shift) for y*s+t."""
    s = jnp.sum(stats[:, :, 0, :], axis=(0, 1))
    ss = jnp.sum(stats[:, :, 1, :], axis=(0, 1))
    mean = s / count
    var = jnp.maximum(ss / count - mean * mean, 0.0)          # biased (training BN)
    scale = _pad_axis(gamma, 0, cp) * lax.rsqrt(var + EPS)
    shift = _pad_axis(beta, 0, cp) - mean * scale
    return scale.astype(jnp.float32), shift.astype(jnp.float32)


def _conv_weight_slab(w_oihw, cp_in, cp_out):
    """(Co, Ci, 3, 3) -> (3, 3*cp_in, cp_out) bf16 with rows ordered (kw, ci)."""
    w = _pad_axis(_pad_axis(w_oihw, 1, cp_in), 0, cp_out)     # (cp_out, cp_in, 3, 3)
    w = jnp.transpose(w, (2, 3, 1, 0))                        # (kh, kw, ci, co)
    return w.reshape(3, 3 * cp_in, cp_out).astype(jnp.bfloat16)


def decoder_block_forward(x_nchw, skip_nchw, params):
    """x: (N, Cin, H, W), skip: (N, Cout, 2H, 2W) -> (N, Cout, 2H, 2W)."""
    w_up, b_up = params["w_up"], params["b_up"]
    w1, g1, be1 = params["w1"], params["g1"], params["be1"]
    w2, g2, be2 = params["w2"], params["g2"], params["be2"]
    # NOTE: conv biases b1/b2 are intentionally NOT used: a per-channel constant
    # added before training-mode BatchNorm cancels exactly in the mean subtraction.

    N, Cin, H, W = x_nchw.shape
    Cout = w_up.shape[1]
    Cin_p = _round_up(Cin, LANE)
    Cp = _round_up(Cout, LANE)
    Ho, Wo = 2 * H, 2 * W
    m_rows = N * Ho * Wo

    # NCHW -> lane-padded NHWC bf16 (at model scope these transposes happen once)
    x_nhwc = _pad_axis(jnp.transpose(x_nchw, (0, 2, 3, 1)), 3, Cin_p).astype(jnp.bfloat16)
    skip_nhwc = _pad_axis(jnp.transpose(skip_nchw, (0, 2, 3, 1)), 3, Cp).astype(jnp.bfloat16)

    # ConvTranspose2d(k=2, s=2) weight -> (Cin_p, 4*Cp), columns = (dh, dw, co)
    w_up_r = jnp.transpose(w_up, (0, 2, 3, 1))                # (Cin, 2, 2, Cout)
    w_up_r = _pad_axis(_pad_axis(w_up_r, 3, Cp), 0, Cin_p)
    w_up_r = w_up_r.reshape(Cin_p, 4 * Cp).astype(jnp.bfloat16)
    b_up_r = jnp.tile(_pad_axis(b_up, 0, Cp), (4,)).reshape(1, 4 * Cp).astype(jnp.float32)

    # ---- upsample (no concat materialized) --------------------------------
    tile_up = _pick_tile(H, UP_TILE_CAP)
    up6 = upsample_k2s2(x_nhwc, w_up_r, b_up_r, tile_h=tile_up)
    up = up6.reshape(N, Ho, Wo, Cp)                           # free contiguous reshape

    # ---- conv1 over fused [up | skip], emitting raw bf16 + BN stats --------
    w1_up_slab = _conv_weight_slab(w1[:, :Cout], Cp, Cp)      # acts on the up channels
    w1_skip_slab = _conv_weight_slab(w1[:, Cout:], Cp, Cp)    # acts on the skip channels
    tile_c = _pick_tile(Ho, CONV_TILE_CAP)
    y1, st1 = conv1_concat_stats(up, skip_nhwc, w1_up_slab, w1_skip_slab, tile_h=tile_c)
    sc1, sh1 = _bn_scale_shift(st1, g1, be1, Cp, m_rows)

    # ---- conv2 with BN1+ReLU fused on its input ----------------------------
    w2_slab = _conv_weight_slab(w2, Cp, Cp)
    y2, st2 = conv2_bnin_stats(y1, sc1, sh1, w2_slab, tile_h=tile_c)
    sc2, sh2 = _bn_scale_shift(st2, g2, be2, Cp, m_rows)

    # ---- final BN + ReLU (block output) ------------------------------------
    o2 = bn_relu_apply(y2, sc2, sh2, tile_h=tile_c, out_dtype=jnp.float32)
    return jnp.transpose(o2[..., :Cout], (0, 3, 1, 2))        # back to NCHW


# --------------------------- pure-JAX reference -----------------------------

def _bn_relu_ref(y_nchw, gamma, beta):
    mu = jnp.mean(y_nchw, axis=(0, 2, 3), keepdims=True)
    var = jnp.mean((y_nchw - mu) ** 2, axis=(0, 2, 3), keepdims=True)
    y_hat = (y_nchw - mu) * lax.rsqrt(var + EPS)
    return jnp.maximum(y_hat * gamma.reshape(1, -1, 1, 1) + beta.reshape(1, -1, 1, 1), 0.0)


def decoder_block_reference(x, skip, params):
    """Mirrors PyTorch semantics; uses the same bf16 operand quantization."""
    w_up, b_up = params["w_up"], params["b_up"]
    up = jnp.einsum("nchw,codk->nohdwk",
                    x.astype(jnp.bfloat16), w_up.astype(jnp.bfloat16),
                    preferred_element_type=jnp.float32)
    N, Co, H, _, W, _ = up.shape
    up = up.reshape(N, Co, 2 * H, 2 * W) + b_up.reshape(1, -1, 1, 1)
    cat = jnp.concatenate([up, skip], axis=1).astype(jnp.bfloat16)

    dn = ("NCHW", "OIHW", "NCHW")
    c1 = lax.conv_general_dilated(cat, params["w1"].astype(jnp.bfloat16),
                                  (1, 1), "SAME", dimension_numbers=dn,
                                  preferred_element_type=jnp.float32)
    c1 = c1 + params["b1"].reshape(1, -1, 1, 1)
    o1 = _bn_relu_ref(c1, params["g1"], params["be1"]).astype(jnp.bfloat16)
    c2 = lax.conv_general_dilated(o1, params["w2"].astype(jnp.bfloat16),
                                  (1, 1), "SAME", dimension_numbers=dn,
                                  preferred_element_type=jnp.float32)
    c2 = c2 + params["b2"].reshape(1, -1, 1, 1)
    return _bn_relu_ref(c2, params["g2"], params["be2"])


# ----------------------------------- main -----------------------------------

if __name__ == "__main__":
    key = jax.random.PRNGKey(0)
    N, Cin, Cout, H, W = 2, 8, 4, 8, 8

    ks = jax.random.split(key, 10)
    params = {
        # ConvTranspose2d weight: (in_channels, out_channels, 2, 2)
        "w_up": 0.1 * jax.random.normal(ks[0], (Cin, Cout, 2, 2), jnp.float32),
        "b_up": 0.1 * jax.random.normal(ks[1], (Cout,), jnp.float32),
        # conv1: (Cout, 2*Cout, 3, 3)
        "w1": 0.1 * jax.random.normal(ks[2], (Cout, 2 * Cout, 3, 3), jnp.float32),
        "b1": 0.1 * jax.random.normal(ks[3], (Cout,), jnp.float32),
        "g1": jnp.ones((Cout,), jnp.float32),
        "be1": jnp.zeros((Cout,), jnp.float32),
        # conv2: (Cout, Cout, 3, 3)
        "w2": 0.1 * jax.random.normal(ks[4], (Cout, Cout, 3, 3), jnp.float32),
        "b2": 0.1 * jax.random.normal(ks[5], (Cout,), jnp.float32),
        "g2": jnp.ones((Cout,), jnp.float32),
        "be2": jnp.zeros((Cout,), jnp.float32),
    }

    x = jax.random.normal(ks[6], (N, Cin, H, W), jnp.float32)
    skip = jax.random.normal(ks[7], (N, Cout, 2 * H, 2 * W), jnp.float32)

    out = jax.jit(decoder_block_forward)(x, skip, params)
    out = jax.block_until_ready(out)

    ref = decoder_block_reference(x, skip, params)
    assert out.shape == (N, Cout, 2 * H, 2 * W), out.shape
    max_err = float(jnp.max(jnp.abs(out - ref)))
    assert jnp.allclose(out, ref, atol=3e-2, rtol=3e-2), max_err

    print("KERNEL_OK")
</pallas_src>

<mosaic_0001>
module attributes {stable_mosaic.version = 11 : i64} {
  func.func @_upsample_kernel(%arg0: i32, %arg1: i32, %arg2: memref<1x8x8x128xbf16, #tpu.memory_space<vmem>>, %arg3: memref<128x512xbf16, #tpu.memory_space<vmem>>, %arg4: memref<1x512xf32, #tpu.memory_space<vmem>>, %arg5: memref<1x8x2x8x256xbf16, #tpu.memory_space<vmem>>) attributes {dimension_semantics = [#tpu.dimension_semantics<parallel>, #tpu.dimension_semantics<parallel>], iteration_bounds = array<i64: 2, 1>, scalar_prefetch = 0 : i64, scratch_operands = 0 : i64, tpu.core_type = #tpu.core_type<tc>, window_params = [{transform_indices = @transform_0, window_bounds = array<i64: 1, 8, 8, 128>}, {pipeline_mode = #tpu.pipeline_mode<synchronous>, transform_indices = @transform_1, window_bounds = array<i64: 128, 512>}, {pipeline_mode = #tpu.pipeline_mode<synchronous>, transform_indices = @transform_2, window_bounds = array<i64: 1, 512>}, {transform_indices = @transform_3, window_bounds = array<i64: 1, 8, 2, 8, 256>}]} {
    %c0 = arith.constant 0 : index
    %c0_0 = arith.constant 0 : index
    %c0_1 = arith.constant 0 : index
    %c0_2 = arith.constant 0 : index
    %0 = vector.load %arg2[%c0, %c0_0, %c0_1, %c0_2] : memref<1x8x8x128xbf16, #tpu.memory_space<vmem>>, vector<1x8x8x128xbf16>
    %1 = vector.shape_cast %0 : vector<1x8x8x128xbf16> to vector<8x8x128xbf16>
    %2 = vector.shape_cast %1 : vector<8x8x128xbf16> to vector<64x128xbf16>
    %c0_3 = arith.constant 0 : index
    %c0_4 = arith.constant 0 : index
    %3 = vector.load %arg3[%c0_3, %c0_4] : memref<128x512xbf16, #tpu.memory_space<vmem>>, vector<128x512xbf16>
    %cst = arith.constant dense<0.000000e+00> : vector<64x512xf32>
    %4 = tpu.matmul %2, %3, %cst {dimension_numbers = #tpu.dot_dimension_numbers<[1], [0], [0], [1], [0, 0, 1, 1], [], []>} : vector<64x128xbf16>, vector<128x512xbf16>, vector<64x512xf32> -> vector<64x512xf32>
    %c0_5 = arith.constant 0 : index
    %c0_6 = arith.constant 0 : index
    %5 = vector.load %arg4[%c0_5, %c0_6] : memref<1x512xf32, #tpu.memory_space<vmem>>, vector<1x512xf32>
    %6 = vector.broadcast %5 : vector<1x512xf32> to vector<64x512xf32>
    %7 = arith.addf %4, %6 : vector<64x512xf32>
    %8 = vector.extract_strided_slice %7 {offsets = [0, 0], sizes = [64, 256], strides = [1, 1]} : vector<64x512xf32> to vector<64x256xf32>
    %9 = vector.shape_cast %8 : vector<64x256xf32> to vector<8x8x256xf32>
    %10 = arith.truncf %9 : vector<8x8x256xf32> to vector<8x8x256xbf16>
    %c0_7 = arith.constant 0 : index
    %c0_8 = arith.constant 0 : index
    %c0_9 = arith.constant 0 : index
    %c0_10 = arith.constant 0 : index
    %c0_11 = arith.constant 0 : index
    %11 = vector.load %arg5[%c0_7, %c0_8, %c0_9, %c0_10, %c0_11] : memref<1x8x2x8x256xbf16, #tpu.memory_space<vmem>>, vector<1x8x1x8x256xbf16>
    %12 = vector.shape_cast %11 : vector<1x8x1x8x256xbf16> to vector<8x8x256xbf16>
    %13 = vector.shape_cast %10 : vector<8x8x256xbf16> to vector<1x8x1x8x256xbf16>
    tpu.vector_store %arg5[%c0_7, %c0_8, %c0_9, %c0_10, %c0_11], %13 {strides = array<i32>} : memref<1x8x2x8x256xbf16, #tpu.memory_space<vmem>>, vector<1x8x1x8x256xbf16>,
    %14 = vector.extract_strided_slice %7 {offsets = [0, 256], sizes = [64, 256], strides = [1, 1]} : vector<64x512xf32> to vector<64x256xf32>
    %15 = vector.shape_cast %14 : vector<64x256xf32> to vector<8x8x256xf32>
    %16 = arith.truncf %15 : vector<8x8x256xf32> to vector<8x8x256xbf16>
    %c0_12 = arith.constant 0 : index
    %c0_13 = arith.constant 0 : index
    %c1 = arith.constant 1 : index
    %c0_14 = arith.constant 0 : index
    %c0_15 = arith.constant 0 : index
    %17 = vector.load %arg5[%c0_12, %c0_13, %c1, %c0_14, %c0_15] : memref<1x8x2x8x256xbf16, #tpu.memory_space<vmem>>, vector<1x8x1x8x256xbf16>
    %18 = vector.shape_cast %17 : vector<1x8x1x8x256xbf16> to vector<8x8x256xbf16>
    %19 = vector.shape_cast %16 : vector<8x8x256xbf16> to vector<1x8x1x8x256xbf16>
    tpu.vector_store %arg5[%c0_12, %c0_13, %c1, %c0_14, %c0_15], %19 {strides = array<i32>} : memref<1x8x2x8x256xbf16, #tpu.memory_space<vmem>>, vector<1x8x1x8x256xbf16>,
    return
  }
  func.func @transform_0(%arg0: i32, %arg1: i32) -> (i32, i32, i32, i32) {
    %c0_i32 = arith.constant 0 : i32
    %c0_i32_0 = arith.constant 0 : i32
    %c0_i32_1 = arith.constant 0 : i32
    return %arg0, %arg1, %c0_i32, %c0_i32_0 : i32, i32, i32, i32
  }
  func.func @transform_1(%arg0: i32, %arg1: i32) -> (i32, i32) {
    %c0_i32 = arith.constant 0 : i32
    %c0_i32_0 = arith.constant 0 : i32
    %c0_i32_1 = arith.constant 0 : i32
    return %c0_i32, %c0_i32_0 : i32, i32
  }
  func.func @transform_2(%arg0: i32, %arg1: i32) -> (i32, i32) {
    %c0_i32 = arith.constant 0 : i32
    %c0_i32_0 = arith.constant 0 : i32
    %c0_i32_1 = arith.constant 0 : i32
    return %c0_i32, %c0_i32_0 : i32, i32
  }
  func.func @transform_3(%arg0: i32, %arg1: i32) -> (i32, i32, i32, i32, i32) {
    %c0_i32 = arith.constant 0 : i32
    %c0_i32_0 = arith.constant 0 : i32
    %c0_i32_1 = arith.constant 0 : i32
    %c0_i32_2 = arith.constant 0 : i32
    return %arg0, %arg1, %c0_i32, %c0_i32_0, %c0_i32_1 : i32, i32, i32, i32, i32
  }
}

module attributes {stable_mosaic.version = 11 : i64} {
  func.func @_conv1_kernel(%arg0: i32, %arg1: i32, %arg2: memref<2x16x16x128xbf16, #tpu.memory_space<any>>, %arg3: memref<2x16x16x128xbf16, #tpu.memory_space<any>>, %arg4: memref<3x384x128xbf16, #tpu.memory_space<vmem>>, %arg5: memref<3x384x128xbf16, #tpu.memory_space<vmem>>, %arg6: memref<1x8x16x128xbf16, #tpu.memory_space<vmem>>, %arg7: memref<1x1x2x128xf32, #tpu.memory_space<vmem>>, %arg8: memref<2x10x16x128xbf16, #tpu.memory_space<vmem>>, %arg9: memref<2x10x16x128xbf16, #tpu.memory_space<vmem>>, %arg10: memref<2x2x!tpu.dma_semaphore, #tpu.memory_space<semaphore_mem>>) attributes {dimension_semantics = [#tpu.dimension_semantics<parallel>, #tpu.dimension_semantics<arbitrary>], iteration_bounds = array<i64: 2, 2>, scalar_prefetch = 0 : i64, scratch_operands = 3 : i64, tpu.core_type = #tpu.core_type<tc>, window_params = [{}, {}, {pipeline_mode = #tpu.pipeline_mode<synchronous>, transform_indices = @transform_2, window_bounds = array<i64: 3, 384, 128>}, {pipeline_mode = #tpu.pipeline_mode<synchronous>, transform_indices = @transform_3, window_bounds = array<i64: 3, 384, 128>}, {transform_indices = @transform_4, window_bounds = array<i64: 1, 8, 16, 128>}, {transform_indices = @transform_5, window_bounds = array<i64: 1, 1, 2, 128>}]} {
    %c2_i32 = arith.constant 2 : i32
    %c0_i32 = arith.constant 0 : i32
    %0 = arith.cmpi eq, %c2_i32, %c0_i32 : i32
    %c1_i32 = arith.constant 1 : i32
    %1 = arith.select %0, %c1_i32, %c2_i32 : i32
    %2 = arith.remsi %arg1, %1 : i32
    %c0_i32_0 = arith.constant 0 : i32
    %3 = arith.cmpi ne, %2, %c0_i32_0 : i32
    %c0_i32_1 = arith.constant 0 : i32
    %4 = arith.cmpi slt, %2, %c0_i32_1 : i32
    %c0_i32_2 = arith.constant 0 : i32
    %5 = arith.cmpi slt, %1, %c0_i32_2 : i32
    %6 = arith.xori %4, %5 : i1
    %7 = arith.andi %6, %3 : i1
    %8 = arith.addi %2, %1 : i32
    %9 = arith.select %7, %8, %2 : i32
    %c0_i32_3 = arith.constant 0 : i32
    %10 = arith.cmpi eq, %arg1, %c0_i32_3 : i32
    %11 = arith.extui %10 : i1 to i32
    %c0_i32_4 = arith.constant 0 : i32
    %12 = arith.cmpi ne, %11, %c0_i32_4 : i32
    scf.if %12 {
      %c8_i32_108 = arith.constant 8 : i32
      %164 = arith.muli %arg1, %c8_i32_108 : i32
      %c1_i32_109 = arith.constant 1 : i32
      %165 = arith.subi %164, %c1_i32_109 : i32
      %c0_i32_110 = arith.constant 0 : i32
      %166 = arith.maxsi %165, %c0_i32_110 : i32
      %c8_i32_111 = arith.constant 8 : i32
      %167 = arith.muli %arg1, %c8_i32_111 : i32
      %c8_i32_112 = arith.constant 8 : i32
      %168 = arith.addi %167, %c8_i32_112 : i32
      %c15_i32_113 = arith.constant 15 : i32
      %169 = arith.minsi %168, %c15_i32_113 : i32
      %c8_i32_114 = arith.constant 8 : i32
      %170 = arith.muli %arg1, %c8_i32_114 : i32
      %c8_i32_115 = arith.constant 8 : i32
      %171 = arith.muli %arg1, %c8_i32_115 : i32
      %c1_i32_116 = arith.constant 1 : i32
      %172 = arith.subi %171, %c1_i32_116 : i32
      %c0_i32_117 = arith.constant 0 : i32
      %173 = arith.maxsi %172, %c0_i32_117 : i32
      %c8_i32_118 = arith.constant 8 : i32
      %174 = arith.muli %arg1, %c8_i32_118 : i32
      %c8_i32_119 = arith.constant 8 : i32
      %175 = arith.addi %174, %c8_i32_119 : i32
      %c15_i32_120 = arith.constant 15 : i32
      %176 = arith.minsi %175, %c15_i32_120 : i32
      %c8_i32_121 = arith.constant 8 : i32
      %177 = arith.muli %arg1, %c8_i32_121 : i32
      %c0_i32_122 = arith.constant 0 : i32
      %c0_i32_123 = arith.constant 0 : i32
      %c0_i32_124 = arith.constant 0 : i32
      %178 = tpu.memref_slice %arg2[%arg0, %170, %c0_i32_123, %c0_i32_124] : memref<2x16x16x128xbf16, #tpu.memory_space<any>> -> memref<1x8x16x128xbf16, #tpu.memory_space<any>>
      %179 = tpu.memref_squeeze %178 : memref<1x8x16x128xbf16, #tpu.memory_space<any>> -> memref<8x16x128xbf16, #tpu.memory_space<any>>
      %c1_i32_125 = arith.constant 1 : i32
      %c0_i32_126 = arith.constant 0 : i32
      %c0_i32_127 = arith.constant 0 : i32
      %180 = tpu.memref_slice %arg8[%9, %c1_i32_125, %c0_i32_126, %c0_i32_127] : memref<2x10x16x128xbf16, #tpu.memory_space<vmem>> -> memref<1x8x16x128xbf16, #tpu.memory_space<vmem>>
      %181 = tpu.memref_squeeze %180 : memref<1x8x16x128xbf16, #tpu.memory_space<vmem>> -> memref<8x16x128xbf16, #tpu.memory_space<vmem>>
      %182 = tpu.memref_slice %arg10[%c0_i32_122, %9] : memref<2x2x!tpu.dma_semaphore, #tpu.memory_space<semaphore_mem>> -> memref<1x1x!tpu.dma_semaphore, #tpu.memory_space<semaphore_mem>>
      %183 = tpu.memref_squeeze %182 : memref<1x1x!tpu.dma_semaphore, #tpu.memory_space<semaphore_mem>> -> memref<!tpu.dma_semaphore, #tpu.memory_space<semaphore_mem>>
      tpu.enqueue_dma source(%179 : memref<8x16x128xbf16, #tpu.memory_space<any>>) target(%181 : memref<8x16x128xbf16, #tpu.memory_space<vmem>>) target_semaphore(%183 : memref<!tpu.dma_semaphore, #tpu.memory_space<semaphore_mem>>)
      %c0_i32_128 = arith.constant 0 : i32
      %c0_i32_129 = arith.constant 0 : i32
      %c0_i32_130 = arith.constant 0 : i32
      %184 = tpu.memref_slice %arg2[%arg0, %166, %c0_i32_129, %c0_i32_130] : memref<2x16x16x128xbf16, #tpu.memory_space<any>> -> memref<1x1x16x128xbf16, #tpu.memory_space<any>>
      %185 = tpu.memref_squeeze %184 : memref<1x1x16x128xbf16, #tpu.memory_space<any>> -> memref<1x16x128xbf16, #tpu.memory_space<any>>
      %c0_i32_131 = arith.constant 0 : i32
      %c0_i32_132 = arith.constant 0 : i32
      %c0_i32_133 = arith.constant 0 : i32
      %186 = tpu.memref_slice %arg8[%9, %c0_i32_131, %c0_i32_132, %c0_i32_133] : memref<2x10x16x128xbf16, #tpu.memory_space<vmem>> -> memref<1x1x16x128xbf16, #tpu.memory_space<vmem>>
      %187 = tpu.memref_squeeze %186 : memref<1x1x16x128xbf16, #tpu.memory_space<vmem>> -> memref<1x16x128xbf16, #tpu.memory_space<vmem>>
      %188 = tpu.memref_slice %arg10[%c0_i32_128, %9] : memref<2x2x!tpu.dma_semaphore, #tpu.memory_space<semaphore_mem>> -> memref<1x1x!tpu.dma_semaphore, #tpu.memory_space<semaphore_mem>>
      %189 = tpu.memref_squeeze %188 : memref<1x1x!tpu.dma_semaphore, #tpu.memory_space<semaphore_mem>> -> memref<!tpu.dma_semaphore, #tpu.memory_space<semaphore_mem>>
      tpu.enqueue_dma source(%185 : memref<1x16x128xbf16, #tpu.memory_space<any>>) target(%187 : memref<1x16x128xbf16, #tpu.memory_space<vmem>>) target_semaphore(%189 : memref<!tpu.dma_semaphore, #tpu.memory_space<semaphore_mem>>)
      %c0_i32_134 = arith.constant 0 : i32
      %c0_i32_135 = arith.constant 0 : i32
      %c0_i32_136 = arith.constant 0 : i32
      %190 = tpu.memref_slice %arg2[%arg0, %169, %c0_i32_135, %c0_i32_136] : memref<2x16x16x128xbf16, #tpu.memory_space<any>> -> memref<1x1x16x128xbf16, #tpu.memory_space<any>>
      %191 = tpu.memref_squeeze %190 : memref<1x1x16x128xbf16, #tpu.memory_space<any>> -> memref<1x16x128xbf16, #tpu.memory_space<any>>
      %c9_i32_137 = arith.constant 9 : i32
      %c0_i32_138 = arith.constant 0 : i32
      %c0_i32_139 = arith.constant 0 : i32
      %192 = tpu.memref_slice %arg8[%9, %c9_i32_137, %c0_i32_138, %c0_i32_139] : memref<2x10x16x128xbf16, #tpu.memory_space<vmem>> -> memref<1x1x16x128xbf16, #tpu.memory_space<vmem>>
      %193 = tpu.memref_squeeze %192 : memref<1x1x16x128xbf16, #tpu.memory_space<vmem>> -> memref<1x16x128xbf16, #tpu.memory_space<vmem>>
      %194 = tpu.memref_slice %arg10[%c0_i32_134, %9] : memref<2x2x!tpu.dma_semaphore, #tpu.memory_space<semaphore_mem>> -> memref<1x1x!tpu.dma_semaphore, #tpu.memory_space<semaphore_mem>>
      %195 = tpu.memref_squeeze %194 : memref<1x1x!tpu.dma_semaphore, #tpu.memory_space<semaphore_mem>> -> memref<!tpu.dma_semaphore, #tpu.memory_space<semaphore_mem>>
      tpu.enqueue_dma source(%191 : memref<1x16x128xbf16, #tpu.memory_space<any>>) target(%193 : memref<1x16x128xbf16, #tpu.memory_space<vmem>>) target_semaphore(%195 : memref<!tpu.dma_semaphore, #tpu.memory_space<semaphore_mem>>)
      %c1_i32_140 = arith.constant 1 : i32
      %c0_i32_141 = arith.constant 0 : i32
      %c0_i32_142 = arith.constant 0 : i32
      %196 = tpu.memref_slice %arg3[%arg0, %177, %c0_i32_141, %c0_i32_142] : memref<2x16x16x128xbf16, #tpu.memory_space<any>> -> memref<1x8x16x128xbf16, #tpu.memory_space<any>>
      %197 = tpu.memref_squeeze %196 : memref<1x8x16x128xbf16, #tpu.memory_space<any>> -> memref<8x16x128xbf16, #tpu.memory_space<any>>
      %c1_i32_143 = arith.constant 1 : i32
      %c0_i32_144 = arith.constant 0 : i32
      %c0_i32_145 = arith.constant 0 : i32
      %198 = tpu.memref_slice %arg9[%9, %c1_i32_143, %c0_i32_144, %c0_i32_145] : memref<2x10x16x128xbf16, #tpu.memory_space<vmem>> -> memref<1x8x16x128xbf16, #tpu.memory_space<vmem>>
      %199 = tpu.memref_squeeze %198 : memref<1x8x16x128xbf16, #tpu.memory_space<vmem>> -> memref<8x16x128xbf16, #tpu.memory_space<vmem>>
      %200 = tpu.memref_slice %arg10[%c1_i32_140, %9] : memref<2x2x!tpu.dma_semaphore, #tpu.memory_space<semaphore_mem>> -> memref<1x1x!tpu.dma_semaphore, #tpu.memory_space<semaphore_mem>>
      %201 = tpu.memref_squeeze %200 : memref<1x1x!tpu.dma_semaphore, #tpu.memory_space<semaphore_mem>> -> memref<!tpu.dma_semaphore, #tpu.memory_space<semaphore_mem>>
      tpu.enqueue_dma source(%197 : memref<8x16x128xbf16, #tpu.memory_space<any>>) target(%199 : memref<8x16x128xbf16, #tpu.memory_space<vmem>>) target_semaphore(%201 : memref<!tpu.dma_semaphore, #tpu.memory_space<semaphore_mem>>)
      %c1_i32_146 = arith.constant 1 : i32
      %c0_i32_147 = arith.constant 0 : i32
      %c0_i32_148 = arith.constant 0 : i32
      %202 = tpu.memref_slice %arg3[%arg0, %173, %c0_i32_147, %c0_i32_148] : memref<2x16x16x128xbf16, #tpu.memory_space<any>> -> memref<1x1x16x128xbf16, #tpu.memory_space<any>>
      %203 = tpu.memref_squeeze %202 : memref<1x1x16x128xbf16, #tpu.memory_space<any>> -> memref<1x16x128xbf16, #tpu.memory_space<any>>
      %c0_i32_149 = arith.constant 0 : i32
      %c0_i32_150 = arith.constant 0 : i32
      %c0_i32_151 = arith.constant 0 : i32
      %204 = tpu.memref_slice %arg9[%9, %c0_i32_149, %c0_i32_150, %c0_i32_151] : memref<2x10x16x128xbf16, #tpu.memory_space<vmem>> -> memref<1x1x16x128xbf16, #tpu.memory_space<vmem>>
      %205 = tpu.memref_squeeze %204 : memref<1x1x16x128xbf16, #tpu.memory_space<vmem>> -> memref<1x16x128xbf16, #tpu.memory_space<vmem>>
      %206 = tpu.memref_slice %arg10[%c1_i32_146, %9] : memref<2x2x!tpu.dma_semaphore, #tpu.memory_space<semaphore_mem>> -> memref<1x1x!tpu.dma_semaphore, #tpu.memory_space<semaphore_mem>>
      %207 = tpu.memref_squeeze %206 : memref<1x1x!tpu.dma_semaphore, #tpu.memory_space<semaphore_mem>> -> memref<!tpu.dma_semaphore, #tpu.memory_space<semaphore_mem>>
      tpu.enqueue_dma source(%203 : memref<1x16x128xbf16, #tpu.memory_space<any>>) target(%205 : memref<1x16x128xbf16, #tpu.memory_space<vmem>>) target_semaphore(%207 : memref<!tpu.dma_semaphore, #tpu.memory_space<semaphore_mem>>)
      %c1_i32_152 = arith.constant 1 : i32
      %c0_i32_153 = arith.constant 0 : i32
      %c0_i32_154 = arith.constant 0 : i32
      %208 = tpu.memref_slice %arg3[%arg0, %176, %c0_i32_153, %c0_i32_154] : memref<2x16x16x128xbf16, #tpu.memory_space<any>> -> memref<1x1x16x128xbf16, #tpu.memory_space<any>>
      %209 = tpu.memref_squeeze %208 : memref<1x1x16x128xbf16, #tpu.memory_space<any>> -> memref<1x16x128xbf16, #tpu.memory_space<any>>
      %c9_i32_155 = arith.constant 9 : i32
      %c0_i32_156 = arith.constant 0 : i32
      %c0_i32_157 = arith.constant 0 : i32
      %210 = tpu.memref_slice %arg9[%9, %c9_i32_155, %c0_i32_156, %c0_i32_157] : memref<2x10x16x128xbf16, #tpu.memory_space<vmem>> -> memref<1x1x16x128xbf16, #tpu.memory_space<vmem>>
      %211 = tpu.memref_squeeze %210 : memref<1x1x16x128xbf16, #tpu.memory_space<vmem>> -> memref<1x16x128xbf16, #tpu.memory_space<vmem>>
      %212 = tpu.memref_slice %arg10[%c1_i32_152, %9] : memref<2x2x!tpu.dma_semaphore, #tpu.memory_space<semaphore_mem>> -> memref<1x1x!tpu.dma_semaphore, #tpu.memory_space<semaphore_mem>>
      %213 = tpu.memref_squeeze %212 : memref<1x1x!tpu.dma_semaphore, #tpu.memory_space<semaphore_mem>> -> memref<!tpu.dma_semaphore, #tpu.memory_space<semaphore_mem>>
      tpu.enqueue_dma source(%209 : memref<1x16x128xbf16, #tpu.memory_space<any>>) target(%211 : memref<1x16x128xbf16, #tpu.memory_space<vmem>>) target_semaphore(%213 : memref<!tpu.dma_semaphore, #tpu.memory_space<semaphore_mem>>)
    } else {
    }
    %c1_i32_5 = arith.constant 1 : i32
    %13 = arith.addi %arg1, %c1_i32_5 : i32
    %c2_i32_6 = arith.constant 2 : i32
    %14 = arith.cmpi slt, %13, %c2_i32_6 : i32
    %15 = arith.extui %14 : i1 to i32
    %c0_i32_7 = arith.constant 0 : i32
    %16 = arith.cmpi ne, %15, %c0_i32_7 : i32
    scf.if %16 {
      %c1_i32_108 = arith.constant 1 : i32
      %164 = arith.addi %arg1, %c1_i32_108 : i32
      %c1_i32_109 = arith.constant 1 : i32
      %165 = arith.subi %c1_i32_109, %9 : i32
      %c8_i32_110 = arith.constant 8 : i32
      %166 = arith.muli %164, %c8_i32_110 : i32
      %c1_i32_111 = arith.constant 1 : i32
      %167 = arith.subi %166, %c1_i32_111 : i32
      %c0_i32_112 = arith.constant 0 : i32
      %168 = arith.maxsi %167, %c0_i32_112 : i32
      %c8_i32_113 = arith.constant 8 : i32
      %169 = arith.muli %164, %c8_i32_113 : i32
      %c8_i32_114 = arith.constant 8 : i32
      %170 = arith.addi %169, %c8_i32_114 : i32
      %c15_i32_115 = arith.constant 15 : i32
      %171 = arith.minsi %170, %c15_i32_115 : i32
      %c8_i32_116 = arith.constant 8 : i32
      %172 = arith.muli %164, %c8_i32_116 : i32
      %c8_i32_117 = arith.constant 8 : i32
      %173 = arith.muli %164, %c8_i32_117 : i32
      %c1_i32_118 = arith.constant 1 : i32
      %174 = arith.subi %173, %c1_i32_118 : i32
      %c0_i32_119 = arith.constant 0 : i32
      %175 = arith.maxsi %174, %c0_i32_119 : i32
      %c8_i32_120 = arith.constant 8 : i32
      %176 = arith.muli %164, %c8_i32_120 : i32
      %c8_i32_121 = arith.constant 8 : i32
      %177 = arith.addi %176, %c8_i32_121 : i32
      %c15_i32_122 = arith.constant 15 : i32
      %178 = arith.minsi %177, %c15_i32_122 : i32
      %c8_i32_123 = arith.constant 8 : i32
      %179 = arith.muli %164, %c8_i32_123 : i32
      %c0_i32_124 = arith.constant 0 : i32
      %c0_i32_125 = arith.constant 0 : i32
      %c0_i32_126 = arith.constant 0 : i32
      %180 = tpu.memref_slice %arg2[%arg0, %172, %c0_i32_125, %c0_i32_126] : memref<2x16x16x128xbf16, #tpu.memory_space<any>> -> memref<1x8x16x128xbf16, #tpu.memory_space<any>>
      %181 = tpu.memref_squeeze %180 : memref<1x8x16x128xbf16, #tpu.memory_space<any>> -> memref<8x16x128xbf16, #tpu.memory_space<any>>
      %c1_i32_127 = arith.constant 1 : i32
      %c0_i32_128 = arith.constant 0 : i32
      %c0_i32_129 = arith.constant 0 : i32
      %182 = tpu.memref_slice %arg8[%165, %c1_i32_127, %c0_i32_128, %c0_i32_129] : memref<2x10x16x128xbf16, #tpu.memory_space<vmem>> -> memref<1x8x16x128xbf16, #tpu.memory_space<vmem>>
      %183 = tpu.memref_squeeze %182 : memref<1x8x16x128xbf16, #tpu.memory_space<vmem>> -> memref<8x16x128xbf16, #tpu.memory_space<vmem>>
      %184 = tpu.memref_slice %arg10[%c0_i32_124, %165] : memref<2x2x!tpu.dma_semaphore, #tpu.memory_space<semaphore_mem>> -> memref<1x1x!tpu.dma_semaphore, #tpu.memory_space<semaphore_mem>>
      %185 = tpu.memref_squeeze %184 : memref<1x1x!tpu.dma_semaphore, #tpu.memory_space<semaphore_mem>> -> memref<!tpu.dma_semaphore, #tpu.memory_space<semaphore_mem>>
      tpu.enqueue_dma source(%181 : memref<8x16x128xbf16, #tpu.memory_space<any>>) target(%183 : memref<8x16x128xbf16, #tpu.memory_space<vmem>>) target_semaphore(%185 : memref<!tpu.dma_semaphore, #tpu.memory_space<semaphore_mem>>)
      %c0_i32_130 = arith.constant 0 : i32
      %c0_i32_131 = arith.constant 0 : i32
      %c0_i32_132 = arith.constant 0 : i32
      %186 = tpu.memref_slice %arg2[%arg0, %168, %c0_i32_131, %c0_i32_132] : memref<2x16x16x128xbf16, #tpu.memory_space<any>> -> memref<1x1x16x128xbf16, #tpu.memory_space<any>>
      %187 = tpu.memref_squeeze %186 : memref<1x1x16x128xbf16, #tpu.memory_space<any>> -> memref<1x16x128xbf16, #tpu.memory_space<any>>
      %c0_i32_133 = arith.constant 0 : i32
      %c0_i32_134 = arith.constant 0 : i32
      %c0_i32_135 = arith.constant 0 : i32
      %188 = tpu.memref_slice %arg8[%165, %c0_i32_133, %c0_i32_134, %c0_i32_135] : memref<2x10x16x128xbf16, #tpu.memory_space<vmem>> -> memref<1x1x16x128xbf16, #tpu.memory_space<vmem>>
      %189 = tpu.memref_squeeze %188 : memref<1x1x16x128xbf16, #tpu.memory_space<vmem>> -> memref<1x16x128xbf16, #tpu.memory_space<vmem>>
      %190 = tpu.memref_slice %arg10[%c0_i32_130, %165] : memref<2x2x!tpu.dma_semaphore, #tpu.memory_space<semaphore_mem>> -> memref<1x1x!tpu.dma_semaphore, #tpu.memory_space<semaphore_mem>>
      %191 = tpu.memref_squeeze %190 : memref<1x1x!tpu.dma_semaphore, #tpu.memory_space<semaphore_mem>> -> memref<!tpu.dma_semaphore, #tpu.memory_space<semaphore_mem>>
      tpu.enqueue_dma source(%187 : memref<1x16x128xbf16, #tpu.memory_space<any>>) target(%189 : memref<1x16x128xbf16, #tpu.memory_space<vmem>>) target_semaphore(%191 : memref<!tpu.dma_semaphore, #tpu.memory_space<semaphore_mem>>)
      %c0_i32_136 = arith.constant 0 : i32
      %c0_i32_137 = arith.constant 0 : i32
      %c0_i32_138 = arith.constant 0 : i32
      %192 = tpu.memref_slice %arg2[%arg0, %171, %c0_i32_137, %c0_i32_138] : memref<2x16x16x128xbf16, #tpu.memory_space<any>> -> memref<1x1x16x128xbf16, #tpu.memory_space<any>>
      %193 = tpu.memref_squeeze %192 : memref<1x1x16x128xbf16, #tpu.memory_space<any>> -> memref<1x16x128xbf16, #tpu.memory_space<any>>
      %c9_i32_139 = arith.constant 9 : i32
      %c0_i32_140 = arith.constant 0 : i32
      %c0_i32_141 = arith.constant 0 : i32
      %194 = tpu.memref_slice %arg8[%165, %c9_i32_139, %c0_i32_140, %c0_i32_141] : memref<2x10x16x128xbf16, #tpu.memory_space<vmem>> -> memref<1x1x16x128xbf16, #tpu.memory_space<vmem>>
      %195 = tpu.memref_squeeze %194 : memref<1x1x16x128xbf16, #tpu.memory_space<vmem>> -> memref<1x16x128xbf16, #tpu.memory_space<vmem>>
      %196 = tpu.memref_slice %arg10[%c0_i32_136, %165] : memref<2x2x!tpu.dma_semaphore, #tpu.memory_space<semaphore_mem>> -> memref<1x1x!tpu.dma_semaphore, #tpu.memory_space<semaphore_mem>>
      %197 = tpu.memref_squeeze %196 : memref<1x1x!tpu.dma_semaphore, #tpu.memory_space<semaphore_mem>> -> memref<!tpu.dma_semaphore, #tpu.memory_space<semaphore_mem>>
      tpu.enqueue_dma source(%193 : memref<1x16x128xbf16, #tpu.memory_space<any>>) target(%195 : memref<1x16x128xbf16, #tpu.memory_space<vmem>>) target_semaphore(%197 : memref<!tpu.dma_semaphore, #tpu.memory_space<semaphore_mem>>)
      %c1_i32_142 = arith.constant 1 : i32
      %c0_i32_143 = arith.constant 0 : i32
      %c0_i32_144 = arith.constant 0 : i32
      %198 = tpu.memref_slice %arg3[%arg0, %179, %c0_i32_143, %c0_i32_144] : memref<2x16x16x128xbf16, #tpu.memory_space<any>> -> memref<1x8x16x128xbf16, #tpu.memory_space<any>>
      %199 = tpu.memref_squeeze %198 : memref<1x8x16x128xbf16, #tpu.memory_space<any>> -> memref<8x16x128xbf16, #tpu.memory_space<any>>
      %c1_i32_145 = arith.constant 1 : i32
      %c0_i32_146 = arith.constant 0 : i32
      %c0_i32_147 = arith.constant 0 : i32
      %200 = tpu.memref_slice %arg9[%165, %c1_i32_145, %c0_i32_146, %c0_i32_147] : memref<2x10x16x128xbf16, #tpu.memory_space<vmem>> -> memref<1x8x16x128xbf16, #tpu.memory_space<vmem>>
      %201 = tpu.memref_squeeze %200 : memref<1x8x16x128xbf16, #tpu.memory_space<vmem>> -> memref<8x16x128xbf16, #tpu.memory_space<vmem>>
      %202 = tpu.memref_slice %arg10[%c1_i32_142, %165] : memref<2x2x!tpu.dma_semaphore, #tpu.memory_space<semaphore_mem>> -> memref<1x1x!tpu.dma_semaphore, #tpu.memory_space<semaphore_mem>>
      %203 = tpu.memref_squeeze %202 : memref<1x1x!tpu.dma_semaphore, #tpu.memory_space<semaphore_mem>> -> memref<!tpu.dma_semaphore, #tpu.memory_space<semaphore_mem>>
      tpu.enqueue_dma source(%199 : memref<8x16x128xbf16, #tpu.memory_space<any>>) target(%201 : memref<8x16x128xbf16, #tpu.memory_space<vmem>>) target_semaphore(%203 : memref<!tpu.dma_semaphore, #tpu.memory_space<semaphore_mem>>)
      %c1_i32_148 = arith.constant 1 : i32
      %c0_i32_149 = arith.constant 0 : i32
      %c0_i32_150 = arith.constant 0 : i32
      %204 = tpu.memref_slice %arg3[%arg0, %175, %c0_i32_149, %c0_i32_150] : memref<2x16x16x128xbf16, #tpu.memory_space<any>> -> memref<1x1x16x128xbf16, #tpu.memory_space<any>>
      %205 = tpu.memref_squeeze %204 : memref<1x1x16x128xbf16, #tpu.memory_space<any>> -> memref<1x16x128xbf16, #tpu.memory_space<any>>
      %c0_i32_151 = arith.constant 0 : i32
      %c0_i32_152 = arith.constant 0 : i32
      %c0_i32_153 = arith.constant 0 : i32
      %206 = tpu.memref_slice %arg9[%165, %c0_i32_151, %c0_i32_152, %c0_i32_153] : memref<2x10x16x128xbf16, #tpu.memory_space<vmem>> -> memref<1x1x16x128xbf16, #tpu.memory_space<vmem>>
      %207 = tpu.memref_squeeze %206 : memref<1x1x16x128xbf16, #tpu.memory_space<vmem>> -> memref<1x16x128xbf16, #tpu.memory_space<vmem>>
      %208 = tpu.memref_slice %arg10[%c1_i32_148, %165] : memref<2x2x!tpu.dma_semaphore, #tpu.memory_space<semaphore_mem>> -> memref<1x1x!tpu.dma_semaphore, #tpu.memory_space<semaphore_mem>>
      %209 = tpu.memref_squeeze %208 : memref<1x1x!tpu.dma_semaphore, #tpu.memory_space<semaphore_mem>> -> memref<!tpu.dma_semaphore, #tpu.memory_space<semaphore_mem>>
      tpu.enqueue_dma source(%205 : memref<1x16x128xbf16, #tpu.memory_space<any>>) target(%207 : memref<1x16x128xbf16, #tpu.memory_space<vmem>>) target_semaphore(%209 : memref<!tpu.dma_semaphore, #tpu.memory_space<semaphore_mem>>)
      %c1_i32_154 = arith.constant 1 : i32
      %c0_i32_155 = arith.constant 0 : i32
      %c0_i32_156 = arith.constant 0 : i32
      %210 = tpu.memref_slice %arg3[%arg0, %178, %c0_i32_155, %c0_i32_156] : memref<2x16x16x128xbf16, #tpu.memory_space<any>> -> memref<1x1x16x128xbf16, #tpu.memory_space<any>>
      %211 = tpu.memref_squeeze %210 : memref<1x1x16x128xbf16, #tpu.memory_space<any>> -> memref<1x16x128xbf16, #tpu.memory_space<any>>
      %c9_i32_157 = arith.constant 9 : i32
      %c0_i32_158 = arith.constant 0 : i32
      %c0_i32_159 = arith.constant 0 : i32
      %212 = tpu.memref_slice %arg9[%165, %c9_i32_157, %c0_i32_158, %c0_i32_159] : memref<2x10x16x128xbf16, #tpu.memory_space<vmem>> -> memref<1x1x16x128xbf16, #tpu.memory_space<vmem>>
      %213 = tpu.memref_squeeze %212 : memref<1x1x16x128xbf16, #tpu.memory_space<vmem>> -> memref<1x16x128xbf16, #tpu.memory_space<vmem>>
      %214 = tpu.memref_slice %arg10[%c1_i32_154, %165] : memref<2x2x!tpu.dma_semaphore, #tpu.memory_space<semaphore_mem>> -> memref<1x1x!tpu.dma_semaphore, #tpu.memory_space<semaphore_mem>>
      %215 = tpu.memref_squeeze %214 : memref<1x1x!tpu.dma_semaphore, #tpu.memory_space<semaphore_mem>> -> memref<!tpu.dma_semaphore, #tpu.memory_space<semaphore_mem>>
      tpu.enqueue_dma source(%211 : memref<1x16x128xbf16, #tpu.memory_space<any>>) target(%213 : memref<1x16x128xbf16, #tpu.memory_space<vmem>>) target_semaphore(%215 : memref<!tpu.dma_semaphore, #tpu.memory_space<semaphore_mem>>)
    } else {
    }
    %c8_i32 = arith.constant 8 : i32
    %17 = arith.muli %arg1, %c8_i32 : i32
    %c1_i32_8 = arith.constant 1 : i32
    %18 = arith.subi %17, %c1_i32_8 : i32
    %c0_i32_9 = arith.constant 0 : i32
    %19 = arith.maxsi %18, %c0_i32_9 : i32
    %c8_i32_10 = arith.constant 8 : i32
    %20 = arith.muli %arg1, %c8_i32_10 : i32
    %c8_i32_11 = arith.constant 8 : i32
    %21 = arith.addi %20, %c8_i32_11 : i32
    %c15_i32 = arith.constant 15 : i32
    %22 = arith.minsi %21, %c15_i32 : i32
    %c8_i32_12 = arith.constant 8 : i32
    %23 = arith.muli %arg1, %c8_i32_12 : i32
    %c8_i32_13 = arith.constant 8 : i32
    %24 = arith.muli %arg1, %c8_i32_13 : i32
    %c1_i32_14 = arith.constant 1 : i32
    %25 = arith.subi %24, %c1_i32_14 : i32
    %c0_i32_15 = arith.constant 0 : i32
    %26 = arith.maxsi %25, %c0_i32_15 : i32
    %c8_i32_16 = arith.constant 8 : i32
    %27 = arith.muli %arg1, %c8_i32_16 : i32
    %c8_i32_17 = arith.constant 8 : i32
    %28 = arith.addi %27, %c8_i32_17 : i32
    %c15_i32_18 = arith.constant 15 : i32
    %29 = arith.minsi %28, %c15_i32_18 : i32
    %c8_i32_19 = arith.constant 8 : i32
    %30 = arith.muli %arg1, %c8_i32_19 : i32
    %c0_i32_20 = arith.constant 0 : i32
    %c0_i32_21 = arith.constant 0 : i32
    %c0_i32_22 = arith.constant 0 : i32
    %31 = tpu.memref_slice %arg2[%arg0, %23, %c0_i32_21, %c0_i32_22] : memref<2x16x16x128xbf16, #tpu.memory_space<any>> -> memref<1x8x16x128xbf16, #tpu.memory_space<any>>
    %32 = tpu.memref_squeeze %31 : memref<1x8x16x128xbf16, #tpu.memory_space<any>> -> memref<8x16x128xbf16, #tpu.memory_space<any>>
    %c1_i32_23 = arith.constant 1 : i32
    %c0_i32_24 = arith.constant 0 : i32
    %c0_i32_25 = arith.constant 0 : i32
    %33 = tpu.memref_slice %arg8[%9, %c1_i32_23, %c0_i32_24, %c0_i32_25] : memref<2x10x16x128xbf16, #tpu.memory_space<vmem>> -> memref<1x8x16x128xbf16, #tpu.memory_space<vmem>>
    %34 = tpu.memref_squeeze %33 : memref<1x8x16x128xbf16, #tpu.memory_space<vmem>> -> memref<8x16x128xbf16, #tpu.memory_space<vmem>>
    %35 = tpu.memref_slice %arg10[%c0_i32_20, %9] : memref<2x2x!tpu.dma_semaphore, #tpu.memory_space<semaphore_mem>> -> memref<1x1x!tpu.dma_semaphore, #tpu.memory_space<semaphore_mem>>
    %36 = tpu.memref_squeeze %35 : memref<1x1x!tpu.dma_semaphore, #tpu.memory_space<semaphore_mem>> -> memref<!tpu.dma_semaphore, #tpu.memory_space<semaphore_mem>>
    tpu.wait_dma2 semaphore(%36 : memref<!tpu.dma_semaphore, #tpu.memory_space<semaphore_mem>>) src(%32 : memref<8x16x128xbf16, #tpu.memory_space<any>>) dst(%34 : memref<8x16x128xbf16, #tpu.memory_space<vmem>>)
    %c0_i32_26 = arith.constant 0 : i32
    %c0_i32_27 = arith.constant 0 : i32
    %c0_i32_28 = arith.constant 0 : i32
    %37 = tpu.memref_slice %arg2[%arg0, %19, %c0_i32_27, %c0_i32_28] : memref<2x16x16x128xbf16, #tpu.memory_space<any>> -> memref<1x1x16x128xbf16, #tpu.memory_space<any>>
    %38 = tpu.memref_squeeze %37 : memref<1x1x16x128xbf16, #tpu.memory_space<any>> -> memref<1x16x128xbf16, #tpu.memory_space<any>>
    %c0_i32_29 = arith.constant 0 : i32
    %c0_i32_30 = arith.constant 0 : i32
    %c0_i32_31 = arith.constant 0 : i32
    %39 = tpu.memref_slice %arg8[%9, %c0_i32_29, %c0_i32_30, %c0_i32_31] : memref<2x10x16x128xbf16, #tpu.memory_space<vmem>> -> memref<1x1x16x128xbf16, #tpu.memory_space<vmem>>
    %40 = tpu.memref_squeeze %39 : memref<1x1x16x128xbf16, #tpu.memory_space<vmem>> -> memref<1x16x128xbf16, #tpu.memory_space<vmem>>
    %41 = tpu.memref_slice %arg10[%c0_i32_26, %9] : memref<2x2x!tpu.dma_semaphore, #tpu.memory_space<semaphore_mem>> -> memref<1x1x!tpu.dma_semaphore, #tpu.memory_space<semaphore_mem>>
    %42 = tpu.memref_squeeze %41 : memref<1x1x!tpu.dma_semaphore, #tpu.memory_space<semaphore_mem>> -> memref<!tpu.dma_semaphore, #tpu.memory_space<semaphore_mem>>
    tpu.wait_dma2 semaphore(%42 : memref<!tpu.dma_semaphore, #tpu.memory_space<semaphore_mem>>) src(%38 : memref<1x16x128xbf16, #tpu.memory_space<any>>) dst(%40 : memref<1x16x128xbf16, #tpu.memory_space<vmem>>)
    %c0_i32_32 = arith.constant 0 : i32
    %c0_i32_33 = arith.constant 0 : i32
    %c0_i32_34 = arith.constant 0 : i32
    %43 = tpu.memref_slice %arg2[%arg0, %22, %c0_i32_33, %c0_i32_34] : memref<2x16x16x128xbf16, #tpu.memory_space<any>> -> memref<1x1x16x128xbf16, #tpu.memory_space<any>>
    %44 = tpu.memref_squeeze %43 : memref<1x1x16x128xbf16, #tpu.memory_space<any>> -> memref<1x16x128xbf16, #tpu.memory_space<any>>
    %c9_i32 = arith.constant 9 : i32
    %c0_i32_35 = arith.constant 0 : i32
    %c0_i32_36 = arith.constant 0 : i32
    %45 = tpu.memref_slice %arg8[%9, %c9_i32, %c0_i32_35, %c0_i32_36] : memref<2x10x16x128xbf16, #tpu.memory_space<vmem>> -> memref<1x1x16x128xbf16, #tpu.memory_space<vmem>>
    %46 = tpu.memref_squeeze %45 : memref<1x1x16x128xbf16, #tpu.memory_space<vmem>> -> memref<1x16x128xbf16, #tpu.memory_space<vmem>>
    %47 = tpu.memref_slice %arg10[%c0_i32_32, %9] : memref<2x2x!tpu.dma_semaphore, #tpu.memory_space<semaphore_mem>> -> memref<1x1x!tpu.dma_semaphore, #tpu.memory_space<semaphore_mem>>
    %48 = tpu.memref_squeeze %47 : memref<1x1x!tpu.dma_semaphore, #tpu.memory_space<semaphore_mem>> -> memref<!tpu.dma_semaphore, #tpu.memory_space<semaphore_mem>>
    tpu.wait_dma2 semaphore(%48 : memref<!tpu.dma_semaphore, #tpu.memory_space<semaphore_mem>>) src(%44 : memref<1x16x128xbf16, #tpu.memory_space<any>>) dst(%46 : memref<1x16x128xbf16, #tpu.memory_space<vmem>>)
    %c1_i32_37 = arith.constant 1 : i32
    %c0_i32_38 = arith.constant 0 : i32
    %c0_i32_39 = arith.constant 0 : i32
    %49 = tpu.memref_slice %arg3[%arg0, %30, %c0_i32_38, %c0_i32_39] : memref<2x16x16x128xbf16, #tpu.memory_space<any>> -> memref<1x8x16x128xbf16, #tpu.memory_space<any>>
    %50 = tpu.memref_squeeze %49 : memref<1x8x16x128xbf16, #tpu.memory_space<any>> -> memref<8x16x128xbf16, #tpu.memory_space<any>>
    %c1_i32_40 = arith.constant 1 : i32
    %c0_i32_41 = arith.constant 0 : i32
    %c0_i32_42 = arith.constant 0 : i32
    %51 = tpu.memref_slice %arg9[%9, %c1_i32_40, %c0_i32_41, %c0_i32_42] : memref<2x10x16x128xbf16, #tpu.memory_space<vmem>> -> memref<1x8x16x128xbf16, #tpu.memory_space<vmem>>
    %52 = tpu.memref_squeeze %51 : memref<1x8x16x128xbf16, #tpu.memory_space<vmem>> -> memref<8x16x128xbf16, #tpu.memory_space<vmem>>
    %53 = tpu.memref_slice %arg10[%c1_i32_37, %9] : memref<2x2x!tpu.dma_semaphore, #tpu.memory_space<semaphore_mem>> -> memref<1x1x!tpu.dma_semaphore, #tpu.memory_space<semaphore_mem>>
    %54 = tpu.memref_squeeze %53 : memref<1x1x!tpu.dma_semaphore, #tpu.memory_space<semaphore_mem>> -> memref<!tpu.dma_semaphore, #tpu.memory_space<semaphore_mem>>
    tpu.wait_dma2 semaphore(%54 : memref<!tpu.dma_semaphore, #tpu.memory_space<semaphore_mem>>) src(%50 : memref<8x16x128xbf16, #tpu.memory_space<any>>) dst(%52 : memref<8x16x128xbf16, #tpu.memory_space<vmem>>)
    %c1_i32_43 = arith.constant 1 : i32
    %c0_i32_44 = arith.constant 0 : i32
    %c0_i32_45 = arith.constant 0 : i32
    %55 = tpu.memref_slice %arg3[%arg0, %26, %c0_i32_44, %c0_i32_45] : memref<2x16x16x128xbf16, #tpu.memory_space<any>> -> memref<1x1x16x128xbf16, #tpu.memory_space<any>>
    %56 = tpu.memref_squeeze %55 : memref<1x1x16x128xbf16, #tpu.memory_space<any>> -> memref<1x16x128xbf16, #tpu.memory_space<any>>
    %c0_i32_46 = arith.constant 0 : i32
    %c0_i32_47 = arith.constant 0 : i32
    %c0_i32_48 = arith.constant 0 : i32
    %57 = tpu.memref_slice %arg9[%9, %c0_i32_46, %c0_i32_47, %c0_i32_48] : memref<2x10x16x128xbf16, #tpu.memory_space<vmem>> -> memref<1x1x16x128xbf16, #tpu.memory_space<vmem>>
    %58 = tpu.memref_squeeze %57 : memref<1x1x16x128xbf16, #tpu.memory_space<vmem>> -> memref<1x16x128xbf16, #tpu.memory_space<vmem>>
    %59 = tpu.memref_slice %arg10[%c1_i32_43, %9] : memref<2x2x!tpu.dma_semaphore, #tpu.memory_space<semaphore_mem>> -> memref<1x1x!tpu.dma_semaphore, #tpu.memory_space<semaphore_mem>>
    %60 = tpu.memref_squeeze %59 : memref<1x1x!tpu.dma_semaphore, #tpu.memory_space<semaphore_mem>> -> memref<!tpu.dma_semaphore, #tpu.memory_space<semaphore_mem>>
    tpu.wait_dma2 semaphore(%60 : memref<!tpu.dma_semaphore, #tpu.memory_space<semaphore_mem>>) src(%56 : memref<1x16x128xbf16, #tpu.memory_space<any>>) dst(%58 : memref<1x16x128xbf16, #tpu.memory_space<vmem>>)
    %c1_i32_49 = arith.constant 1 : i32
    %c0_i32_50 = arith.constant 0 : i32
    %c0_i32_51 = arith.constant 0 : i32
    %61 = tpu.memref_slice %arg3[%arg0, %29, %c0_i32_50, %c0_i32_51] : memref<2x16x16x128xbf16, #tpu.memory_space<any>> -> memref<1x1x16x128xbf16, #tpu.memory_space<any>>
    %62 = tpu.memref_squeeze %61 : memref<1x1x16x128xbf16, #tpu.memory_space<any>> -> memref<1x16x128xbf16, #tpu.memory_space<any>>
    %c9_i32_52 = arith.constant 9 : i32
    %c0_i32_53 = arith.constant 0 : i32
    %c0_i32_54 = arith.constant 0 : i32
    %63 = tpu.memref_slice %arg9[%9, %c9_i32_52, %c0_i32_53, %c0_i32_54] : memref<2x10x16x128xbf16, #tpu.memory_space<vmem>> -> memref<1x1x16x128xbf16, #tpu.memory_space<vmem>>
    %64 = tpu.memref_squeeze %63 : memref<1x1x16x128xbf16, #tpu.memory_space<vmem>> -> memref<1x16x128xbf16, #tpu.memory_space<vmem>>
    %65 = tpu.memref_slice %arg10[%c1_i32_49, %9] : memref<2x2x!tpu.dma_semaphore, #tpu.memory_space<semaphore_mem>> -> memref<1x1x!tpu.dma_semaphore, #tpu.memory_space<semaphore_mem>>
    %66 = tpu.memref_squeeze %65 : memref<1x1x!tpu.dma_semaphore, #tpu.memory_space<semaphore_mem>> -> memref<!tpu.dma_semaphore, #tpu.memory_space<semaphore_mem>>
    tpu.wait_dma2 semaphore(%66 : memref<!tpu.dma_semaphore, #tpu.memory_space<semaphore_mem>>) src(%62 : memref<1x16x128xbf16, #tpu.memory_space<any>>) dst(%64 : memref<1x16x128xbf16, #tpu.memory_space<vmem>>)
    %67 = arith.index_cast %9 : i32 to index
    %c0 = arith.constant 0 : index
    %c0_55 = arith.constant 0 : index
    %c0_56 = arith.constant 0 : index
    %68 = vector.load %arg8[%67, %c0, %c0_55, %c0_56] : memref<2x10x16x128xbf16, #tpu.memory_space<vmem>>, vector<1x10x16x128xbf16>
    %69 = vector.shape_cast %68 : vector<1x10x16x128xbf16> to vector<10x16x128xbf16>
    %70 = tpu.iota {dimensions = array<i32: 0>} : vector<10x16x128xi32>
    %c0_i32_57 = arith.constant 0 : i32
    %71 = arith.cmpi eq, %arg1, %c0_i32_57 : i32
    %c0_i32_58 = arith.constant 0 : i32
    %72 = vector.broadcast %c0_i32_58 : i32 to vector<10x16x128xi32>
    %73 = arith.cmpi eq, %70, %72 : vector<10x16x128xi32>
    %74 = vector.broadcast %71 : i1 to vector<10x16x128xi1>
    %75 = arith.andi %74, %73 : vector<10x16x128xi1>
    %c1_i32_59 = arith.constant 1 : i32
    %76 = arith.cmpi eq, %arg1, %c1_i32_59 : i32
    %c9_i32_60 = arith.constant 9 : i32
    %77 = vector.broadcast %c9_i32_60 : i32 to vector<10x16x128xi32>
    %78 = arith.cmpi eq, %70, %77 : vector<10x16x128xi32>
    %79 = vector.broadcast %76 : i1 to vector<10x16x128xi1>
    %80 = arith.andi %79, %78 : vector<10x16x128xi1>
    %81 = arith.ori %75, %80 : vector<10x16x128xi1>
    %cst = arith.constant 0.000000e+00 : bf16
    %82 = vector.broadcast %cst : bf16 to vector<10x16x128xbf16>
    %83 = arith.select %81, %82, %69 : vector<10x16x128xi1>, vector<10x16x128xbf16>
    %84 = arith.index_cast %9 : i32 to index
    %c0_61 = arith.constant 0 : index
    %c0_62 = arith.constant 0 : index
    %c0_63 = arith.constant 0 : index
    %85 = vector.load %arg9[%84, %c0_61, %c0_62, %c0_63] : memref<2x10x16x128xbf16, #tpu.memory_space<vmem>>, vector<1x10x16x128xbf16>
    %86 = vector.shape_cast %85 : vector<1x10x16x128xbf16> to vector<10x16x128xbf16>
    %87 = tpu.iota {dimensions = array<i32: 0>} : vector<10x16x128xi32>
    %c0_i32_64 = arith.constant 0 : i32
    %88 = arith.cmpi eq, %arg1, %c0_i32_64 : i32
    %c0_i32_65 = arith.constant 0 : i32
    %89 = vector.broadcast %c0_i32_65 : i32 to vector<10x16x128xi32>
    %90 = arith.cmpi eq, %87, %89 : vector<10x16x128xi32>
    %91 = vector.broadcast %88 : i1 to vector<10x16x128xi1>
    %92 = arith.andi %91, %90 : vector<10x16x128xi1>
    %c1_i32_66 = arith.constant 1 : i32
    %93 = arith.cmpi eq, %arg1, %c1_i32_66 : i32
    %c9_i32_67 = arith.constant 9 : i32
    %94 = vector.broadcast %c9_i32_67 : i32 to vector<10x16x128xi32>
    %95 = arith.cmpi eq, %87, %94 : vector<10x16x128xi32>
    %96 = vector.broadcast %93 : i1 to vector<10x16x128xi1>
    %97 = arith.andi %96, %95 : vector<10x16x128xi1>
    %98 = arith.ori %92, %97 : vector<10x16x128xi1>
    %cst_68 = arith.constant 0.000000e+00 : bf16
    %99 = vector.broadcast %cst_68 : bf16 to vector<10x16x128xbf16>
    %100 = arith.select %98, %99, %86 : vector<10x16x128xi1>, vector<10x16x128xbf16>
    %cst_69 = arith.constant 0.000000e+00 : f32
    %101 = vector.broadcast %cst_69 : f32 to vector<128x128xf32>
    %cst_70 = arith.constant 0.000000e+00 : bf16
    %102 = vector.broadcast %cst_70 : bf16 to vector<10x1x128xbf16>
    %103 = tpu.concatenate %102, %83, %102 in 1 : vector<10x1x128xbf16>, vector<10x16x128xbf16>, vector<10x1x128xbf16> -> vector<10x18x128xbf16>
    %104 = vector.extract_strided_slice %103 {offsets = [0, 0, 0], sizes = [10, 16, 128], strides = [1, 1, 1]} : vector<10x18x128xbf16> to vector<10x16x128xbf16>
    %105 = vector.extract_strided_slice %103 {offsets = [0, 2, 0], sizes = [10, 16, 128], strides = [1, 1, 1]} : vector<10x18x128xbf16> to vector<10x16x128xbf16>
    %106 = tpu.concatenate %104, %83, %105 in 2 : vector<10x16x128xbf16>, vector<10x16x128xbf16>, vector<10x16x128xbf16> -> vector<10x16x384xbf16>
    %107 = vector.extract_strided_slice %106 {offsets = [0, 0, 0], sizes = [8, 16, 384], strides = [1, 1, 1]} : vector<10x16x384xbf16> to vector<8x16x384xbf16>
    %108 = vector.shape_cast %107 : vector<8x16x384xbf16> to vector<128x384xbf16>
    %c0_71 = arith.constant 0 : index
    %c0_72 = arith.constant 0 : index
    %c0_73 = arith.constant 0 : index
    %109 = vector.load %arg4[%c0_71, %c0_72, %c0_73] : memref<3x384x128xbf16, #tpu.memory_space<vmem>>, vector<1x384x128xbf16>
    %110 = vector.shape_cast %109 : vector<1x384x128xbf16> to vector<384x128xbf16>
    %cst_74 = arith.constant dense<0.000000e+00> : vector<128x128xf32>
    %111 = tpu.matmul %108, %110, %cst_74 {dimension_numbers = #tpu.dot_dimension_numbers<[1], [0], [0], [1], [0, 0, 1, 1], [], []>} : vector<128x384xbf16>, vector<384x128xbf16>, vector<128x128xf32> -> vector<128x128xf32>
    %112 = arith.addf %101, %111 : vector<128x128xf32>
    %113 = vector.extract_strided_slice %106 {offsets = [1, 0, 0], sizes = [8, 16, 384], strides = [1, 1, 1]} : vector<10x16x384xbf16> to vector<8x16x384xbf16>
    %114 = vector.shape_cast %113 : vector<8x16x384xbf16> to vector<128x384xbf16>
    %c1 = arith.constant 1 : index
    %c0_75 = arith.constant 0 : index
    %c0_76 = arith.constant 0 : index
    %115 = vector.load %arg4[%c1, %c0_75, %c0_76] : memref<3x384x128xbf16, #tpu.memory_space<vmem>>, vector<1x384x128xbf16>
    %116 = vector.shape_cast %115 : vector<1x384x128xbf16> to vector<384x128xbf16>
    %cst_77 = arith.constant dense<0.000000e+00> : vector<128x128xf32>
    %117 = tpu.matmul %114, %116, %cst_77 {dimension_numbers = #tpu.dot_dimension_numbers<[1], [0], [0], [1], [0, 0, 1, 1], [], []>} : vector<128x384xbf16>, vector<384x128xbf16>, vector<128x128xf32> -> vector<128x128xf32>
    %118 = arith.addf %112, %117 : vector<128x128xf32>
    %119 = vector.extract_strided_slice %106 {offsets = [2, 0, 0], sizes = [8, 16, 384], strides = [1, 1, 1]} : vector<10x16x384xbf16> to vector<8x16x384xbf16>
    %120 = vector.shape_cast %119 : vector<8x16x384xbf16> to vector<128x384xbf16>
    %c2 = arith.constant 2 : index
    %c0_78 = arith.constant 0 : index
    %c0_79 = arith.constant 0 : index
    %121 = vector.load %arg4[%c2, %c0_78, %c0_79] : memref<3x384x128xbf16, #tpu.memory_space<vmem>>, vector<1x384x128xbf16>
    %122 = vector.shape_cast %121 : vector<1x384x128xbf16> to vector<384x128xbf16>
    %cst_80 = arith.constant dense<0.000000e+00> : vector<128x128xf32>
    %123 = tpu.matmul %120, %122, %cst_80 {dimension_numbers = #tpu.dot_dimension_numbers<[1], [0], [0], [1], [0, 0, 1, 1], [], []>} : vector<128x384xbf16>, vector<384x128xbf16>, vector<128x128xf32> -> vector<128x128xf32>
    %124 = arith.addf %118, %123 : vector<128x128xf32>
    %cst_81 = arith.constant 0.000000e+00 : bf16
    %125 = vector.broadcast %cst_81 : bf16 to vector<10x1x128xbf16>
    %126 = tpu.concatenate %125, %100, %125 in 1 : vector<10x1x128xbf16>, vector<10x16x128xbf16>, vector<10x1x128xbf16> -> vector<10x18x128xbf16>
    %127 = vector.extract_strided_slice %126 {offsets = [0, 0, 0], sizes = [10, 16, 128], strides = [1, 1, 1]} : vector<10x18x128xbf16> to vector<10x16x128xbf16>
    %128 = vector.extract_strided_slice %126 {offsets = [0, 2, 0], sizes = [10, 16, 128], strides = [1, 1, 1]} : vector<10x18x128xbf16> to vector<10x16x128xbf16>
    %129 = tpu.concatenate %127, %100, %128 in 2 : vector<10x16x128xbf16>, vector<10x16x128xbf16>, vector<10x16x128xbf16> -> vector<10x16x384xbf16>
    %130 = vector.extract_strided_slice %129 {offsets = [0, 0, 0], sizes = [8, 16, 384], strides = [1, 1, 1]} : vector<10x16x384xbf16> to vector<8x16x384xbf16>
    %131 = vector.shape_cast %130 : vector<8x16x384xbf16> to vector<128x384xbf16>
    %c0_82 = arith.constant 0 : index
    %c0_83 = arith.constant 0 : index
    %c0_84 = arith.constant 0 : index
    %132 = vector.load %arg5[%c0_82, %c0_83, %c0_84] : memref<3x384x128xbf16, #tpu.memory_space<vmem>>, vector<1x384x128xbf16>
    %133 = vector.shape_cast %132 : vector<1x384x128xbf16> to vector<384x128xbf16>
    %cst_85 = arith.constant dense<0.000000e+00> : vector<128x128xf32>
    %134 = tpu.matmul %131, %133, %cst_85 {dimension_numbers = #tpu.dot_dimension_numbers<[1], [0], [0], [1], [0, 0, 1, 1], [], []>} : vector<128x384xbf16>, vector<384x128xbf16>, vector<128x128xf32> -> vector<128x128xf32>
    %135 = arith.addf %124, %134 : vector<128x128xf32>
    %136 = vector.extract_strided_slice %129 {offsets = [1, 0, 0], sizes = [8, 16, 384], strides = [1, 1, 1]} : vector<10x16x384xbf16> to vector<8x16x384xbf16>
    %137 = vector.shape_cast %136 : vector<8x16x384xbf16> to vector<128x384xbf16>
    %c1_86 = arith.constant 1 : index
    %c0_87 = arith.constant 0 : index
    %c0_88 = arith.constant 0 : index
    %138 = vector.load %arg5[%c1_86, %c0_87, %c0_88] : memref<3x384x128xbf16, #tpu.memory_space<vmem>>, vector<1x384x128xbf16>
    %139 = vector.shape_cast %138 : vector<1x384x128xbf16> to vector<384x128xbf16>
    %cst_89 = arith.constant dense<0.000000e+00> : vector<128x128xf32>
    %140 = tpu.matmul %137, %139, %cst_89 {dimension_numbers = #tpu.dot_dimension_numbers<[1], [0], [0], [1], [0, 0, 1, 1], [], []>} : vector<128x384xbf16>, vector<384x128xbf16>, vector<128x128xf32> -> vector<128x128xf32>
    %141 = arith.addf %135, %140 : vector<128x128xf32>
    %142 = vector.extract_strided_slice %129 {offsets = [2, 0, 0], sizes = [8, 16, 384], strides = [1, 1, 1]} : vector<10x16x384xbf16> to vector<8x16x384xbf16>
    %143 = vector.shape_cast %142 : vector<8x16x384xbf16> to vector<128x384xbf16>
    %c2_90 = arith.constant 2 : index
    %c0_91 = arith.constant 0 : index
    %c0_92 = arith.constant 0 : index
    %144 = vector.load %arg5[%c2_90, %c0_91, %c0_92] : memref<3x384x128xbf16, #tpu.memory_space<vmem>>, vector<1x384x128xbf16>
    %145 = vector.shape_cast %144 : vector<1x384x128xbf16> to vector<384x128xbf16>
    %cst_93 = arith.constant dense<0.000000e+00> : vector<128x128xf32>
    %146 = tpu.matmul %143, %145, %cst_93 {dimension_numbers = #tpu.dot_dimension_numbers<[1], [0], [0], [1], [0, 0, 1, 1], [], []>} : vector<128x384xbf16>, vector<384x128xbf16>, vector<128x128xf32> -> vector<128x128xf32>
    %147 = arith.addf %141, %146 : vector<128x128xf32>
    %148 = vector.shape_cast %147 : vector<128x128xf32> to vector<8x16x128xf32>
    %149 = arith.truncf %148 : vector<8x16x128xf32> to vector<8x16x128xbf16>
    %c0_94 = arith.constant 0 : index
    %c0_95 = arith.constant 0 : index
    %c0_96 = arith.constant 0 : index
    %c0_97 = arith.constant 0 : index
    %150 = vector.load %arg6[%c0_94, %c0_95, %c0_96, %c0_97] : memref<1x8x16x128xbf16, #tpu.memory_space<vmem>>, vector<1x8x16x128xbf16>
    %151 = vector.shape_cast %150 : vector<1x8x16x128xbf16> to vector<8x16x128xbf16>
    %152 = vector.shape_cast %149 : vector<8x16x128xbf16> to vector<1x8x16x128xbf16>
    tpu.vector_store %arg6[%c0_94, %c0_95, %c0_96, %c0_97], %152 {strides = array<i32>} : memref<1x8x16x128xbf16, #tpu.memory_space<vmem>>, vector<1x8x16x128xbf16>,
    %cst_98 = arith.constant dense<0.000000e+00> : vector<128xf32>
    %153 = vector.multi_reduction <add>, %147, %cst_98 [0] : vector<128x128xf32> to vector<128xf32>
    %154 = vector.shape_cast %153 : vector<128xf32> to vector<1x128xf32>
    %c0_99 = arith.constant 0 : index
    %c0_100 = arith.constant 0 : index
    %c0_101 = arith.constant 0 : index
    %c0_102 = arith.constant 0 : index
    %155 = vector.load %arg7[%c0_99, %c0_100, %c0_101, %c0_102] : memref<1x1x2x128xf32, #tpu.memory_space<vmem>>, vector<1x1x1x128xf32>
    %156 = vector.shape_cast %155 : vector<1x1x1x128xf32> to vector<1x128xf32>
    %157 = vector.shape_cast %154 : vector<1x128xf32> to vector<1x1x1x128xf32>
    tpu.vector_store %arg7[%c0_99, %c0_100, %c0_101, %c0_102], %157 {strides = array<i32>} : memref<1x1x2x128xf32, #tpu.memory_space<vmem>>, vector<1x1x1x128xf32>,
    %158 = arith.mulf %147, %147 : vector<128x128xf32>
    %cst_103 = arith.constant dense<0.000000e+00> : vector<128xf32>
    %159 = vector.multi_reduction <add>, %158, %cst_103 [0] : vector<128x128xf32> to vector<128xf32>
    %160 = vector.shape_cast %159 : vector<128xf32> to vector<1x128xf32>
    %c0_104 = arith.constant 0 : index
    %c0_105 = arith.constant 0 : index
    %c1_106 = arith.constant 1 : index
    %c0_107 = arith.constant 0 : index
    %161 = vector.load %arg7[%c0_104, %c0_105, %c1_106, %c0_107] : memref<1x1x2x128xf32, #tpu.memory_space<vmem>>, vector<1x1x1x128xf32>
    %162 = vector.shape_cast %161 : vector<1x1x1x128xf32> to vector<1x128xf32>
    %163 = vector.shape_cast %160 : vector<1x128xf32> to vector<1x1x1x128xf32>
    tpu.vector_store %arg7[%c0_104, %c0_105, %c1_106, %c0_107], %163 {strides = array<i32>} : memref<1x1x2x128xf32, #tpu.memory_space<vmem>>, vector<1x1x1x128xf32>,
    return
  }
  func.func @transform_2(%arg0: i32, %arg1: i32) -> (i32, i32, i32) {
    %c0_i32 = arith.constant 0 : i32
    %c0_i32_0 = arith.constant 0 : i32
    %c0_i32_1 = arith.constant 0 : i32
    %c0_i32_2 = arith.constant 0 : i32
    return %c0_i32, %c0_i32_0, %c0_i32_1 : i32, i32, i32
  }
  func.func @transform_3(%arg0: i32, %arg1: i32) -> (i32, i32, i32) {
    %c0_i32 = arith.constant 0 : i32
    %c0_i32_0 = arith.constant 0 : i32
    %c0_i32_1 = arith.constant 0 : i32
    %c0_i32_2 = arith.constant 0 : i32
    return %c0_i32, %c0_i32_0, %c0_i32_1 : i32, i32, i32
  }
  func.func @transform_4(%arg0: i32, %arg1: i32) -> (i32, i32, i32, i32) {
    %c0_i32 = arith.constant 0 : i32
    %c0_i32_0 = arith.constant 0 : i32
    %c0_i32_1 = arith.constant 0 : i32
    return %arg0, %arg1, %c0_i32, %c0_i32_0 : i32, i32, i32, i32
  }
  func.func @transform_5(%arg0: i32, %arg1: i32) -> (i32, i32, i32, i32) {
    %c0_i32 = arith.constant 0 : i32
    %c0_i32_0 = arith.constant 0 : i32
    %c0_i32_1 = arith.constant 0 : i32
    return %arg0, %arg1, %c0_i32, %c0_i32_0 : i32, i32, i32, i32
  }
}

module attributes {stable_mosaic.version = 11 : i64} {
  func.func @_bn_relu_kernel(%arg0: i32, %arg1: i32, %arg2: memref<1x8x16x128xbf16, #tpu.memory_space<vmem>>, %arg3: memref<1x128xf32, #tpu.memory_space<vmem>>, %arg4: memref<1x128xf32, #tpu.memory_space<vmem>>, %arg5: memref<1x8x16x128xf32, #tpu.memory_space<vmem>>) attributes {dimension_semantics = [#tpu.dimension_semantics<parallel>, #tpu.dimension_semantics<parallel>], iteration_bounds = array<i64: 2, 2>, scalar_prefetch = 0 : i64, scratch_operands = 0 : i64, tpu.core_type = #tpu.core_type<tc>, window_params = [{transform_indices = @transform_0, window_bounds = array<i64: 1, 8, 16, 128>}, {pipeline_mode = #tpu.pipeline_mode<synchronous>, transform_indices = @transform_1, window_bounds = array<i64: 1, 128>}, {pipeline_mode = #tpu.pipeline_mode<synchronous>, transform_indices = @transform_2, window_bounds = array<i64: 1, 128>}, {transform_indices = @transform_3, window_bounds = array<i64: 1, 8, 16, 128>}]} {
    %c0 = arith.constant 0 : index
    %c0_0 = arith.constant 0 : index
    %0 = vector.load %arg3[%c0, %c0_0] : memref<1x128xf32, #tpu.memory_space<vmem>>, vector<1x128xf32>
    %1 = vector.shape_cast %0 : vector<1x128xf32> to vector<1x1x128xf32>
    %c0_1 = arith.constant 0 : index
    %c0_2 = arith.constant 0 : index
    %2 = vector.load %arg4[%c0_1, %c0_2] : memref<1x128xf32, #tpu.memory_space<vmem>>, vector<1x128xf32>
    %3 = vector.shape_cast %2 : vector<1x128xf32> to vector<1x1x128xf32>
    %c0_3 = arith.constant 0 : index
    %c0_4 = arith.constant 0 : index
    %c0_5 = arith.constant 0 : index
    %c0_6 = arith.constant 0 : index
    %4 = vector.load %arg2[%c0_3, %c0_4, %c0_5, %c0_6] : memref<1x8x16x128xbf16, #tpu.memory_space<vmem>>, vector<1x8x16x128xbf16>
    %5 = vector.shape_cast %4 : vector<1x8x16x128xbf16> to vector<8x16x128xbf16>
    %6 = arith.extf %5 : vector<8x16x128xbf16> to vector<8x16x128xf32>
    %7 = vector.broadcast %1 : vector<1x1x128xf32> to vector<8x16x128xf32>
    %8 = arith.mulf %6, %7 : vector<8x16x128xf32>
    %9 = vector.broadcast %3 : vector<1x1x128xf32> to vector<8x16x128xf32>
    %10 = arith.addf %8, %9 : vector<8x16x128xf32>
    %cst = arith.constant 0.000000e+00 : f32
    %11 = vector.broadcast %cst : f32 to vector<8x16x128xf32>
    %12 = arith.maximumf %10, %11 : vector<8x16x128xf32>
    %c0_7 = arith.constant 0 : index
    %c0_8 = arith.constant 0 : index
    %c0_9 = arith.constant 0 : index
    %c0_10 = arith.constant 0 : index
    %13 = vector.load %arg5[%c0_7, %c0_8, %c0_9, %c0_10] : memref<1x8x16x128xf32, #tpu.memory_space<vmem>>, vector<1x8x16x128xf32>
    %14 = vector.shape_cast %13 : vector<1x8x16x128xf32> to vector<8x16x128xf32>
    %15 = vector.shape_cast %12 : vector<8x16x128xf32> to vector<1x8x16x128xf32>
    tpu.vector_store %arg5[%c0_7, %c0_8, %c0_9, %c0_10], %15 {strides = array<i32>} : memref<1x8x16x128xf32, #tpu.memory_space<vmem>>, vector<1x8x16x128xf32>,
    return
  }
  func.func @transform_0(%arg0: i32, %arg1: i32) -> (i32, i32, i32, i32) {
    %c0_i32 = arith.constant 0 : i32
    %c0_i32_0 = arith.constant 0 : i32
    %c0_i32_1 = arith.constant 0 : i32
    return %arg0, %arg1, %c0_i32, %c0_i32_0 : i32, i32, i32, i32
  }
  func.func @transform_1(%arg0: i32, %arg1: i32) -> (i32, i32) {
    %c0_i32 = arith.constant 0 : i32
    %c0_i32_0 = arith.constant 0 : i32
    %c0_i32_1 = arith.constant 0 : i32
    return %c0_i32, %c0_i32_0 : i32, i32
  }
  func.func @transform_2(%arg0: i32, %arg1: i32) -> (i32, i32) {
    %c0_i32 = arith.constant 0 : i32
    %c0_i32_0 = arith.constant 0 : i32
    %c0_i32_1 = arith.constant 0 : i32
    return %c0_i32, %c0_i32_0 : i32, i32
  }
  func.func @transform_3(%arg0: i32, %arg1: i32) -> (i32, i32, i32, i32) {
    %c0_i32 = arith.constant 0 : i32
    %c0_i32_0 = arith.constant 0 : i32
    %c0_i32_1 = arith.constant 0 : i32
    return %arg0, %arg1, %c0_i32, %c0_i32_0 : i32, i32, i32, i32
  }
}

module attributes {stable_mosaic.version = 11 : i64} {
  func.func @_conv2_kernel(%arg0: i32, %arg1: i32, %arg2: memref<2x16x16x128xbf16, #tpu.memory_space<any>>, %arg3: memref<1x128xf32, #tpu.memory_space<vmem>>, %arg4: memref<1x128xf32, #tpu.memory_space<vmem>>, %arg5: memref<3x384x128xbf16, #tpu.memory_space<vmem>>, %arg6: memref<1x8x16x128xbf16, #tpu.memory_space<vmem>>, %arg7: memref<1x1x2x128xf32, #tpu.memory_space<vmem>>, %arg8: memref<2x10x16x128xbf16, #tpu.memory_space<vmem>>, %arg9: memref<2x!tpu.dma_semaphore, #tpu.memory_space<semaphore_mem>>) attributes {dimension_semantics = [#tpu.dimension_semantics<parallel>, #tpu.dimension_semantics<arbitrary>], iteration_bounds = array<i64: 2, 2>, scalar_prefetch = 0 : i64, scratch_operands = 2 : i64, tpu.core_type = #tpu.core_type<tc>, window_params = [{}, {pipeline_mode = #tpu.pipeline_mode<synchronous>, transform_indices = @transform_1, window_bounds = array<i64: 1, 128>}, {pipeline_mode = #tpu.pipeline_mode<synchronous>, transform_indices = @transform_2, window_bounds = array<i64: 1, 128>}, {pipeline_mode = #tpu.pipeline_mode<synchronous>, transform_indices = @transform_3, window_bounds = array<i64: 3, 384, 128>}, {transform_indices = @transform_4, window_bounds = array<i64: 1, 8, 16, 128>}, {transform_indices = @transform_5, window_bounds = array<i64: 1, 1, 2, 128>}]} {
    %c2_i32 = arith.constant 2 : i32
    %c0_i32 = arith.constant 0 : i32
    %0 = arith.cmpi eq, %c2_i32, %c0_i32 : i32
    %c1_i32 = arith.constant 1 : i32
    %1 = arith.select %0, %c1_i32, %c2_i32 : i32
    %2 = arith.remsi %arg1, %1 : i32
    %c0_i32_0 = arith.constant 0 : i32
    %3 = arith.cmpi ne, %2, %c0_i32_0 : i32
    %c0_i32_1 = arith.constant 0 : i32
    %4 = arith.cmpi slt, %2, %c0_i32_1 : i32
    %c0_i32_2 = arith.constant 0 : i32
    %5 = arith.cmpi slt, %1, %c0_i32_2 : i32
    %6 = arith.xori %4, %5 : i1
    %7 = arith.andi %6, %3 : i1
    %8 = arith.addi %2, %1 : i32
    %9 = arith.select %7, %8, %2 : i32
    %c0_i32_3 = arith.constant 0 : i32
    %10 = arith.cmpi eq, %arg1, %c0_i32_3 : i32
    %11 = arith.extui %10 : i1 to i32
    %c0_i32_4 = arith.constant 0 : i32
    %12 = arith.cmpi ne, %11, %c0_i32_4 : i32
    scf.if %12 {
      %c8_i32_64 = arith.constant 8 : i32
      %111 = arith.muli %arg1, %c8_i32_64 : i32
      %c1_i32_65 = arith.constant 1 : i32
      %112 = arith.subi %111, %c1_i32_65 : i32
      %c0_i32_66 = arith.constant 0 : i32
      %113 = arith.maxsi %112, %c0_i32_66 : i32
      %c8_i32_67 = arith.constant 8 : i32
      %114 = arith.muli %arg1, %c8_i32_67 : i32
      %c8_i32_68 = arith.constant 8 : i32
      %115 = arith.addi %114, %c8_i32_68 : i32
      %c15_i32_69 = arith.constant 15 : i32
      %116 = arith.minsi %115, %c15_i32_69 : i32
      %c8_i32_70 = arith.constant 8 : i32
      %117 = arith.muli %arg1, %c8_i32_70 : i32
      %c0_i32_71 = arith.constant 0 : i32
      %c0_i32_72 = arith.constant 0 : i32
      %118 = tpu.memref_slice %arg2[%arg0, %117, %c0_i32_71, %c0_i32_72] : memref<2x16x16x128xbf16, #tpu.memory_space<any>> -> memref<1x8x16x128xbf16, #tpu.memory_space<any>>
      %119 = tpu.memref_squeeze %118 : memref<1x8x16x128xbf16, #tpu.memory_space<any>> -> memref<8x16x128xbf16, #tpu.memory_space<any>>
      %c1_i32_73 = arith.constant 1 : i32
      %c0_i32_74 = arith.constant 0 : i32
      %c0_i32_75 = arith.constant 0 : i32
      %120 = tpu.memref_slice %arg8[%9, %c1_i32_73, %c0_i32_74, %c0_i32_75] : memref<2x10x16x128xbf16, #tpu.memory_space<vmem>> -> memref<1x8x16x128xbf16, #tpu.memory_space<vmem>>
      %121 = tpu.memref_squeeze %120 : memref<1x8x16x128xbf16, #tpu.memory_space<vmem>> -> memref<8x16x128xbf16, #tpu.memory_space<vmem>>
      %122 = tpu.memref_slice %arg9[%9] : memref<2x!tpu.dma_semaphore, #tpu.memory_space<semaphore_mem>> -> memref<1x!tpu.dma_semaphore, #tpu.memory_space<semaphore_mem>>
      %123 = tpu.memref_squeeze %122 : memref<1x!tpu.dma_semaphore, #tpu.memory_space<semaphore_mem>> -> memref<!tpu.dma_semaphore, #tpu.memory_space<semaphore_mem>>
      tpu.enqueue_dma source(%119 : memref<8x16x128xbf16, #tpu.memory_space<any>>) target(%121 : memref<8x16x128xbf16, #tpu.memory_space<vmem>>) target_semaphore(%123 : memref<!tpu.dma_semaphore, #tpu.memory_space<semaphore_mem>>)
      %c0_i32_76 = arith.constant 0 : i32
      %c0_i32_77 = arith.constant 0 : i32
      %124 = tpu.memref_slice %arg2[%arg0, %113, %c0_i32_76, %c0_i32_77] : memref<2x16x16x128xbf16, #tpu.memory_space<any>> -> memref<1x1x16x128xbf16, #tpu.memory_space<any>>
      %125 = tpu.memref_squeeze %124 : memref<1x1x16x128xbf16, #tpu.memory_space<any>> -> memref<1x16x128xbf16, #tpu.memory_space<any>>
      %c0_i32_78 = arith.constant 0 : i32
      %c0_i32_79 = arith.constant 0 : i32
      %c0_i32_80 = arith.constant 0 : i32
      %126 = tpu.memref_slice %arg8[%9, %c0_i32_78, %c0_i32_79, %c0_i32_80] : memref<2x10x16x128xbf16, #tpu.memory_space<vmem>> -> memref<1x1x16x128xbf16, #tpu.memory_space<vmem>>
      %127 = tpu.memref_squeeze %126 : memref<1x1x16x128xbf16, #tpu.memory_space<vmem>> -> memref<1x16x128xbf16, #tpu.memory_space<vmem>>
      %128 = tpu.memref_slice %arg9[%9] : memref<2x!tpu.dma_semaphore, #tpu.memory_space<semaphore_mem>> -> memref<1x!tpu.dma_semaphore, #tpu.memory_space<semaphore_mem>>
      %129 = tpu.memref_squeeze %128 : memref<1x!tpu.dma_semaphore, #tpu.memory_space<semaphore_mem>> -> memref<!tpu.dma_semaphore, #tpu.memory_space<semaphore_mem>>
      tpu.enqueue_dma source(%125 : memref<1x16x128xbf16, #tpu.memory_space<any>>) target(%127 : memref<1x16x128xbf16, #tpu.memory_space<vmem>>) target_semaphore(%129 : memref<!tpu.dma_semaphore, #tpu.memory_space<semaphore_mem>>)
      %c0_i32_81 = arith.constant 0 : i32
      %c0_i32_82 = arith.constant 0 : i32
      %130 = tpu.memref_slice %arg2[%arg0, %116, %c0_i32_81, %c0_i32_82] : memref<2x16x16x128xbf16, #tpu.memory_space<any>> -> memref<1x1x16x128xbf16, #tpu.memory_space<any>>
      %131 = tpu.memref_squeeze %130 : memref<1x1x16x128xbf16, #tpu.memory_space<any>> -> memref<1x16x128xbf16, #tpu.memory_space<any>>
      %c9_i32_83 = arith.constant 9 : i32
      %c0_i32_84 = arith.constant 0 : i32
      %c0_i32_85 = arith.constant 0 : i32
      %132 = tpu.memref_slice %arg8[%9, %c9_i32_83, %c0_i32_84, %c0_i32_85] : memref<2x10x16x128xbf16, #tpu.memory_space<vmem>> -> memref<1x1x16x128xbf16, #tpu.memory_space<vmem>>
      %133 = tpu.memref_squeeze %132 : memref<1x1x16x128xbf16, #tpu.memory_space<vmem>> -> memref<1x16x128xbf16, #tpu.memory_space<vmem>>
      %134 = tpu.memref_slice %arg9[%9] : memref<2x!tpu.dma_semaphore, #tpu.memory_space<semaphore_mem>> -> memref<1x!tpu.dma_semaphore, #tpu.memory_space<semaphore_mem>>
      %135 = tpu.memref_squeeze %134 : memref<1x!tpu.dma_semaphore, #tpu.memory_space<semaphore_mem>> -> memref<!tpu.dma_semaphore, #tpu.memory_space<semaphore_mem>>
      tpu.enqueue_dma source(%131 : memref<1x16x128xbf16, #tpu.memory_space<any>>) target(%133 : memref<1x16x128xbf16, #tpu.memory_space<vmem>>) target_semaphore(%135 : memref<!tpu.dma_semaphore, #tpu.memory_space<semaphore_mem>>)
    } else {
    }
    %c1_i32_5 = arith.constant 1 : i32
    %13 = arith.addi %arg1, %c1_i32_5 : i32
    %c2_i32_6 = arith.constant 2 : i32
    %14 = arith.cmpi slt, %13, %c2_i32_6 : i32
    %15 = arith.extui %14 : i1 to i32
    %c0_i32_7 = arith.constant 0 : i32
    %16 = arith.cmpi ne, %15, %c0_i32_7 : i32
    scf.if %16 {
      %c1_i32_64 = arith.constant 1 : i32
      %111 = arith.addi %arg1, %c1_i32_64 : i32
      %c1_i32_65 = arith.constant 1 : i32
      %112 = arith.subi %c1_i32_65, %9 : i32
      %c8_i32_66 = arith.constant 8 : i32
      %113 = arith.muli %111, %c8_i32_66 : i32
      %c1_i32_67 = arith.constant 1 : i32
      %114 = arith.subi %113, %c1_i32_67 : i32
      %c0_i32_68 = arith.constant 0 : i32
      %115 = arith.maxsi %114, %c0_i32_68 : i32
      %c8_i32_69 = arith.constant 8 : i32
      %116 = arith.muli %111, %c8_i32_69 : i32
      %c8_i32_70 = arith.constant 8 : i32
      %117 = arith.addi %116, %c8_i32_70 : i32
      %c15_i32_71 = arith.constant 15 : i32
      %118 = arith.minsi %117, %c15_i32_71 : i32
      %c8_i32_72 = arith.constant 8 : i32
      %119 = arith.muli %111, %c8_i32_72 : i32
      %c0_i32_73 = arith.constant 0 : i32
      %c0_i32_74 = arith.constant 0 : i32
      %120 = tpu.memref_slice %arg2[%arg0, %119, %c0_i32_73, %c0_i32_74] : memref<2x16x16x128xbf16, #tpu.memory_space<any>> -> memref<1x8x16x128xbf16, #tpu.memory_space<any>>
      %121 = tpu.memref_squeeze %120 : memref<1x8x16x128xbf16, #tpu.memory_space<any>> -> memref<8x16x128xbf16, #tpu.memory_space<any>>
      %c1_i32_75 = arith.constant 1 : i32
      %c0_i32_76 = arith.constant 0 : i32
      %c0_i32_77 = arith.constant 0 : i32
      %122 = tpu.memref_slice %arg8[%112, %c1_i32_75, %c0_i32_76, %c0_i32_77] : memref<2x10x16x128xbf16, #tpu.memory_space<vmem>> -> memref<1x8x16x128xbf16, #tpu.memory_space<vmem>>
      %123 = tpu.memref_squeeze %122 : memref<1x8x16x128xbf16, #tpu.memory_space<vmem>> -> memref<8x16x128xbf16, #tpu.memory_space<vmem>>
      %124 = tpu.memref_slice %arg9[%112] : memref<2x!tpu.dma_semaphore, #tpu.memory_space<semaphore_mem>> -> memref<1x!tpu.dma_semaphore, #tpu.memory_space<semaphore_mem>>
      %125 = tpu.memref_squeeze %124 : memref<1x!tpu.dma_semaphore, #tpu.memory_space<semaphore_mem>> -> memref<!tpu.dma_semaphore, #tpu.memory_space<semaphore_mem>>
      tpu.enqueue_dma source(%121 : memref<8x16x128xbf16, #tpu.memory_space<any>>) target(%123 : memref<8x16x128xbf16, #tpu.memory_space<vmem>>) target_semaphore(%125 : memref<!tpu.dma_semaphore, #tpu.memory_space<semaphore_mem>>)
      %c0_i32_78 = arith.constant 0 : i32
      %c0_i32_79 = arith.constant 0 : i32
      %126 = tpu.memref_slice %arg2[%arg0, %115, %c0_i32_78, %c0_i32_79] : memref<2x16x16x128xbf16, #tpu.memory_space<any>> -> memref<1x1x16x128xbf16, #tpu.memory_space<any>>
      %127 = tpu.memref_squeeze %126 : memref<1x1x16x128xbf16, #tpu.memory_space<any>> -> memref<1x16x128xbf16, #tpu.memory_space<any>>
      %c0_i32_80 = arith.constant 0 : i32
      %c0_i32_81 = arith.constant 0 : i32
      %c0_i32_82 = arith.constant 0 : i32
      %128 = tpu.memref_slice %arg8[%112, %c0_i32_80, %c0_i32_81, %c0_i32_82] : memref<2x10x16x128xbf16, #tpu.memory_space<vmem>> -> memref<1x1x16x128xbf16, #tpu.memory_space<vmem>>
      %129 = tpu.memref_squeeze %128 : memref<1x1x16x128xbf16, #tpu.memory_space<vmem>> -> memref<1x16x128xbf16, #tpu.memory_space<vmem>>
      %130 = tpu.memref_slice %arg9[%112] : memref<2x!tpu.dma_semaphore, #tpu.memory_space<semaphore_mem>> -> memref<1x!tpu.dma_semaphore, #tpu.memory_space<semaphore_mem>>
      %131 = tpu.memref_squeeze %130 : memref<1x!tpu.dma_semaphore, #tpu.memory_space<semaphore_mem>> -> memref<!tpu.dma_semaphore, #tpu.memory_space<semaphore_mem>>
      tpu.enqueue_dma source(%127 : memref<1x16x128xbf16, #tpu.memory_space<any>>) target(%129 : memref<1x16x128xbf16, #tpu.memory_space<vmem>>) target_semaphore(%131 : memref<!tpu.dma_semaphore, #tpu.memory_space<semaphore_mem>>)
      %c0_i32_83 = arith.constant 0 : i32
      %c0_i32_84 = arith.constant 0 : i32
      %132 = tpu.memref_slice %arg2[%arg0, %118, %c0_i32_83, %c0_i32_84] : memref<2x16x16x128xbf16, #tpu.memory_space<any>> -> memref<1x1x16x128xbf16, #tpu.memory_space<any>>
      %133 = tpu.memref_squeeze %132 : memref<1x1x16x128xbf16, #tpu.memory_space<any>> -> memref<1x16x128xbf16, #tpu.memory_space<any>>
      %c9_i32_85 = arith.constant 9 : i32
      %c0_i32_86 = arith.constant 0 : i32
      %c0_i32_87 = arith.constant 0 : i32
      %134 = tpu.memref_slice %arg8[%112, %c9_i32_85, %c0_i32_86, %c0_i32_87] : memref<2x10x16x128xbf16, #tpu.memory_space<vmem>> -> memref<1x1x16x128xbf16, #tpu.memory_space<vmem>>
      %135 = tpu.memref_squeeze %134 : memref<1x1x16x128xbf16, #tpu.memory_space<vmem>> -> memref<1x16x128xbf16, #tpu.memory_space<vmem>>
      %136 = tpu.memref_slice %arg9[%112] : memref<2x!tpu.dma_semaphore, #tpu.memory_space<semaphore_mem>> -> memref<1x!tpu.dma_semaphore, #tpu.memory_space<semaphore_mem>>
      %137 = tpu.memref_squeeze %136 : memref<1x!tpu.dma_semaphore, #tpu.memory_space<semaphore_mem>> -> memref<!tpu.dma_semaphore, #tpu.memory_space<semaphore_mem>>
      tpu.enqueue_dma source(%133 : memref<1x16x128xbf16, #tpu.memory_space<any>>) target(%135 : memref<1x16x128xbf16, #tpu.memory_space<vmem>>) target_semaphore(%137 : memref<!tpu.dma_semaphore, #tpu.memory_space<semaphore_mem>>)
    } else {
    }
    %c8_i32 = arith.constant 8 : i32
    %17 = arith.muli %arg1, %c8_i32 : i32
    %c1_i32_8 = arith.constant 1 : i32
    %18 = arith.subi %17, %c1_i32_8 : i32
    %c0_i32_9 = arith.constant 0 : i32
    %19 = arith.maxsi %18, %c0_i32_9 : i32
    %c8_i32_10 = arith.constant 8 : i32
    %20 = arith.muli %arg1, %c8_i32_10 : i32
    %c8_i32_11 = arith.constant 8 : i32
    %21 = arith.addi %20, %c8_i32_11 : i32
    %c15_i32 = arith.constant 15 : i32
    %22 = arith.minsi %21, %c15_i32 : i32
    %c8_i32_12 = arith.constant 8 : i32
    %23 = arith.muli %arg1, %c8_i32_12 : i32
    %c0_i32_13 = arith.constant 0 : i32
    %c0_i32_14 = arith.constant 0 : i32
    %24 = tpu.memref_slice %arg2[%arg0, %23, %c0_i32_13, %c0_i32_14] : memref<2x16x16x128xbf16, #tpu.memory_space<any>> -> memref<1x8x16x128xbf16, #tpu.memory_space<any>>
    %25 = tpu.memref_squeeze %24 : memref<1x8x16x128xbf16, #tpu.memory_space<any>> -> memref<8x16x128xbf16, #tpu.memory_space<any>>
    %c1_i32_15 = arith.constant 1 : i32
    %c0_i32_16 = arith.constant 0 : i32
    %c0_i32_17 = arith.constant 0 : i32
    %26 = tpu.memref_slice %arg8[%9, %c1_i32_15, %c0_i32_16, %c0_i32_17] : memref<2x10x16x128xbf16, #tpu.memory_space<vmem>> -> memref<1x8x16x128xbf16, #tpu.memory_space<vmem>>
    %27 = tpu.memref_squeeze %26 : memref<1x8x16x128xbf16, #tpu.memory_space<vmem>> -> memref<8x16x128xbf16, #tpu.memory_space<vmem>>
    %28 = tpu.memref_slice %arg9[%9] : memref<2x!tpu.dma_semaphore, #tpu.memory_space<semaphore_mem>> -> memref<1x!tpu.dma_semaphore, #tpu.memory_space<semaphore_mem>>
    %29 = tpu.memref_squeeze %28 : memref<1x!tpu.dma_semaphore, #tpu.memory_space<semaphore_mem>> -> memref<!tpu.dma_semaphore, #tpu.memory_space<semaphore_mem>>
    tpu.wait_dma2 semaphore(%29 : memref<!tpu.dma_semaphore, #tpu.memory_space<semaphore_mem>>) src(%25 : memref<8x16x128xbf16, #tpu.memory_space<any>>) dst(%27 : memref<8x16x128xbf16, #tpu.memory_space<vmem>>)
    %c0_i32_18 = arith.constant 0 : i32
    %c0_i32_19 = arith.constant 0 : i32
    %30 = tpu.memref_slice %arg2[%arg0, %19, %c0_i32_18, %c0_i32_19] : memref<2x16x16x128xbf16, #tpu.memory_space<any>> -> memref<1x1x16x128xbf16, #tpu.memory_space<any>>
    %31 = tpu.memref_squeeze %30 : memref<1x1x16x128xbf16, #tpu.memory_space<any>> -> memref<1x16x128xbf16, #tpu.memory_space<any>>
    %c0_i32_20 = arith.constant 0 : i32
    %c0_i32_21 = arith.constant 0 : i32
    %c0_i32_22 = arith.constant 0 : i32
    %32 = tpu.memref_slice %arg8[%9, %c0_i32_20, %c0_i32_21, %c0_i32_22] : memref<2x10x16x128xbf16, #tpu.memory_space<vmem>> -> memref<1x1x16x128xbf16, #tpu.memory_space<vmem>>
    %33 = tpu.memref_squeeze %32 : memref<1x1x16x128xbf16, #tpu.memory_space<vmem>> -> memref<1x16x128xbf16, #tpu.memory_space<vmem>>
    %34 = tpu.memref_slice %arg9[%9] : memref<2x!tpu.dma_semaphore, #tpu.memory_space<semaphore_mem>> -> memref<1x!tpu.dma_semaphore, #tpu.memory_space<semaphore_mem>>
    %35 = tpu.memref_squeeze %34 : memref<1x!tpu.dma_semaphore, #tpu.memory_space<semaphore_mem>> -> memref<!tpu.dma_semaphore, #tpu.memory_space<semaphore_mem>>
    tpu.wait_dma2 semaphore(%35 : memref<!tpu.dma_semaphore, #tpu.memory_space<semaphore_mem>>) src(%31 : memref<1x16x128xbf16, #tpu.memory_space<any>>) dst(%33 : memref<1x16x128xbf16, #tpu.memory_space<vmem>>)
    %c0_i32_23 = arith.constant 0 : i32
    %c0_i32_24 = arith.constant 0 : i32
    %36 = tpu.memref_slice %arg2[%arg0, %22, %c0_i32_23, %c0_i32_24] : memref<2x16x16x128xbf16, #tpu.memory_space<any>> -> memref<1x1x16x128xbf16, #tpu.memory_space<any>>
    %37 = tpu.memref_squeeze %36 : memref<1x1x16x128xbf16, #tpu.memory_space<any>> -> memref<1x16x128xbf16, #tpu.memory_space<any>>
    %c9_i32 = arith.constant 9 : i32
    %c0_i32_25 = arith.constant 0 : i32
    %c0_i32_26 = arith.constant 0 : i32
    %38 = tpu.memref_slice %arg8[%9, %c9_i32, %c0_i32_25, %c0_i32_26] : memref<2x10x16x128xbf16, #tpu.memory_space<vmem>> -> memref<1x1x16x128xbf16, #tpu.memory_space<vmem>>
    %39 = tpu.memref_squeeze %38 : memref<1x1x16x128xbf16, #tpu.memory_space<vmem>> -> memref<1x16x128xbf16, #tpu.memory_space<vmem>>
    %40 = tpu.memref_slice %arg9[%9] : memref<2x!tpu.dma_semaphore, #tpu.memory_space<semaphore_mem>> -> memref<1x!tpu.dma_semaphore, #tpu.memory_space<semaphore_mem>>
    %41 = tpu.memref_squeeze %40 : memref<1x!tpu.dma_semaphore, #tpu.memory_space<semaphore_mem>> -> memref<!tpu.dma_semaphore, #tpu.memory_space<semaphore_mem>>
    tpu.wait_dma2 semaphore(%41 : memref<!tpu.dma_semaphore, #tpu.memory_space<semaphore_mem>>) src(%37 : memref<1x16x128xbf16, #tpu.memory_space<any>>) dst(%39 : memref<1x16x128xbf16, #tpu.memory_space<vmem>>)
    %c0 = arith.constant 0 : index
    %c0_27 = arith.constant 0 : index
    %42 = vector.load %arg3[%c0, %c0_27] : memref<1x128xf32, #tpu.memory_space<vmem>>, vector<1x128xf32>
    %43 = vector.shape_cast %42 : vector<1x128xf32> to vector<1x1x128xf32>
    %c0_28 = arith.constant 0 : index
    %c0_29 = arith.constant 0 : index
    %44 = vector.load %arg4[%c0_28, %c0_29] : memref<1x128xf32, #tpu.memory_space<vmem>>, vector<1x128xf32>
    %45 = vector.shape_cast %44 : vector<1x128xf32> to vector<1x1x128xf32>
    %46 = arith.index_cast %9 : i32 to index
    %c0_30 = arith.constant 0 : index
    %c0_31 = arith.constant 0 : index
    %c0_32 = arith.constant 0 : index
    %47 = vector.load %arg8[%46, %c0_30, %c0_31, %c0_32] : memref<2x10x16x128xbf16, #tpu.memory_space<vmem>>, vector<1x10x16x128xbf16>
    %48 = vector.shape_cast %47 : vector<1x10x16x128xbf16> to vector<10x16x128xbf16>
    %49 = arith.extf %48 : vector<10x16x128xbf16> to vector<10x16x128xf32>
    %50 = vector.broadcast %43 : vector<1x1x128xf32> to vector<10x16x128xf32>
    %51 = arith.mulf %49, %50 : vector<10x16x128xf32>
    %52 = vector.broadcast %45 : vector<1x1x128xf32> to vector<10x16x128xf32>
    %53 = arith.addf %51, %52 : vector<10x16x128xf32>
    %cst = arith.constant 0.000000e+00 : f32
    %54 = vector.broadcast %cst : f32 to vector<10x16x128xf32>
    %55 = arith.maximumf %53, %54 : vector<10x16x128xf32>
    %56 = tpu.iota {dimensions = array<i32: 0>} : vector<10x16x128xi32>
    %c0_i32_33 = arith.constant 0 : i32
    %57 = arith.cmpi eq, %arg1, %c0_i32_33 : i32
    %c0_i32_34 = arith.constant 0 : i32
    %58 = vector.broadcast %c0_i32_34 : i32 to vector<10x16x128xi32>
    %59 = arith.cmpi eq, %56, %58 : vector<10x16x128xi32>
    %60 = vector.broadcast %57 : i1 to vector<10x16x128xi1>
    %61 = arith.andi %60, %59 : vector<10x16x128xi1>
    %c1_i32_35 = arith.constant 1 : i32
    %62 = arith.cmpi eq, %arg1, %c1_i32_35 : i32
    %c9_i32_36 = arith.constant 9 : i32
    %63 = vector.broadcast %c9_i32_36 : i32 to vector<10x16x128xi32>
    %64 = arith.cmpi eq, %56, %63 : vector<10x16x128xi32>
    %65 = vector.broadcast %62 : i1 to vector<10x16x128xi1>
    %66 = arith.andi %65, %64 : vector<10x16x128xi1>
    %67 = arith.ori %61, %66 : vector<10x16x128xi1>
    %cst_37 = arith.constant 0.000000e+00 : f32
    %68 = vector.broadcast %cst_37 : f32 to vector<10x16x128xf32>
    %69 = arith.select %67, %68, %55 : vector<10x16x128xi1>, vector<10x16x128xf32>
    %70 = arith.truncf %69 : vector<10x16x128xf32> to vector<10x16x128xbf16>
    %cst_38 = arith.constant 0.000000e+00 : f32
    %71 = vector.broadcast %cst_38 : f32 to vector<128x128xf32>
    %cst_39 = arith.constant 0.000000e+00 : bf16
    %72 = vector.broadcast %cst_39 : bf16 to vector<10x1x128xbf16>
    %73 = tpu.concatenate %72, %70, %72 in 1 : vector<10x1x128xbf16>, vector<10x16x128xbf16>, vector<10x1x128xbf16> -> vector<10x18x128xbf16>
    %74 = vector.extract_strided_slice %73 {offsets = [0, 0, 0], sizes = [10, 16, 128], strides = [1, 1, 1]} : vector<10x18x128xbf16> to vector<10x16x128xbf16>
    %75 = vector.extract_strided_slice %73 {offsets = [0, 2, 0], sizes = [10, 16, 128], strides = [1, 1, 1]} : vector<10x18x128xbf16> to vector<10x16x128xbf16>
    %76 = tpu.concatenate %74, %70, %75 in 2 : vector<10x16x128xbf16>, vector<10x16x128xbf16>, vector<10x16x128xbf16> -> vector<10x16x384xbf16>
    %77 = vector.extract_strided_slice %76 {offsets = [0, 0, 0], sizes = [8, 16, 384], strides = [1, 1, 1]} : vector<10x16x384xbf16> to vector<8x16x384xbf16>
    %78 = vector.shape_cast %77 : vector<8x16x384xbf16> to vector<128x384xbf16>
    %c0_40 = arith.constant 0 : index
    %c0_41 = arith.constant 0 : index
    %c0_42 = arith.constant 0 : index
    %79 = vector.load %arg5[%c0_40, %c0_41, %c0_42] : memref<3x384x128xbf16, #tpu.memory_space<vmem>>, vector<1x384x128xbf16>
    %80 = vector.shape_cast %79 : vector<1x384x128xbf16> to vector<384x128xbf16>
    %cst_43 = arith.constant dense<0.000000e+00> : vector<128x128xf32>
    %81 = tpu.matmul %78, %80, %cst_43 {dimension_numbers = #tpu.dot_dimension_numbers<[1], [0], [0], [1], [0, 0, 1, 1], [], []>} : vector<128x384xbf16>, vector<384x128xbf16>, vector<128x128xf32> -> vector<128x128xf32>
    %82 = arith.addf %71, %81 : vector<128x128xf32>
    %83 = vector.extract_strided_slice %76 {offsets = [1, 0, 0], sizes = [8, 16, 384], strides = [1, 1, 1]} : vector<10x16x384xbf16> to vector<8x16x384xbf16>
    %84 = vector.shape_cast %83 : vector<8x16x384xbf16> to vector<128x384xbf16>
    %c1 = arith.constant 1 : index
    %c0_44 = arith.constant 0 : index
    %c0_45 = arith.constant 0 : index
    %85 = vector.load %arg5[%c1, %c0_44, %c0_45] : memref<3x384x128xbf16, #tpu.memory_space<vmem>>, vector<1x384x128xbf16>
    %86 = vector.shape_cast %85 : vector<1x384x128xbf16> to vector<384x128xbf16>
    %cst_46 = arith.constant dense<0.000000e+00> : vector<128x128xf32>
    %87 = tpu.matmul %84, %86, %cst_46 {dimension_numbers = #tpu.dot_dimension_numbers<[1], [0], [0], [1], [0, 0, 1, 1], [], []>} : vector<128x384xbf16>, vector<384x128xbf16>, vector<128x128xf32> -> vector<128x128xf32>
    %88 = arith.addf %82, %87 : vector<128x128xf32>
    %89 = vector.extract_strided_slice %76 {offsets = [2, 0, 0], sizes = [8, 16, 384], strides = [1, 1, 1]} : vector<10x16x384xbf16> to vector<8x16x384xbf16>
    %90 = vector.shape_cast %89 : vector<8x16x384xbf16> to vector<128x384xbf16>
    %c2 = arith.constant 2 : index
    %c0_47 = arith.constant 0 : index
    %c0_48 = arith.constant 0 : index
    %91 = vector.load %arg5[%c2, %c0_47, %c0_48] : memref<3x384x128xbf16, #tpu.memory_space<vmem>>, vector<1x384x128xbf16>
    %92 = vector.shape_cast %91 : vector<1x384x128xbf16> to vector<384x128xbf16>
    %cst_49 = arith.constant dense<0.000000e+00> : vector<128x128xf32>
    %93 = tpu.matmul %90, %92, %cst_49 {dimension_numbers = #tpu.dot_dimension_numbers<[1], [0], [0], [1], [0, 0, 1, 1], [], []>} : vector<128x384xbf16>, vector<384x128xbf16>, vector<128x128xf32> -> vector<128x128xf32>
    %94 = arith.addf %88, %93 : vector<128x128xf32>
    %95 = vector.shape_cast %94 : vector<128x128xf32> to vector<8x16x128xf32>
    %96 = arith.truncf %95 : vector<8x16x128xf32> to vector<8x16x128xbf16>
    %c0_50 = arith.constant 0 : index
    %c0_51 = arith.constant 0 : index
    %c0_52 = arith.constant 0 : index
    %c0_53 = arith.constant 0 : index
    %97 = vector.load %arg6[%c0_50, %c0_51, %c0_52, %c0_53] : memref<1x8x16x128xbf16, #tpu.memory_space<vmem>>, vector<1x8x16x128xbf16>
    %98 = vector.shape_cast %97 : vector<1x8x16x128xbf16> to vector<8x16x128xbf16>
    %99 = vector.shape_cast %96 : vector<8x16x128xbf16> to vector<1x8x16x128xbf16>
    tpu.vector_store %arg6[%c0_50, %c0_51, %c0_52, %c0_53], %99 {strides = array<i32>} : memref<1x8x16x128xbf16, #tpu.memory_space<vmem>>, vector<1x8x16x128xbf16>,
    %cst_54 = arith.constant dense<0.000000e+00> : vector<128xf32>
    %100 = vector.multi_reduction <add>, %94, %cst_54 [0] : vector<128x128xf32> to vector<128xf32>
    %101 = vector.shape_cast %100 : vector<128xf32> to vector<1x128xf32>
    %c0_55 = arith.constant 0 : index
    %c0_56 = arith.constant 0 : index
    %c0_57 = arith.constant 0 : index
    %c0_58 = arith.constant 0 : index
    %102 = vector.load %arg7[%c0_55, %c0_56, %c0_57, %c0_58] : memref<1x1x2x128xf32, #tpu.memory_space<vmem>>, vector<1x1x1x128xf32>
    %103 = vector.shape_cast %102 : vector<1x1x1x128xf32> to vector<1x128xf32>
    %104 = vector.shape_cast %101 : vector<1x128xf32> to vector<1x1x1x128xf32>
    tpu.vector_store %arg7[%c0_55, %c0_56, %c0_57, %c0_58], %104 {strides = array<i32>} : memref<1x1x2x128xf32, #tpu.memory_space<vmem>>, vector<1x1x1x128xf32>,
    %105 = arith.mulf %94, %94 : vector<128x128xf32>
    %cst_59 = arith.constant dense<0.000000e+00> : vector<128xf32>
    %106 = vector.multi_reduction <add>, %105, %cst_59 [0] : vector<128x128xf32> to vector<128xf32>
    %107 = vector.shape_cast %106 : vector<128xf32> to vector<1x128xf32>
    %c0_60 = arith.constant 0 : index
    %c0_61 = arith.constant 0 : index
    %c1_62 = arith.constant 1 : index
    %c0_63 = arith.constant 0 : index
    %108 = vector.load %arg7[%c0_60, %c0_61, %c1_62, %c0_63] : memref<1x1x2x128xf32, #tpu.memory_space<vmem>>, vector<1x1x1x128xf32>
    %109 = vector.shape_cast %108 : vector<1x1x1x128xf32> to vector<1x128xf32>
    %110 = vector.shape_cast %107 : vector<1x128xf32> to vector<1x1x1x128xf32>
    tpu.vector_store %arg7[%c0_60, %c0_61, %c1_62, %c0_63], %110 {strides = array<i32>} : memref<1x1x2x128xf32, #tpu.memory_space<vmem>>, vector<1x1x1x128xf32>,
    return
  }
  func.func @transform_1(%arg0: i32, %arg1: i32) -> (i32, i32) {
    %c0_i32 = arith.constant 0 : i32
    %c0_i32_0 = arith.constant 0 : i32
    %c0_i32_1 = arith.constant 0 : i32
    return %c0_i32, %c0_i32_0 : i32, i32
  }
  func.func @transform_2(%arg0: i32, %arg1: i32) -> (i32, i32) {
    %c0_i32 = arith.constant 0 : i32
    %c0_i32_0 = arith.constant 0 : i32
    %c0_i32_1 = arith.constant 0 : i32
    return %c0_i32, %c0_i32_0 : i32, i32
  }
  func.func @transform_3(%arg0: i32, %arg1: i32) -> (i32, i32, i32) {
    %c0_i32 = arith.constant 0 : i32
    %c0_i32_0 = arith.constant 0 : i32
    %c0_i32_1 = arith.constant 0 : i32
    %c0_i32_2 = arith.constant 0 : i32
    return %c0_i32, %c0_i32_0, %c0_i32_1 : i32, i32, i32
  }
  func.func @transform_4(%arg0: i32, %arg1: i32) -> (i32, i32, i32, i32) {
    %c0_i32 = arith.constant 0 : i32
    %c0_i32_0 = arith.constant 0 : i32
    %c0_i32_1 = arith.constant 0 : i32
    return %arg0, %arg1, %c0_i32, %c0_i32_0 : i32, i32, i32, i32
  }
  func.func @transform_5(%arg0: i32, %arg1: i32) -> (i32, i32, i32, i32) {
    %c0_i32 = arith.constant 0 : i32
    %c0_i32_0 = arith.constant 0 : i32
    %c0_i32_1 = arith.constant 0 : i32
    return %arg0, %arg1, %c0_i32, %c0_i32_0 : i32, i32, i32, i32
  }
}

</mosaic_0001>

<bundles_post_ra>
// kernel: tile.8
= control target key start
LH: loop header
LB: loop body
LE: loop exit
PB: predicated region body
PF: predicated region fallthrough
CT: control target
= control target key end

     0   :  { %s22_s0 = inlined_call_operand.vmem [shape: f32[128], index: 0, kind: input, shape index: {}]   ;;  %s23_s1 = inlined_call_operand.vmem [shape: f32[4,128], index: 1, kind: output, shape index: {}]  }
   0x1   :  { %v4_v0 = vld [vmem:[%s22_s0] ss:$0 sm:$0xff] }
   0x2   :  { %5 = vst [vmem:[%s23_s1] sm:$0xf] %v4_v0 }

// kernel: decoder_block_forward.4
= control target key start
LH: loop header
LB: loop body
LE: loop exit
PB: predicated region body
PF: predicated region fallthrough
CT: control target
= control target key end

     0   :  { %s1054_s12 = smov 0   ;;  %s1056_s13 = smov 0   ;;  %s1266_s0 = inlined_call_operand.vmem [shape: bf16[2,8,8,128], index: 0, kind: input, shape index: {}]   ;;  %s1267_s1 = inlined_call_operand.vmem [shape: bf16[128,512], index: 1, kind: input, shape index: {}]   ;;  %s1268_s2 = inlined_call_operand.vmem [shape: f32[1,512], index: 2, kind: input, shape index: {}]   ;;  %s1269_s3 = inlined_call_operand.vmem [shape: bf16[2,8,2,8,256], index: 3, kind: output, shape index: {}]  }
   0x1   :  { %s1058_s14 = smov 0  }
   0x2 LB: > { %s25_s15 = sadd.s32 1, %s1027_s13  ;;  %p847_p0 = scmp.ge.s32.totalorder %s1031_s14, 1  ;;  %s1031_s14 = sphi %s1058_s14, %s13_s14   ;;  %s1027_s13 = sphi %s1056_s13, %s1271_s13   ;;  %s1023_s12 = sphi %s1054_s12, %s1270_s12  }
   0x3   : > { %p27_p1 = scmp.ge.s32.totalorder %s25_s15, 2  ;;  %p158_p2 = scmp.lt.s32.totalorder %s1031_s14, 3 }
   0x5   : > { %s1273_s15 = smov (%p27_p1, %s25_s15), 0  ;;  %p159_p3 = pnand %p847_p0, %p158_p2 }
   0x6   : > { %v957_v0 = vld [vmem:[%s1267_s1 + $0x4] ss:$16 sps:$4 sm:$0xff] (!%p159_p3)   ;;  %v959_v1 = vld [vmem:[%s1267_s1 + $0xc] ss:$16 sps:$4 sm:$0xff] (!%p159_p3)   ;;  %v1033_v2 = vmov (!%p159_p3), 0   ;;  %p192_p4 = scmp.lt.s32.totalorder (!%p159_p3), %s1023_s12, 1  ;;  %v255_v37 = vlaneseq (!%p159_p3) }
   0x7   : > { %162 = sbr.rel (%p159_p3) target bundleno = 284 (0x11c), region = 32  ;;  %491 = vmatprep.mubr.bf16.mxu0 (!%p159_p3), %v1033_v2  ;;  %564 = vmatprep.mubr.bf16.mxu1 (!%p159_p3), %v1033_v2  ;;  %v961_v3 = vld [vmem:[%s1267_s1] ss:$16 sps:$4 sm:$0xff] (!%p159_p3)   ;;  %v962_v4 = vld [vmem:[%s1267_s1 + $0x8] ss:$16 sps:$4 sm:$0xff] (!%p159_p3)  }
   0x8   : > { %459 = vmatprep.subr.bf16.mxu0 (!%p159_p3), %v957_v0  ;;  %532 = vmatprep.subr.bf16.mxu1 (!%p159_p3), %v959_v1  ;;  %v963_v5 = vld [vmem:[%s1267_s1 + $0x24] ss:$16 sps:$4 sm:$0xff] (!%p159_p3)   ;;  %v965_v6 = vld [vmem:[%s1267_s1 + $0x2c] ss:$16 sps:$4 sm:$0xff] (!%p159_p3)   ;;  %v967_v7 = vld [vmem:[%s1267_s1 + $0x20] ss:$16 sps:$4 sm:$0xff] (!%p159_p3)  }
   0x9   : > { %460 = vmatpush1.bf16.msra.mxu0 (!%p159_p3), %v961_v3  ;;  %533 = vmatpush1.bf16.msra.mxu1 (!%p159_p3), %v962_v4  ;;  %v968_v8 = vld [vmem:[%s1267_s1 + $0x28] ss:$16 sps:$4 sm:$0xff] (!%p159_p3)   ;;  %v969_v9 = vld [vmem:[%s1267_s1 + $0x44] ss:$16 sps:$4 sm:$0xff] (!%p159_p3)   ;;  %v971_v10 = vld [vmem:[%s1267_s1 + $0x4c] ss:$16 sps:$4 sm:$0xff] (!%p159_p3)  }
   0xa   : > { %461 = vmatprep.subr.bf16.mxu0 (!%p159_p3), %v963_v5  ;;  %534 = vmatprep.subr.bf16.mxu1 (!%p159_p3), %v965_v6  ;;  %v973_v11 = vld [vmem:[%s1267_s1 + $0x40] ss:$16 sps:$4 sm:$0xff] (!%p159_p3)   ;;  %v974_v12 = vld [vmem:[%s1267_s1 + $0x48] ss:$16 sps:$4 sm:$0xff] (!%p159_p3)   ;;  %v975_v13 = vld [vmem:[%s1267_s1 + $0x64] ss:$16 sps:$4 sm:$0xff] (!%p159_p3)  }
   0xb   : > { %v977_v14 = vld [vmem:[%s1267_s1 + $0x6c] ss:$16 sps:$4 sm:$0xff] (!%p159_p3)   ;;  %v979_v15 = vld [vmem:[%s1267_s1 + $0x60] ss:$16 sps:$4 sm:$0xff] (!%p159_p3)   ;;  %v980_v16 = vld [vmem:[%s1267_s1 + $0x68] ss:$16 sps:$4 sm:$0xff] (!%p159_p3)  }
   0xc   : > { %v981_v17 = vld [vmem:[%s1267_s1 + $0x84] ss:$16 sps:$4 sm:$0xff] (!%p159_p3)   ;;  %v983_v18 = vld [vmem:[%s1267_s1 + $0x8c] ss:$16 sps:$4 sm:$0xff] (!%p159_p3)   ;;  %v985_v19 = vld [vmem:[%s1267_s1 + $0x80] ss:$16 sps:$4 sm:$0xff] (!%p159_p3)  }
   0xd   : > { %462 = vmatpush1.bf16.msra.mxu0 (!%p159_p3), %v967_v7  ;;  %535 = vmatpush1.bf16.msra.mxu1 (!%p159_p3), %v968_v8  ;;  %v986_v20 = vld [vmem:[%s1267_s1 + $0x88] ss:$16 sps:$4 sm:$0xff] (!%p159_p3)   ;;  %v987_v21 = vld [vmem:[%s1267_s1 + $0xa4] ss:$16 sps:$4 sm:$0xff] (!%p159_p3)   ;;  %v989_v22 = vld [vmem:[%s1267_s1 + $0xac] ss:$16 sps:$4 sm:$0xff] (!%p159_p3)  }
   0xe   : > { %463 = vmatprep.subr.bf16.mxu0 %v969_v9  ;;  %536 = vmatprep.subr.bf16.mxu1 %v971_v10  ;;  %s1275_s12 = smov (!%p192_p4, %s1023_s12), 1  ;;  %v991_v23 = vld [vmem:[%s1267_s1 + $0xa0] ss:$16 sps:$4 sm:$0xff]   ;;  %v992_v24 = vld [vmem:[%s1267_s1 + $0xa8] ss:$16 sps:$4 sm:$0xff]   ;;  %v256_v38 = vshrl.u32 %v255_v37, 7 }
   0xf   : > { %s914_s10 = sshll.u32 %s1275_s12, 5  ;;  %v993_v25 = vld [vmem:[%s1267_s1 + $0xc4] ss:$16 sps:$4 sm:$0xff]   ;;  %v995_v26 = vld [vmem:[%s1267_s1 + $0xcc] ss:$16 sps:$4 sm:$0xff]   ;;  %s915_s17 = sshll.u32 %s1275_s12, 7 }
  0x10   : > { %s1159_s23 = scalar_lea.vmem %s1266_s0, %s914_s10  ;;  %v997_v27 = vld [vmem:[%s1267_s1 + $0xc0] ss:$16 sps:$4 sm:$0xff]   ;;  %v998_v28 = vld [vmem:[%s1267_s1 + $0xc8] ss:$16 sps:$4 sm:$0xff]   ;;  %v999_v29 = vld [vmem:[%s1267_s1 + $0xe4] ss:$16 sps:$4 sm:$0xff]   ;;  %s1211_s20 = scalar_lea.vmem %s1269_s3, %s915_s17 }
  0x11   : > { %464 = vmatpush1.bf16.msra.mxu0 %v973_v11  ;;  %537 = vmatpush1.bf16.msra.mxu1 %v974_v12  ;;  %v1001_v30 = vld [vmem:[%s1267_s1 + $0xec] ss:$16 sps:$4 sm:$0xff]   ;;  %v1003_v31 = vld [vmem:[%s1267_s1 + $0xe0] ss:$16 sps:$4 sm:$0xff]   ;;  %v1004_v32 = vld [vmem:[%s1267_s1 + $0xe8] ss:$16 sps:$4 sm:$0xff]  }
  0x12   : > { %465 = vmatprep.subr.bf16.mxu0 %v975_v13  ;;  %538 = vmatprep.subr.bf16.mxu1 %v977_v14  ;;  %v1005_v33 = vld [vmem:[%s1159_s23] sm:$0xff]   ;;  %v1006_v34 = vld [vmem:[%s1159_s23 + $0x8] sm:$0xff]   ;;  %v1007_v35 = vld [vmem:[%s1159_s23 + $0x10] sm:$0xff]   ;;  %v257_v39 = vsub.s32 0, %v256_v38  ;;  %v265_v40 = vsub.s32 2, %v256_v38  ;;  %v261_v42 = vsub.s32 1, %v256_v38 }
  0x13   : > { %v1008_v36 = vld [vmem:[%s1159_s23 + $0x18] sm:$0xff]   ;;  %v253_v41 = vld [vmem:[%s1268_s2] sm:$0xf]  ;;  %v269_v43 = vsub.s32 3, %v256_v38 }
  0x14   : > { %v1195_v44 = vrot.slane %v253_v41, %v257_v39  ;;  %v1197_v45 = vrot.slane %v253_v41, %v265_v40  ;;  %v1199_v46 = vrot.slane %v253_v41, %v261_v42 }
  0x15   : > { %466 = vmatpush1.bf16.msra.mxu0 %v979_v15  ;;  %539 = vmatpush1.bf16.msra.mxu1 %v980_v16  ;;  %v1201_v47 = vrot.slane %v253_v41, %v269_v43 }
  0x16   : > { %467 = vmatprep.subr.bf16.mxu0 %v981_v17  ;;  %540 = vmatprep.subr.bf16.mxu1 %v983_v18 }
  0x19   : > { %468 = vmatpush1.bf16.msra.mxu0 %v985_v19  ;;  %541 = vmatpush1.bf16.msra.mxu1 %v986_v20 }
  0x1a   : > { %469 = vmatprep.subr.bf16.mxu0 %v987_v21  ;;  %542 = vmatprep.subr.bf16.mxu1 %v989_v22 }
  0x1d   : > { %470 = vmatpush1.bf16.msra.mxu0 %v991_v23  ;;  %543 = vmatpush1.bf16.msra.mxu1 %v992_v24 }
  0x1e   : > { %471 = vmatprep.subr.bf16.mxu0 %v993_v25  ;;  %544 = vmatprep.subr.bf16.mxu1 %v995_v26 }
  0x21   : > { %472 = vmatpush1.bf16.msra.mxu0 %v997_v27  ;;  %545 = vmatpush1.bf16.msra.mxu1 %v998_v28 }
  0x22   : > { %473 = vmatprep.subr.bf16.mxu0 %v999_v29  ;;  %546 = vmatprep.subr.bf16.mxu1 %v1001_v30 }
  0x25   : > { %474 = vmatpush1.bf16.msra.mxu0 %v1003_v31  ;;  %547 = vmatpush1.bf16.msra.mxu1 %v1004_v32 }
  0x28   : > { %492 = vmatmul.mubr.bf16.vlgmr.msra.gmra.mrb[0].mxu0 %v1005_v33  ;;  %565 = vmatmul.mubr.bf16.vlgmr.msra.gmra.mrb[0].mxu1 %v1005_v33 }
  0x29   : > { %501 = vmatprep.mubr.bf16.mxu0 %v1033_v2  ;;  %574 = vmatprep.mubr.bf16.mxu1 %v1033_v2 }
  0x30   : > { %502 = vmatmul.mubr.bf16.gmra.mrb[4].mxu0 %v1006_v34  ;;  %575 = vmatmul.mubr.bf16.gmra.mrb[4].mxu1 %v1006_v34 }
  0x31   : > { %511 = vmatprep.mubr.bf16.mxu0 %v1033_v2  ;;  %584 = vmatprep.mubr.bf16.mxu1 %v1033_v2 }
  0x38   : > { %512 = vmatmul.mubr.bf16.gmra.mrb[8].mxu0 %v1007_v35  ;;  %585 = vmatmul.mubr.bf16.gmra.mrb[8].mxu1 %v1007_v35 }
  0x39   : > { %521 = vmatprep.mubr.bf16.mxu0 %v1033_v2  ;;  %594 = vmatprep.mubr.bf16.mxu1 %v1033_v2 }
  0x40   : > { %522 = vmatmul.mubr.bf16.gmra.mrb[12].mxu0 %v1008_v36  ;;  %595 = vmatmul.mubr.bf16.gmra.mrb[12].mxu1 %v1008_v36 }
  0xfb   : > { %v493_v48 = vpop.f32.mrb[0].mxu0  ;;  %v566_v49 = vpop.f32.mrb[0].mxu1 }
  0xfc   : > { %v494_v50 = vadd.f32 %v493_v48, %v1195_v44  ;;  %v567_v51 = vadd.f32 %v566_v49, %v1197_v45  ;;  %v495_v52 = vpop.f32.mrb[1].mxu0  ;;  %v568_v53 = vpop.f32.mrb[1].mxu1 }
  0xfd   : > { %v496_v54 = vadd.f32 %v495_v52, %v1199_v46  ;;  %v569_v55 = vadd.f32 %v568_v53, %v1201_v47  ;;  %v497_v56 = vpop.f32.mrb[2].mxu0  ;;  %v570_v57 = vpop.f32.mrb[2].mxu1 }
  0xfe   : > { %v498_v58 = vadd.f32 %v497_v56, %v1195_v44  ;;  %v571_v59 = vadd.f32 %v570_v57, %v1197_v45  ;;  %v499_v60 = vpop.f32.mrb[3].mxu0  ;;  %v572_v61 = vpop.f32.mrb[3].mxu1 }
  0xff   : > { %v916_v62 = vpack.c.bf16 %v496_v54, %v494_v50  ;;  %v924_v63 = vpack.c.bf16 %v569_v55, %v567_v51  ;;  %v500_v0 = vadd.f32 %v499_v60, %v1199_v46  ;;  %v573_v1 = vadd.f32 %v572_v61, %v1201_v47 }
 0x101   : > { %669 = vst [vmem:[%s1211_s20] sm:$0xff] %v916_v62  ;;  %904 = vst [vmem:[%s1211_s20 + $0x8] sm:$0xff] %v924_v63  ;;  %v917_v2 = vpack.c.bf16 %v500_v0, %v498_v58  ;;  %v925_v3 = vpack.c.bf16 %v573_v1, %v571_v59 }
 0x103   : > { %670 = vst [vmem:[%s1211_s20 + $0x10] sm:$0xff] %v917_v2  ;;  %905 = vst [vmem:[%s1211_s20 + $0x18] sm:$0xff] %v925_v3  ;;  %v503_v4 = vpop.f32.mrb[4].mxu0  ;;  %v576_v5 = vpop.f32.mrb[4].mxu1 }
 0x104   : > { %v504_v6 = vadd.f32 %v503_v4, %v1195_v44  ;;  %v577_v7 = vadd.f32 %v576_v5, %v1197_v45  ;;  %v505_v8 = vpop.f32.mrb[5].mxu0  ;;  %v578_v9 = vpop.f32.mrb[5].mxu1 }
 0x105   : > { %v506_v10 = vadd.f32 %v505_v8, %v1199_v46  ;;  %v579_v11 = vadd.f32 %v578_v9, %v1201_v47  ;;  %v507_v12 = vpop.f32.mrb[6].mxu0  ;;  %v580_v13 = vpop.f32.mrb[6].mxu1 }
 0x106   : > { %v508_v14 = vadd.f32 %v507_v12, %v1195_v44  ;;  %v581_v15 = vadd.f32 %v580_v13, %v1197_v45  ;;  %v509_v16 = vpop.f32.mrb[7].mxu0  ;;  %v582_v17 = vpop.f32.mrb[7].mxu1 }
 0x107   : > { %v918_v18 = vpack.c.bf16 %v506_v10, %v504_v6  ;;  %v926_v19 = vpack.c.bf16 %v579_v11, %v577_v7  ;;  %v510_v20 = vadd.f32 %v509_v16, %v1199_v46  ;;  %v583_v21 = vadd.f32 %v582_v17, %v1201_v47 }
 0x109   : > { %671 = vst [vmem:[%s1211_s20 + $0x20] sm:$0xff] %v918_v18  ;;  %906 = vst [vmem:[%s1211_s20 + $0x28] sm:$0xff] %v926_v19  ;;  %v919_v22 = vpack.c.bf16 %v510_v20, %v508_v14  ;;  %v927_v23 = vpack.c.bf16 %v583_v21, %v581_v15 }
 0x10b   : > { %672 = vst [vmem:[%s1211_s20 + $0x30] sm:$0xff] %v919_v22  ;;  %907 = vst [vmem:[%s1211_s20 + $0x38] sm:$0xff] %v927_v23  ;;  %v513_v24 = vpop.f32.mrb[8].mxu0  ;;  %v586_v25 = vpop.f32.mrb[8].mxu1 }
 0x10c   : > { %v514_v26 = vadd.f32 %v513_v24, %v1195_v44  ;;  %v587_v27 = vadd.f32 %v586_v25, %v1197_v45  ;;  %v515_v28 = vpop.f32.mrb[9].mxu0  ;;  %v588_v29 = vpop.f32.mrb[9].mxu1 }
 0x10d   : > { %v516_v30 = vadd.f32 %v515_v28, %v1199_v46  ;;  %v589_v31 = vadd.f32 %v588_v29, %v1201_v47  ;;  %v517_v32 = vpop.f32.mrb[10].mxu0  ;;  %v590_v33 = vpop.f32.mrb[10].mxu1 }
 0x10e   : > { %v518_v34 = vadd.f32 %v517_v32, %v1195_v44  ;;  %v591_v35 = vadd.f32 %v590_v33, %v1197_v45  ;;  %v519_v36 = vpop.f32.mrb[11].mxu0  ;;  %v592_v37 = vpop.f32.mrb[11].mxu1 }
 0x10f   : > { %v920_v38 = vpack.c.bf16 %v516_v30, %v514_v26  ;;  %v928_v39 = vpack.c.bf16 %v589_v31, %v587_v27  ;;  %v520_v40 = vadd.f32 %v519_v36, %v1199_v46  ;;  %v593_v41 = vadd.f32 %v592_v37, %v1201_v47 }
 0x111   : > { %673 = vst [vmem:[%s1211_s20 + $0x40] sm:$0xff] %v920_v38  ;;  %908 = vst [vmem:[%s1211_s20 + $0x48] sm:$0xff] %v928_v39  ;;  %v921_v42 = vpack.c.bf16 %v520_v40, %v518_v34  ;;  %v929_v43 = vpack.c.bf16 %v593_v41, %v591_v35 }
 0x113   : > { %674 = vst [vmem:[%s1211_s20 + $0x50] sm:$0xff] %v921_v42  ;;  %909 = vst [vmem:[%s1211_s20 + $0x58] sm:$0xff] %v929_v43  ;;  %v523_v48 = vpop.f32.mrb[12].mxu0  ;;  %v596_v49 = vpop.f32.mrb[12].mxu1 }
 0x114   : > { %v524_v50 = vadd.f32 %v523_v48, %v1195_v44  ;;  %v597_v51 = vadd.f32 %v596_v49, %v1197_v45  ;;  %v525_v52 = vpop.f32.mrb[13].mxu0  ;;  %v598_v53 = vpop.f32.mrb[13].mxu1 }
 0x115   : > { %v526_v54 = vadd.f32 %v525_v52, %v1199_v46  ;;  %v599_v55 = vadd.f32 %v598_v53, %v1201_v47  ;;  %v527_v56 = vpop.f32.mrb[14].mxu0  ;;  %v600_v57 = vpop.f32.mrb[14].mxu1 }
 0x116   : > { %v528_v58 = vadd.f32 %v527_v56, %v1195_v44  ;;  %v601_v59 = vadd.f32 %v600_v57, %v1197_v45  ;;  %v529_v60 = vpop.f32.mrb[15].mxu0  ;;  %v602_v61 = vpop.f32.mrb[15].mxu1 }
 0x117   : > { %v922_v62 = vpack.c.bf16 %v526_v54, %v524_v50  ;;  %v930_v63 = vpack.c.bf16 %v599_v55, %v597_v51  ;;  %v530_v0 = vadd.f32 %v529_v60, %v1199_v46  ;;  %v603_v1 = vadd.f32 %v602_v61, %v1201_v47 }
 0x119   : > { %675 = vst [vmem:[%s1211_s20 + $0x60] sm:$0xff] %v922_v62  ;;  %910 = vst [vmem:[%s1211_s20 + $0x68] sm:$0xff] %v930_v63  ;;  %v923_v2 = vpack.c.bf16 %v530_v0, %v528_v58  ;;  %v931_v3 = vpack.c.bf16 %v603_v1, %v601_v59 }
 0x11b   : > { %676 = vst [vmem:[%s1211_s20 + $0x70] sm:$0xff] %v923_v2  ;;  %911 = vst [vmem:[%s1211_s20 + $0x78] sm:$0xff] %v931_v3 }
 0x11c PF: > { %s13_s14 = sadd.s32 1, %s1031_s14   ;;  %s1270_s12 = smov %s1027_s13 }
 0x11d   : > { %p10_p5 = scmp.ge.s32.totalorder %s13_s14, 4   ;;  %s1271_s13 = smov %s1273_s15 }
 0x11f   :  { %12 = sbr.rel (!%p10_p5) target bundleno = 2 (0x2), region = 63 }

// kernel: decoder_block_forward.7
= control target key start
LH: loop header
LB: loop body
LE: loop exit
PB: predicated region body
PF: predicated region fallthrough
CT: control target
= control target key end

     0   :  { %s580_s12 = smov 0   ;;  %s582_s13 = smov 0   ;;  %s705_s0 = inlined_call_operand.vmem [shape: bf16[2,16,16,128], index: 0, kind: input, shape index: {}]   ;;  %s706_s1 = inlined_call_operand.vmem [shape: f32[1,128], index: 1, kind: input, shape index: {}]   ;;  %s707_s2 = inlined_call_operand.vmem [shape: f32[1,128], index: 2, kind: input, shape index: {}]   ;;  %s708_s3 = inlined_call_operand.vmem [shape: f32[2,16,16,128], index: 3, kind: output, shape index: {}]  }
   0x1   :  { %s584_s14 = smov 0   ;;  %s586_s15 = smov 0  }
   0x2   :  { %s588_s16 = smov 0  }
   0x3 LB: > { %s22_s17 = sadd.s32 1, %s550_s14  ;;  %s25_s18 = sadd.s32 1, %s554_s15  ;;  %s558_s16 = sphi %s588_s16, %s13_s16   ;;  %s554_s15 = sphi %s586_s15, %s712_s15   ;;  %s550_s14 = sphi %s584_s14, %s711_s14   ;;  %s546_s13 = sphi %s582_s13, %s710_s13   ;;  %s542_s12 = sphi %s580_s12, %s709_s12  }
   0x4   : > { %p23_p0 = scmp.ge.s32.totalorder %s22_s17, 2  ;;  %p428_p1 = scmp.ge.s32.totalorder %s558_s16, 1 }
   0x5   : > { %p159_p2 = scmp.lt.s32.totalorder %s558_s16, 5 }
   0x6   : > { %s714_s17 = smov (%p23_p0, %s22_s17), 0  ;;  %s716_s18 = smov (!%p23_p0, %s25_s18), %s554_s15 }
   0x7   : > { %p160_p3 = pnand %p428_p1, %p159_p2  ;;  %p27_p4 = scmp.ge.s32.totalorder %s716_s18, 2 }
   0x8   : > { %s429_s19 = sshll.u32 (!%p160_p3), %s542_s12, 3  ;;  %p194_p5 = scmp.lt.s32.totalorder (!%p160_p3), %s546_s13, 1  ;;  %v621_v0 = vld [vmem:[%s706_s1] ss:$0 sm:$0xff] (!%p160_p3) }
   0x9   : > { %s718_s18 = smov (%p27_p4, %s716_s18), 0  ;;  %163 = sbr.rel (%p160_p3) target bundleno = 42 (0x2a), region = 32 }
   0xa   : > { %p196_p6 = scmp.lt.s32.totalorder (!%p160_p3), %s429_s19, 15  ;;  %v630_v9 = vld [vmem:[%s707_s2] ss:$0 sm:$0xff] (!%p160_p3) }
  0x10   : > { %s720_s13 = smov (!%p194_p5, %s546_s13), 1  ;;  %s722_s19 = smov (!%p196_p6, %s429_s19), 15 }
  0x11   : > { %s431_s20 = sshll.u32 %s720_s13, 5  ;;  %s430_s21 = sshll.u32 %s722_s19, 1 }
  0x12   : > { %s610_s22 = sadd.s32 %s431_s20, %s430_s21 }
  0x13   : > { %s432_s23 = sshll.u32 %s610_s22, 2  ;;  %s436_s4 = sshll.u32 %s610_s22, 3 }
  0x14   : > { %s616_s26 = scalar_lea.vmem %s705_s0, %s432_s23  ;;  %s648_s7 = scalar_lea.vmem %s708_s3, %s436_s4 }
  0x15   : > { %v442_v1 = vld [vmem:[%s616_s26] sm:$0xff]   ;;  %v473_v2 = vld [vmem:[%s616_s26 + $0x8] sm:$0xff]   ;;  %v474_v3 = vld [vmem:[%s616_s26 + $0x10] sm:$0xff]  }
  0x16   : > { %v443_v4 = vunpack.c.l.bf16 %v442_v1  ;;  %v444_v5 = vunpack.c.h.bf16 %v442_v1  ;;  %v447_v6 = vunpack.c.l.bf16 %v473_v2  ;;  %v448_v7 = vunpack.c.h.bf16 %v473_v2  ;;  %v475_v8 = vld [vmem:[%s616_s26 + $0x18] sm:$0xff]   ;;  %v476_v30 = vld [vmem:[%s616_s26 + $0x20] sm:$0xff]   ;;  %v477_v31 = vld [vmem:[%s616_s26 + $0x28] sm:$0xff]  }
  0x17   : > { %v451_v10 = vunpack.c.l.bf16 %v474_v3  ;;  %v452_v11 = vunpack.c.h.bf16 %v474_v3  ;;  %v455_v12 = vunpack.c.l.bf16 %v475_v8  ;;  %v456_v13 = vunpack.c.h.bf16 %v475_v8  ;;  %v478_v36 = vld [vmem:[%s616_s26 + $0x30] sm:$0xff]   ;;  %v479_v37 = vld [vmem:[%s616_s26 + $0x38] sm:$0xff]  }
  0x18   : > { %v255_v14 = vmul.f32 %v443_v4, %v621_v0  ;;  %v256_v15 = vmul.f32 %v444_v5, %v621_v0  ;;  %v257_v16 = vmul.f32 %v447_v6, %v621_v0  ;;  %v258_v17 = vmul.f32 %v448_v7, %v621_v0 }
  0x19   : > { %v259_v18 = vmul.f32 %v451_v10, %v621_v0  ;;  %v260_v19 = vmul.f32 %v452_v11, %v621_v0  ;;  %v261_v20 = vmul.f32 %v455_v12, %v621_v0  ;;  %v262_v21 = vmul.f32 %v456_v13, %v621_v0 }
  0x1a   : > { %v277_v22 = vadd.f32 %v630_v9, %v255_v14  ;;  %v278_v23 = vadd.f32 %v630_v9, %v256_v15  ;;  %v279_v24 = vadd.f32 %v630_v9, %v257_v16  ;;  %v280_v25 = vadd.f32 %v630_v9, %v258_v17 }
  0x1b   : > { %v281_v26 = vadd.f32 %v630_v9, %v259_v18  ;;  %v282_v27 = vadd.f32 %v630_v9, %v260_v19  ;;  %v283_v28 = vadd.f32 %v630_v9, %v261_v20  ;;  %v284_v29 = vadd.f32 %v630_v9, %v262_v21 }
  0x1c   : > { %v293_v32 = vmax.f32 %v277_v22, 0.0  ;;  %v294_v33 = vmax.f32 %v278_v23, 0.0  ;;  %v295_v34 = vmax.f32 %v279_v24, 0.0  ;;  %v296_v35 = vmax.f32 %v280_v25, 0.0 }
  0x1d   : > { %v297_v38 = vmax.f32 %v281_v26, 0.0  ;;  %v298_v39 = vmax.f32 %v282_v27, 0.0  ;;  %v299_v40 = vmax.f32 %v283_v28, 0.0  ;;  %v300_v41 = vmax.f32 %v284_v29, 0.0 }
  0x1e   : > { %309 = vst [vmem:[%s648_s7] sm:$0xff] %v293_v32  ;;  %310 = vst [vmem:[%s648_s7 + $0x8] sm:$0xff] %v294_v33  ;;  %v459_v42 = vunpack.c.l.bf16 %v476_v30  ;;  %v460_v43 = vunpack.c.h.bf16 %v476_v30  ;;  %v463_v44 = vunpack.c.l.bf16 %v477_v31  ;;  %v464_v45 = vunpack.c.h.bf16 %v477_v31 }
  0x1f   : > { %311 = vst [vmem:[%s648_s7 + $0x10] sm:$0xff] %v295_v34  ;;  %312 = vst [vmem:[%s648_s7 + $0x18] sm:$0xff] %v296_v35  ;;  %v467_v46 = vunpack.c.l.bf16 %v478_v36  ;;  %v468_v47 = vunpack.c.h.bf16 %v478_v36  ;;  %v471_v48 = vunpack.c.l.bf16 %v479_v37  ;;  %v472_v49 = vunpack.c.h.bf16 %v479_v37 }
  0x20   : > { %313 = vst [vmem:[%s648_s7 + $0x20] sm:$0xff] %v297_v38  ;;  %314 = vst [vmem:[%s648_s7 + $0x28] sm:$0xff] %v298_v39  ;;  %v263_v50 = vmul.f32 %v459_v42, %v621_v0  ;;  %v264_v51 = vmul.f32 %v460_v43, %v621_v0  ;;  %v265_v52 = vmul.f32 %v463_v44, %v621_v0 }
  0x21   : > { %315 = vst [vmem:[%s648_s7 + $0x30] sm:$0xff] %v299_v40  ;;  %316 = vst [vmem:[%s648_s7 + $0x38] sm:$0xff] %v300_v41  ;;  %v266_v53 = vmul.f32 %v464_v45, %v621_v0  ;;  %v267_v54 = vmul.f32 %v467_v46, %v621_v0  ;;  %v268_v55 = vmul.f32 %v468_v47, %v621_v0 }
  0x22   : > { %v269_v56 = vmul.f32 %v471_v48, %v621_v0  ;;  %v270_v57 = vmul.f32 %v472_v49, %v621_v0  ;;  %v285_v58 = vadd.f32 %v630_v9, %v263_v50  ;;  %v286_v59 = vadd.f32 %v630_v9, %v264_v51 }
  0x23   : > { %v287_v60 = vadd.f32 %v630_v9, %v265_v52  ;;  %v288_v61 = vadd.f32 %v630_v9, %v266_v53  ;;  %v289_v62 = vadd.f32 %v630_v9, %v267_v54  ;;  %v290_v63 = vadd.f32 %v630_v9, %v268_v55 }
  0x24   : > { %v291_v0 = vadd.f32 %v630_v9, %v269_v56  ;;  %v292_v1 = vadd.f32 %v630_v9, %v270_v57  ;;  %v301_v2 = vmax.f32 %v285_v58, 0.0  ;;  %v302_v3 = vmax.f32 %v286_v59, 0.0 }
  0x25   : > { %v303_v4 = vmax.f32 %v287_v60, 0.0  ;;  %v304_v5 = vmax.f32 %v288_v61, 0.0  ;;  %v305_v6 = vmax.f32 %v289_v62, 0.0  ;;  %v306_v7 = vmax.f32 %v290_v63, 0.0 }
  0x26   : > { %v307_v8 = vmax.f32 %v291_v0, 0.0  ;;  %v308_v10 = vmax.f32 %v292_v1, 0.0  ;;  %317 = vst [vmem:[%s648_s7 + $0x40] sm:$0xff] %v301_v2  ;;  %318 = vst [vmem:[%s648_s7 + $0x48] sm:$0xff] %v302_v3 }
  0x27   : > { %319 = vst [vmem:[%s648_s7 + $0x50] sm:$0xff] %v303_v4  ;;  %320 = vst [vmem:[%s648_s7 + $0x58] sm:$0xff] %v304_v5 }
  0x28   : > { %321 = vst [vmem:[%s648_s7 + $0x60] sm:$0xff] %v305_v6  ;;  %322 = vst [vmem:[%s648_s7 + $0x68] sm:$0xff] %v306_v7 }
  0x29   : > { %323 = vst [vmem:[%s648_s7 + $0x70] sm:$0xff] %v307_v8  ;;  %324 = vst [vmem:[%s648_s7 + $0x78] sm:$0xff] %v308_v10 }
  0x2a PF: > { %s13_s16 = sadd.s32 1, %s558_s16   ;;  %s709_s12 = smov %s550_s14 }
  0x2b   : > { %p10_p7 = scmp.ge.s32.totalorder %s13_s16, 6   ;;  %s710_s13 = smov %s554_s15 }
  0x2c   : > { %s711_s14 = smov %s714_s17  ;;  %s712_s15 = smov %s718_s18 }
  0x2d   :  { %12 = sbr.rel (!%p10_p7) target bundleno = 3 (0x3), region = 62 }

// kernel: decoder_block_forward.6
= control target key start
LH: loop header
LB: loop body
LE: loop exit
PB: predicated region body
PF: predicated region fallthrough
CT: control target
= control target key end

     0   :  { %s3434_s18 = smov 0   ;;  %s3436_s19 = smov 0   ;;  %s4175_s0 = inlined_call_operand.vmem [shape: bf16[2,16,16,128], index: 0, kind: input, shape index: {}]   ;;  %s4176_s1 = inlined_call_operand.vmem [shape: f32[1,128], index: 1, kind: input, shape index: {}]   ;;  %s4177_s2 = inlined_call_operand.vmem [shape: f32[1,128], index: 2, kind: input, shape index: {}]   ;;  %s4178_s3 = inlined_call_operand.vmem [shape: bf16[3,384,128], index: 3, kind: input, shape index: {}]   ;;  %s4179_s4 = inlined_call_operand.vmem [shape: bf16[2,16,16,128], index: 4, kind: output, shape index: {0}]   ;;  %s4180_s5 = inlined_call_operand.vmem [shape: f32[2,2,2,128], index: 5, kind: output, shape index: {1}]  }
   0x1   :  { %4181 = sst [smem:[#allocation13_spill]] %s4179_s4  ;;  %s3438_s20 = smov 0  }
   0x2   :  { %s3440_s21 = smov 0   ;;  %s3442_s22 = smov 0  }
   0x3 LB: > { %s25_s23 = sadd.s32 1, %s3394_s20  ;;  %s28_s24 = sadd.s32 1, %s3398_s21  ;;  %s3402_s22 = sphi %s3442_s22, %s16_s22   ;;  %s3398_s21 = sphi %s3440_s21, %s4198_s21   ;;  %s3394_s20 = sphi %s3438_s20, %s4197_s20   ;;  %s3390_s19 = sphi %s3436_s19, %s4196_s19   ;;  %s3386_s18 = sphi %s3434_s18, %s4195_s18  }
   0x4   : > { %p26_p0 = scmp.ge.s32.totalorder %s25_s23, 2  ;;  %p2480_p1 = scmp.ge.s32.totalorder %s3402_s22, 1 }
   0x5   : > { %p172_p2 = scmp.lt.s32.totalorder %s3402_s22, 5 }
   0x6   : > { %s4200_s23 = smov (%p26_p0, %s25_s23), 0  ;;  %s4202_s24 = smov (!%p26_p0, %s28_s24), %s3398_s21 }
   0x7   : > { %4182 = sst [smem:[#allocation11_spill]] %s4200_s23  ;;  %p173_p3 = pnand %p2480_p1, %p172_p2 }
   0x8   : > { %p30_p4 = scmp.ge.s32.totalorder %s4202_s24, 2  ;;  %s3469_s25 = sshll.u32 (!%p173_p3), %s3386_s18, 3 }
   0x9   : > { %176 = sbr.rel (%p173_p3) target bundleno = 505 (0x1f9), region = 32  ;;  %p207_p5 = scmp.lt.s32.totalorder (!%p173_p3), %s3390_s19, 1 }
   0xa   : > { %s4204_s24 = smov (%p30_p4, %s4202_s24), 0  ;;  %p209_p6 = scmp.lt.s32.totalorder (!%p173_p3), %s3469_s25, 15 }
   0xb   : > { %4183 = sst [smem:[#allocation12_spill]] %s4204_s24  ;;  %p219_p7 = scmp.lt.s32.totalorder (!%p173_p3), %s3386_s18, 1 }
   0xc   : > { %s227_s7 = ssub.s32 (!%p173_p3), 0, %s3386_s18  ;;  %s4184_s4 = sld [smem:[#allocation13_spill]] (!%p173_p3) }
   0xd   : > { %s2487_s9 = smin.u32 (!%p173_p3), %s3386_s18, %s227_s7  ;;  %p226_p8 = scmp.lt.s32.totalorder (!%p173_p3), %s3386_s18, 0 }
   0xe   : > { %s229_s13 = sand.u32 (!%p173_p3), 1, %s2487_s9   ;;  %p238_p9 = scmp.eq.s32.totalorder (!%p173_p3), %s3386_s18, 0 }
   0xf   : > { %s230_s16 = ssub.s32 (!%p173_p3), 0, %s229_s13  ;;  %p2490_p11 = scmp.ne.s32.totalorder (!%p173_p3), %s3386_s18, 0 }
  0x10   : > { %s208_s26 = scalar_select %p207_p5, %s3390_s19, 1 }
  0x11   : > { %s210_s27 = scalar_select %p209_p6, %s3469_s25, 15 }
  0x12   : > { %s2483_s28 = sshll.u32 %s208_s26, 5  ;;  %s2485_s30 = sshll.u32 %s208_s26, 1 }
  0x13   : > { %s2482_s29 = sshll.u32 %s210_s27, 1  ;;  %s4206_s16 = smov (!%p226_p8, %s230_s16), %s229_s13 }
  0x14   : > { %s213_s6 = sadd.s32 %s2483_s28, %s2482_s29  ;;  %p2489_p10 = scmp.lt.s32.totalorder %s4206_s16, 0 }
  0x15   : > { %s2484_s8 = sshll.u32 %s213_s6, 2  ;;  %s236_s27 = sadd.s32 2, %s4206_s16 }
  0x16   : > { %s3481_s12 = scalar_lea.vmem %s4184_s4, %s2484_s8  ;;  %s4208_s27 = smov (!%p2489_p10, %s236_s27), %s4206_s16 }
  0x17   : > { %s220_s14 = scalar_select %p219_p7, %s3386_s18, 1 }
  0x18   : > { %241 = sbr.rel (%p2490_p11) target bundleno = 51 (0x33), region = 36  ;;  %s2492_s28 = sadd.s32 (!%p2490_p11), 4294967295, %s3469_s25 }
  0x19   : > { %s222_s15 = sadd.s32 %s2485_s30, %s220_s14  ;;  %s246_s29 = sadd.s32 (!%p2490_p11), 8, %s3469_s25 }
  0x1a   : > { %s2486_s17 = sshll.u32 %s222_s15, 1  ;;  %p244_p12 = scmp.gt.s32.totalorder (!%p2490_p11), %s2492_s28, 0 }
  0x1b   : > { %s3489_s26 = scalar_lea.vmem %s4180_s5, %s2486_s17  ;;  %p247_p13 = scmp.lt.s32.totalorder (!%p2490_p11), %s246_s29, 15 }
  0x1c   : > { %s2749_s23 = sshll.u32 (!%p2490_p11), %s3386_s18, 4  ;;  %s3498_s24 = sshll.u32 (!%p2490_p11), %s3390_s19, 5 }
  0x1d   : > { %s251_s30 = sadd.s32 (!%p2490_p11), %s2749_s23, %s3498_s24  ;;  %s2496_s6 = smul.u32 (!%p2490_p11), 80, %s4208_s27 }
  0x1e   : > { %s2495_s7 = sshll.u32 (!%p2490_p11), %s251_s30, 2  ;;  %s258_s13 = scalar_lea.sflag (!%p2490_p11), [#allocation3], %s4208_s27 }
  0x1f   : > { %s4210_s28 = smov (!%p244_p12, %s2492_s28), 0  ;;  %s4212_s29 = smov (!%p247_p13, %s246_s29), 15 }
  0x20   : > { %s253_s10 = scalar_lea.vmem %s4175_s0, %s2495_s7  ;;  %s2327_s11 = scalar_lea.vmem [#allocation2], %s2496_s6 }
  0x21   : > { %v291_v0 = vld [vmem:[%s253_s10] sm:$0xff]  ;;  %v293_v1 = vld [vmem:[%s253_s10 + $0x8] sm:$0xff]  ;;  %v295_v2 = vld [vmem:[%s253_s10 + $0x10] sm:$0xff] }
  0x22   : > { %2497 = vst [vmem:[%s2327_s11 + $0x8] sm:$0xff] %v291_v0  ;;  %2498 = vst [vmem:[%s2327_s11 + $0x10] sm:$0xff] %v293_v1  ;;  %v297_v3 = vld [vmem:[%s253_s10 + $0x18] sm:$0xff]  ;;  %v299_v4 = vld [vmem:[%s253_s10 + $0x20] sm:$0xff] }
  0x23   : > { %2499 = vst [vmem:[%s2327_s11 + $0x18] sm:$0xff] %v295_v2  ;;  %v301_v5 = vld [vmem:[%s253_s10 + $0x28] sm:$0xff]  ;;  %2500 = vst [vmem:[%s2327_s11 + $0x20] sm:$0xff] %v297_v3  ;;  %v303_v6 = vld [vmem:[%s253_s10 + $0x30] sm:$0xff] }
  0x24   : > { %2501 = vst [vmem:[%s2327_s11 + $0x28] sm:$0xff] %v299_v4  ;;  %2502 = vst [vmem:[%s2327_s11 + $0x30] sm:$0xff] %v301_v5  ;;  %v305_v7 = vld [vmem:[%s253_s10 + $0x38] sm:$0xff] }
  0x25   : > { %2503 = vst [vmem:[%s2327_s11 + $0x38] sm:$0xff] %v303_v6  ;;  %2504 = vst [vmem:[%s2327_s11 + $0x40] sm:$0xff] %v305_v7 }
  0x26   : > { %314 = vsyncadd %s258_s13, 1024  ;;  %s2506_s14 = sshll.u32 %s4210_s28, 1 }
  0x27   : > { %s316_s15 = sadd.s32 %s2506_s14, %s3498_s24 }
  0x28   : > { %s2507_s16 = sshll.u32 %s316_s15, 2 }
  0x29   : > { %s318_s30 = scalar_lea.vmem %s4175_s0, %s2507_s16 }
  0x2a   : > { %v353_v8 = vld [vmem:[%s318_s30] sm:$0xff] }
  0x2b   : > { %354 = vst [vmem:[%s2327_s11] sm:$0xff] %v353_v8 }
  0x2c   : > { %362 = vsyncadd %s258_s13, 128  ;;  %s2509_s6 = sshll.u32 %s4212_s29, 1 }
  0x2d   : > { %s364_s7 = sadd.s32 %s2509_s6, %s3498_s24 }
  0x2e   : > { %s2510_s8 = sshll.u32 %s364_s7, 2 }
  0x2f   : > { %s366_s4 = scalar_lea.vmem %s4175_s0, %s2510_s8 }
  0x30   : > { %v402_v9 = vld [vmem:[%s366_s4] sm:$0xff] }
  0x31   : > { %2512 = vst [vmem:[%s2327_s11 + $0x48] sm:$0xff] %v402_v9 }
  0x32   : > { %411 = vsyncadd %s258_s13, 128 }
  0x33 PF: > { %s412_s28 = sadd.s32 1, %s3386_s18 }
  0x34   : > { %p2514_p0 = scmp.ge.s32.totalorder %s412_s28, 2 }
  0x35   : > { %s417_s29 = ssub.s32 (!%p2514_p0), 1, %s4208_s27  ;;  %s2752_s24 = sadd.s32 (!%p2514_p0), 8, %s3469_s25 }
  0x36   : > { %416 = sbr.rel (%p2514_p0) target bundleno = 79 (0x4f), region = 142  ;;  %s2516_s14 = sadd.s32 (!%p2514_p0), 4294967295, %s2752_s24 }
  0x37   : > { %s422_s15 = sadd.s32 (!%p2514_p0), 8, %s2752_s24  ;;  %p420_p1 = scmp.gt.s32.totalorder (!%p2514_p0), %s2516_s14, 0 }
  0x38   : > { %p423_p2 = scmp.lt.s32.totalorder (!%p2514_p0), %s422_s15, 15  ;;  %s3521_s16 = sshll.u32 (!%p2514_p0), %s3390_s19, 5 }
  0x39   : > { %s2518_s4 = sshll.u32 (!%p2514_p0), %s3386_s18, 4  ;;  %s2521_s13 = smul.u32 (!%p2514_p0), 80, %s417_s29 }
  0x3a   : > { %s2348_s11 = sadd.s32 (!%p2514_p0), %s2518_s4, %s3521_s16  ;;  %s434_s19 = scalar_lea.sflag (!%p2514_p0), [#allocation3], %s417_s29 }
  0x3b   : > { %s2520_s17 = sshll.u32 (!%p2514_p0), %s2348_s11, 2  ;;  %s2354_s25 = scalar_lea.vmem (!%p2514_p0), [#allocation2], %s2521_s13 }
  0x3c   : > { %s2350_s6 = scalar_lea.vmem (!%p2514_p0), %s4175_s0, %s2520_s17 }
  0x3d   : > { %s4214_s14 = smov (!%p420_p1, %s2516_s14), 0  ;;  %s4216_s15 = smov (!%p423_p2, %s422_s15), 15  ;;  %v2522_v10 = vld [vmem:[%s2350_s6 + $0x40] sm:$0xff]  ;;  %v2524_v11 = vld [vmem:[%s2350_s6 + $0x48] sm:$0xff]  ;;  %v2526_v12 = vld [vmem:[%s2350_s6 + $0x50] sm:$0xff] }
  0x3e   : > { %2523 = vst [vmem:[%s2354_s25 + $0x8] sm:$0xff] %v2522_v10  ;;  %2525 = vst [vmem:[%s2354_s25 + $0x10] sm:$0xff] %v2524_v11  ;;  %v2528_v13 = vld [vmem:[%s2350_s6 + $0x58] sm:$0xff]  ;;  %v2530_v14 = vld [vmem:[%s2350_s6 + $0x60] sm:$0xff] }
  0x3f   : > { %2527 = vst [vmem:[%s2354_s25 + $0x18] sm:$0xff] %v2526_v12  ;;  %v2532_v15 = vld [vmem:[%s2350_s6 + $0x68] sm:$0xff]  ;;  %2529 = vst [vmem:[%s2354_s25 + $0x20] sm:$0xff] %v2528_v13  ;;  %v2534_v16 = vld [vmem:[%s2350_s6 + $0x70] sm:$0xff] }
  0x40   : > { %2531 = vst [vmem:[%s2354_s25 + $0x28] sm:$0xff] %v2530_v14  ;;  %2533 = vst [vmem:[%s2354_s25 + $0x30] sm:$0xff] %v2532_v15  ;;  %v2536_v17 = vld [vmem:[%s2350_s6 + $0x78] sm:$0xff] }
  0x41   : > { %2535 = vst [vmem:[%s2354_s25 + $0x38] sm:$0xff] %v2534_v16  ;;  %2537 = vst [vmem:[%s2354_s25 + $0x40] sm:$0xff] %v2536_v17 }
  0x42   : > { %490 = vsyncadd %s434_s19, 1024  ;;  %s2540_s7 = sshll.u32 %s4214_s14, 1 }
  0x43   : > { %s492_s8 = sadd.s32 %s2540_s7, %s3521_s16 }
  0x44   : > { %s2541_s9 = sshll.u32 %s492_s8, 2 }
  0x45   : > { %s494_s24 = scalar_lea.vmem %s4175_s0, %s2541_s9 }
  0x46   : > { %v529_v18 = vld [vmem:[%s494_s24] sm:$0xff] }
  0x47   : > { %530 = vst [vmem:[%s2354_s25] sm:$0xff] %v529_v18 }
  0x48   : > { %538 = vsyncadd %s434_s19, 128  ;;  %s2543_s4 = sshll.u32 %s4216_s15, 1 }
  0x49   : > { %s540_s11 = sadd.s32 %s2543_s4, %s3521_s16 }
  0x4a   : > { %s2544_s13 = sshll.u32 %s540_s11, 2 }
  0x4b   : > { %s542_s29 = scalar_lea.vmem %s4175_s0, %s2544_s13 }
  0x4c   : > { %v578_v19 = vld [vmem:[%s542_s29] sm:$0xff] }
  0x4d   : > { %2546 = vst [vmem:[%s2354_s25 + $0x48] sm:$0xff] %v578_v19 }
  0x4e   : > { %587 = vsyncadd %s434_s19, 128 }
  0x4f PF: > { %s588_s14 = scalar_lea.sflag [#allocation3], %s4208_s27 }
  0x50   : > { %3382 = dma.done.wait %s588_s14, 1280 }
  0x51   : > { %3383 = vsyncadd %s588_s14, 4294966016  ;;  %v3290_v20 = vld [vmem:[%s4178_s3 + $0x100] sm:$0xff]   ;;  %v3293_v23 = vld [vmem:[%s4178_s3 + $0x108] sm:$0xff]   ;;  %s2754_s17 = smul.u32 80, %s4208_s27  ;;  %vm835_vm0 = vcmask 1040384   ;;  %vm878_vm3 = vcmask 1046528  }
  0x52   : > { %v3291_v21 = vld [vmem:[%s4178_s3 + $0x140] sm:$0xff]   ;;  %2818 = vmatprep.subr.bf16.mxu0 %v3290_v20  ;;  %v3294_v24 = vld [vmem:[%s4178_s3 + $0x148] sm:$0xff]   ;;  %v3296_v26 = vld [vmem:[%s4178_s3 + $0x110] sm:$0xff]   ;;  %vm836_vm1 = vsmask.f32 256  ;;  %p711_p3 = scmp.eq.s32.totalorder %s3386_s18, 1 }
  0x53   : > { %v3292_v22 = vld [vmem:[%s4178_s3 + $0xc0] sm:$0xff]   ;;  %3058 = vmatprep.subr.bf16.mxu1 %v3291_v21  ;;  %v3295_v25 = vld [vmem:[%s4178_s3 + $0xc8] sm:$0xff]   ;;  %v3297_v27 = vld [vmem:[%s4178_s3 + $0x150] sm:$0xff]   ;;  %s3619_s28 = scalar_lea.vmem [#allocation2], %s2754_s17 }
  0x54   : > { %2819 = vmatpush3.bf16.msra.mxu0 %v3292_v22  ;;  %3059 = vmatpush3.bf16.msra.mxu1 %v3291_v21  ;;  %v3298_v28 = vld [vmem:[%s4178_s3 + $0xd0] sm:$0xff]   ;;  %v3299_v29 = vld [vmem:[%s4178_s3 + $0x118] sm:$0xff]   ;;  %v3302_v32 = vld [vmem:[%s4178_s3 + $0x120] sm:$0xff]   ;;  %s3655_s30 = scalar_select %p238_p9, 1, 0 }
  0x55   : > { %2820 = vmatprep.subr.bf16.mxu0 %v3293_v23  ;;  %3060 = vmatprep.subr.bf16.mxu1 %v3294_v24  ;;  %v3300_v30 = vld [vmem:[%s4178_s3 + $0x158] sm:$0xff]   ;;  %v3303_v33 = vld [vmem:[%s4178_s3 + $0x160] sm:$0xff]   ;;  %v3305_v35 = vld [vmem:[%s4178_s3 + $0x128] sm:$0xff]   ;;  %s712_s24 = scalar_select %p711_p3, 1, 0 }
  0x56   : > { %v3301_v31 = vld [vmem:[%s4178_s3 + $0xd8] sm:$0xff]   ;;  %v3304_v34 = vld [vmem:[%s4178_s3 + $0xe0] sm:$0xff]   ;;  %v3306_v36 = vld [vmem:[%s4178_s3 + $0x168] sm:$0xff]  }
  0x57   : > { %v3307_v37 = vld [vmem:[%s4178_s3 + $0xe8] sm:$0xff]   ;;  %v3308_v38 = vld [vmem:[%s4178_s3 + $0x130] sm:$0xff]   ;;  %v3311_v41 = vld [vmem:[%s4178_s3 + $0x138] sm:$0xff]  }
  0x58   : > { %2821 = vmatpush3.bf16.msra.mxu0 %v3295_v25  ;;  %3061 = vmatpush3.bf16.msra.mxu1 %v3294_v24  ;;  %v3309_v39 = vld [vmem:[%s4178_s3 + $0x170] sm:$0xff]   ;;  %v3312_v42 = vld [vmem:[%s4178_s3 + $0x178] sm:$0xff]   ;;  %v3617_v43 = vld [vmem:[%s4176_s1] ss:$0 sm:$0xff] }
  0x59   : > { %2822 = vmatprep.subr.bf16.mxu0 %v3296_v26  ;;  %3062 = vmatprep.subr.bf16.mxu1 %v3297_v27  ;;  %v3310_v40 = vld [vmem:[%s4178_s3 + $0xf0] sm:$0xff]   ;;  %v607_v44 = vld [vmem:[%s3619_s28 + $0x8] sm:$0xff]  ;;  %v3626_v48 = vld [vmem:[%s4177_s2] ss:$0 sm:$0xff] }
  0x5a   : > { %v618_v45 = vunpack.c.l.bf16 %v607_v44  ;;  %v619_v46 = vunpack.c.h.bf16 %v607_v44  ;;  %v608_v47 = vld [vmem:[%s3619_s28 + $0x10] sm:$0xff]  ;;  %v3313_v51 = vld [vmem:[%s4178_s3 + $0xf8] sm:$0xff]   ;;  %v610_v1 = vld [vmem:[%s3619_s28 + $0x20] sm:$0xff] }
  0x5b   : > { %v620_v49 = vunpack.c.l.bf16 %v608_v47  ;;  %v621_v50 = vunpack.c.h.bf16 %v608_v47  ;;  %v3314_v56 = vld [vmem:[%s4178_s3 + $0x40] sm:$0xff]   ;;  %v609_v0 = vld [vmem:[%s3619_s28 + $0x18] sm:$0xff]  ;;  %v624_v7 = vunpack.c.l.bf16 %v610_v1  ;;  %v625_v8 = vunpack.c.h.bf16 %v610_v1  ;;  %vm3663_vm2 = vmand %vm835_vm0, %vm836_vm1 }
  0x5c   : > { %2823 = vmatpush3.bf16.msra.mxu0 %v3298_v28  ;;  %3063 = vmatpush3.bf16.msra.mxu1 %v3297_v27  ;;  %v644_v52 = vmul.f32 %v3617_v43, %v618_v45  ;;  %v645_v53 = vmul.f32 %v3617_v43, %v619_v46  ;;  %v3315_v59 = vld [vmem:[%s4178_s3 + $0x1c0] sm:$0xff]   ;;  %v622_v4 = vunpack.c.l.bf16 %v609_v0  ;;  %v623_v5 = vunpack.c.h.bf16 %v609_v0  ;;  %v3357_v16 = vld [vmem:[%s4178_s3 + $0xb8] sm:$0xff]  }
  0x5d   : > { %2824 = vmatprep.subr.bf16.mxu0 %v3299_v29  ;;  %3064 = vmatprep.subr.bf16.mxu1 %v3300_v30  ;;  %v646_v54 = vmul.f32 %v3617_v43, %v620_v49  ;;  %v647_v55 = vmul.f32 %v3617_v43, %v621_v50  ;;  %v650_v14 = vmul.f32 %v3617_v43, %v624_v7  ;;  %v3317_v25 = vld [vmem:[%s4178_s3 + $0x180] sm:$0xff]   ;;  %v709_v28 = vstv %s3655_s30  ;;  %v3318_v49 = vld [vmem:[%s4178_s3 + $0x48] sm:$0xff]  }
  0x5e   : > { %v670_v57 = vadd.f32 %v3626_v48, %v644_v52  ;;  %v671_v58 = vadd.f32 %v3626_v48, %v645_v53  ;;  %v648_v10 = vmul.f32 %v3617_v43, %v622_v4  ;;  %v649_v11 = vmul.f32 %v3617_v43, %v623_v5  ;;  %v3316_v47 = vld [vmem:[%s4178_s3] sm:$0xff]  }
  0x5f   : > { %v672_v60 = vadd.f32 %v3626_v48, %v646_v54  ;;  %v673_v61 = vadd.f32 %v3626_v48, %v647_v55  ;;  %v651_v15 = vmul.f32 %v3617_v43, %v625_v8  ;;  %v676_v22 = vadd.f32 %v3626_v48, %v650_v14  ;;  %v3323_v55 = vld [vmem:[%s4178_s3 + $0x188] sm:$0xff]  }
  0x60   : > { %2825 = vmatpush3.bf16.msra.mxu0 %v3301_v31  ;;  %3065 = vmatpush3.bf16.msra.mxu1 %v3300_v30  ;;  %v690_v62 = vmax.f32 %v670_v57, 0.0  ;;  %v691_v63 = vmax.f32 %v671_v58, 0.0  ;;  %v674_v19 = vadd.f32 %v3626_v48, %v648_v10  ;;  %v675_v20 = vadd.f32 %v3626_v48, %v649_v11  ;;  %v613_v14 = vld [vmem:[%s3619_s28 + $0x38] sm:$0xff] }
  0x61   : > { %2826 = vmatprep.subr.bf16.mxu0 %v3302_v32  ;;  %3066 = vmatprep.subr.bf16.mxu1 %v3303_v33  ;;  %v692_v2 = vmax.f32 %v672_v60, 0.0  ;;  %v693_v3 = vmax.f32 %v673_v61, 0.0  ;;  %v677_v23 = vadd.f32 %v3626_v48, %v651_v15  ;;  %v696_v31 = vmax.f32 %v676_v22, 0.0  ;;  %v3327_v61 = vld [vmem:[%s4178_s3 + $0x1d0] sm:$0xff]  }
  0x62   : > { %v3647_v6 = vpack.c.bf16 %v691_v63, %v690_v62  ;;  %v694_v26 = vmax.f32 %v674_v19, 0.0  ;;  %v695_v27 = vmax.f32 %v675_v20, 0.0  ;;  %v614_v20 = vld [vmem:[%s3619_s28 + $0x40] sm:$0xff]  ;;  %vm3803_vm4 = vcmp.eq.s32.totalorder %v709_v28, 1 }
  0x63   : > { %v3649_v9 = vpack.c.bf16 %v693_v3, %v692_v2  ;;  %v697_v32 = vmax.f32 %v677_v23, 0.0  ;;  %v3319_v2 = vld [vmem:[%s4178_s3 + $0x8] sm:$0xff]   ;;  %v3322_v23 = vld [vmem:[%s4178_s3 + $0x10] sm:$0xff]   ;;  %v3328_v28 = vld [vmem:[%s4178_s3 + $0x20] sm:$0xff]  }
  0x64   : > { %2827 = vmatpush3.bf16.msra.mxu0 %v3304_v34  ;;  %3067 = vmatpush3.bf16.msra.mxu1 %v3303_v33  ;;  %v753_v12 = vshrl.u32 %v3647_v6, 16  ;;  %v756_v13 = vshll.u32 %v3647_v6, 16  ;;  %v3321_v33 = vld [vmem:[%s4178_s3 + $0x1c8] sm:$0xff]   ;;  %vm2647_vm5 = vmneg %vm3803_vm4 }
  0x65   : > { %2828 = vmatprep.subr.bf16.mxu0 %v3305_v35  ;;  %3068 = vmatprep.subr.bf16.mxu1 %v3306_v36  ;;  %v760_v17 = vshrl.u32 %v3649_v9, 16  ;;  %v763_v18 = vshll.u32 %v3649_v9, 16  ;;  %v611_v34 = vld [vmem:[%s3619_s28 + $0x28] sm:$0xff]  ;;  %v612_v35 = vld [vmem:[%s3619_s28 + $0x30] sm:$0xff]  ;;  %vm3914_vm6 = vmpackc.low %vm2647_vm5, %vm2647_vm5 }
  0x66   : > { %1192 = vmatprep.mubr.bf16.mxu0 %v3647_v6  ;;  %v755_v21 = vrot.slane %v753_v12, 7  ;;  %v626_v44 = vunpack.c.l.bf16 %v611_v34  ;;  %v628_v60 = vunpack.c.l.bf16 %v612_v35  ;;  %v629_v1 = vunpack.c.h.bf16 %v612_v35  ;;  %v3320_v12 = vld [vmem:[%s4178_s3 + $0x50] sm:$0xff]  }
  0x67   : > { %v762_v24 = vrot.slane %v760_v17, 7 }
  0x68   : > { %2829 = vmatpush3.bf16.msra.mxu0 %v3307_v37  ;;  %3069 = vmatpush3.bf16.msra.mxu1 %v3306_v36  ;;  %v758_v29 = vor.u32 %v756_v13, %v755_v21  ;;  %v849_v30 = vsel %vm3663_vm2, %v755_v21, 0  ;;  %v654_v7 = vmul.f32 %v3617_v43, %v628_v60  ;;  %v655_v19 = vmul.f32 %v3617_v43, %v629_v1  ;;  %v3347_v1 = vld [vmem:[%s4178_s3 + $0x1b8] sm:$0xff]  }
  0x69   : > { %2830 = vmatprep.subr.bf16.mxu0 %v3308_v38  ;;  %3070 = vmatprep.subr.bf16.mxu1 %v3309_v39  ;;  %v883_v36 = vrot.slane %v849_v30, 1  ;;  %v765_v37 = vor.u32 %v763_v18, %v762_v24  ;;  %v850_v38 = vsel %vm3663_vm2, %v762_v24, 0  ;;  %v630_v30 = vunpack.c.l.bf16 %v613_v14 }
  0x6b   : > { %v3698_v46 = vsel %vm3663_vm2, 0, %v765_v37  ;;  %v632_v37 = vunpack.c.l.bf16 %v614_v20 }
  0x6c   : > { %2831 = vmatpush3.bf16.msra.mxu0 %v3310_v40  ;;  %3071 = vmatpush3.bf16.msra.mxu1 %v3309_v39  ;;  %v3686_v39 = vpack.c.bf16 %v695_v27, %v694_v26  ;;  %v3690_v40 = vsel %vm3663_vm2, 0, %v758_v29  ;;  %v885_v52 = vrot.slane %v3698_v46, 1  ;;  %v3329_v26 = vld [vmem:[%s4178_s3 + $0x190] sm:$0xff]   ;;  %v681_v29 = vadd.f32 %v3626_v48, %v655_v19 }
  0x6d   : > { %2832 = vmatprep.subr.bf16.mxu0 %v3311_v41  ;;  %3072 = vmatprep.subr.bf16.mxu1 %v3312_v42  ;;  %v886_v41 = vrot.slane %v850_v38, 1  ;;  %v882_v45 = vrot.slane %v3690_v40, 1 }
  0x6e   : > { %v767_v50 = vshrl.u32 %v3686_v39, 16 }
  0x6f   : > { %v3716_v57 = vsel %vm878_vm3, %v882_v45, %v883_v36  ;;  %v3724_v62 = vsel %vm878_vm3, %v885_v52, %v886_v41  ;;  %v701_v41 = vmax.f32 %v681_v29, 0.0  ;;  %v633_v52 = vunpack.c.h.bf16 %v614_v20  ;;  %v3330_v29 = vld [vmem:[%s4178_s3 + $0x68] sm:$0xff]  }
  0x70   : > { %2833 = vmatpush3.bf16.msra.mxu0 %v3313_v51  ;;  %3073 = vmatpush3.bf16.msra.mxu1 %v3312_v42  ;;  %v3692_v42 = vpack.c.bf16 %v697_v32, %v696_v31  ;;  %v770_v51 = vshll.u32 %v3686_v39, 16  ;;  %v769_v58 = vrot.slane %v767_v50, 7  ;;  %v631_v31 = vunpack.c.h.bf16 %v613_v14  ;;  %v3333_v32 = vld [vmem:[%s4178_s3 + $0x1d8] sm:$0xff]   ;;  %v3340_v14 = vld [vmem:[%s4178_s3 + $0x1e8] sm:$0xff]  }
  0x71   : > { %2898 = vmatprep.subr.bf16.mxu1 %v3314_v56  ;;  %2978 = vmatprep.subr.bf16.mxu0 %v3315_v59  ;;  %v627_v56 = vunpack.c.h.bf16 %v611_v34  ;;  %v652_v59 = vmul.f32 %v3617_v43, %v626_v44  ;;  %v3324_v34 = vld [vmem:[%s4178_s3 + $0x58] sm:$0xff]   ;;  %v656_v44 = vmul.f32 %v3617_v43, %v630_v30 }
  0x72   : > { %v774_v53 = vshrl.u32 %v3692_v42, 16  ;;  %v777_v54 = vshll.u32 %v3692_v42, 16  ;;  %3074 = vmatprep.mubr.bf16.mxu1 %v3716_v57  ;;  %v772_v3 = vor.u32 %v770_v51, %v769_v58  ;;  %v851_v4 = vsel %vm3663_vm2, %v769_v58, 0 }
  0x73   : > { %1193 = vmatmul.mubr.bf16.vlgmr.msra.gmra.mrb[0].mxu0 %v3690_v40  ;;  %v653_v0 = vmul.f32 %v3617_v43, %v627_v56  ;;  %3075 = vmatmul.mubr.bf16.vlgmr.msra.gmra.mrb[0].mxu1 %v3724_v62  ;;  %v678_v5 = vadd.f32 %v3626_v48, %v652_v59  ;;  %v889_v8 = vrot.slane %v851_v4, 1  ;;  %v657_v45 = vmul.f32 %v3617_v43, %v631_v31  ;;  %v606_v59 = vld [vmem:[%s3619_s28] sm:$0xff] }
  0x74   : > { %2979 = vmatpush3.bf16.msra.mxu0 %v3317_v25  ;;  %1200 = vmatprep.mubr.bf16.mxu0 %v3649_v9  ;;  %v776_v63 = vrot.slane %v774_v53, 7  ;;  %v3744_v15 = vsel %vm3663_vm2, 0, %v772_v3  ;;  %v680_v25 = vadd.f32 %v3626_v48, %v654_v7  ;;  %v658_v53 = vmul.f32 %v3617_v43, %v632_v37 }
  0x75   : > { %2980 = vmatprep.subr.bf16.mxu0 %v3321_v33  ;;  %2899 = vmatpush3.bf16.msra.mxu1 %v3316_v47  ;;  %v679_v13 = vadd.f32 %v3626_v48, %v653_v0  ;;  %v698_v18 = vmax.f32 %v678_v5, 0.0  ;;  %v888_v21 = vrot.slane %v3744_v15, 1  ;;  %v3335_v47 = vld [vmem:[%s4178_s3 + $0x198] sm:$0xff]   ;;  %v682_v56 = vadd.f32 %v3626_v48, %v656_v44 }
  0x76   : > { %v779_v10 = vor.u32 %v777_v54, %v776_v63  ;;  %v852_v11 = vsel %vm3663_vm2, %v776_v63, 0  ;;  %2900 = vmatprep.subr.bf16.mxu1 %v3318_v49  ;;  %v700_v36 = vmax.f32 %v680_v25, 0.0  ;;  %v3325_v49 = vld [vmem:[%s4178_s3 + $0x18] sm:$0xff]   ;;  %v683_v58 = vadd.f32 %v3626_v48, %v657_v45 }
  0x77   : > { %v892_v17 = vrot.slane %v852_v11, 1  ;;  %v699_v24 = vmax.f32 %v679_v13, 0.0  ;;  %v3767_v33 = vsel %vm878_vm3, %v888_v21, %v889_v8  ;;  %v684_v63 = vadd.f32 %v3626_v48, %v658_v53  ;;  %v3339_v13 = vld [vmem:[%s4178_s3 + $0x1a0] sm:$0xff]  }
  0x78   : > { %2981 = vmatpush3.bf16.msra.mxu0 %v3323_v55  ;;  %v3751_v22 = vsel %vm3663_vm2, 0, %v779_v10  ;;  %3078 = vmatprep.mubr.bf16.mxu1 %v3767_v33  ;;  %v3791_v54 = vpack.c.bf16 %v701_v41, %v700_v36  ;;  %v3326_v55 = vld [vmem:[%s4178_s3 + $0x60] sm:$0xff]   ;;  %v616_v0 = vunpack.c.l.bf16 %v606_v59  ;;  %v702_v5 = vmax.f32 %v682_v56, 0.0  ;;  %v3341_v41 = vld [vmem:[%s4178_s3 + $0x1a8] sm:$0xff]   ;;  %v3343_v56 = vld [vmem:[%s4178_s3 + $0x1f0] sm:$0xff]  }
  0x79   : > { %2982 = vmatprep.subr.bf16.mxu0 %v3327_v61  ;;  %v891_v27 = vrot.slane %v3751_v22, 1  ;;  %2901 = vmatpush3.bf16.msra.mxu1 %v3319_v2  ;;  %v3773_v35 = vpack.c.bf16 %v699_v24, %v698_v18  ;;  %v659_v61 = vmul.f32 %v3617_v43, %v633_v52  ;;  %v3338_v2 = vld [vmem:[%s4178_s3 + $0x1e0] sm:$0xff]   ;;  %v703_v7 = vmax.f32 %v683_v58, 0.0 }
  0x7a   : > { %2902 = vmatprep.subr.bf16.mxu1 %v3320_v12  ;;  %v788_v3 = vshrl.u32 %v3791_v54, 16  ;;  %v791_v4 = vshll.u32 %v3791_v54, 16  ;;  %v704_v12 = vmax.f32 %v684_v63, 0.0  ;;  %v617_v20 = vunpack.c.h.bf16 %v606_v59 }
  0x7b   : > { %1201 = vmatmul.mubr.bf16.gmra.mrb[4].mxu0 %v3698_v46  ;;  %v3777_v38 = vsel %vm878_vm3, %v891_v27, %v892_v17  ;;  %v781_v50 = vshrl.u32 %v3773_v35, 16  ;;  %v784_v51 = vshll.u32 %v3773_v35, 16  ;;  %v685_v11 = vadd.f32 %v3626_v48, %v659_v61 }
  0x7c   : > { %1208 = vmatprep.mubr.bf16.mxu0 %v3686_v39  ;;  %2983 = vmatpush3.bf16.msra.mxu0 %v3329_v26  ;;  %v790_v18 = vrot.slane %v788_v3, 7  ;;  %v3825_v19 = vpack.c.bf16 %v703_v7, %v702_v5  ;;  %v642_v24 = vmul.f32 %v3617_v43, %v616_v0  ;;  %v643_v37 = vmul.f32 %v3617_v43, %v617_v20 }
  0x7d   : > { %3079 = vmatmul.mubr.bf16.gmra.mrb[4].mxu1 %v3777_v38  ;;  %2984 = vmatprep.subr.bf16.mxu0 %v3333_v32  ;;  %v783_v60 = vrot.slane %v781_v50, 7  ;;  %v3331_v32 = vld [vmem:[%s4178_s3 + $0x28] sm:$0xff]  }
  0x7e   : > { %2903 = vmatpush3.bf16.msra.mxu1 %v3322_v23  ;;  %v705_v23 = vmax.f32 %v685_v11, 0.0  ;;  %v793_v26 = vor.u32 %v791_v4, %v790_v18  ;;  %v854_v27 = vsel %vm3663_vm2, %v790_v18, 0  ;;  %v795_v30 = vshrl.u32 %v3825_v19, 16  ;;  %v3344_v4 = vld [vmem:[%s4178_s3 + $0x1b0] sm:$0xff]  }
  0x7f   : > { %2904 = vmatprep.subr.bf16.mxu1 %v3324_v34  ;;  %v786_v8 = vor.u32 %v784_v51, %v783_v60  ;;  %v853_v10 = vsel %vm3663_vm2, %v783_v60, 0  ;;  %v898_v31 = vrot.slane %v854_v27, 1  ;;  %v798_v34 = vshll.u32 %v3825_v19, 16  ;;  %v3337_v27 = vld [vmem:[%s4178_s3 + $0x38] sm:$0xff]  }
  0x80   : > { %2985 = vmatpush3.bf16.msra.mxu0 %v3335_v47  ;;  %v895_v17 = vrot.slane %v853_v10, 1  ;;  %v3844_v36 = vpack.c.bf16 %v705_v23, %v704_v12  ;;  %v3855_v45 = vsel %vm3663_vm2, 0, %v793_v26  ;;  %v797_v47 = vrot.slane %v795_v30, 7  ;;  %v3346_v12 = vld [vmem:[%s4178_s3 + $0x1f8] sm:$0xff]  }
  0x81   : > { %2986 = vmatprep.subr.bf16.mxu0 %v3338_v2  ;;  %v3829_v21 = vsel %vm3663_vm2, 0, %v786_v8  ;;  %v668_v50 = vadd.f32 %v3626_v48, %v642_v24  ;;  %v897_v51 = vrot.slane %v3855_v45, 1  ;;  %v3334_v2 = vld [vmem:[%s4178_s3 + $0x30] sm:$0xff]  }
  0x82   : > { %2905 = vmatpush3.bf16.msra.mxu1 %v3325_v49  ;;  %v894_v25 = vrot.slane %v3829_v21, 1  ;;  %v3332_v49 = vld [vmem:[%s4178_s3 + $0x70] sm:$0xff]   ;;  %v802_v52 = vshrl.u32 %v3844_v36, 16  ;;  %v805_v53 = vshll.u32 %v3844_v36, 16  ;;  %v800_v58 = vor.u32 %v798_v34, %v797_v47  ;;  %v3930_v34 = vld [vmem:[%s4178_s3 + $0x200] sm:$0xff]  }
  0x83   : > { %1209 = vmatmul.mubr.bf16.gmra.mrb[8].mxu0 %v3744_v15  ;;  %2906 = vmatprep.subr.bf16.mxu1 %v3326_v55  ;;  %v669_v55 = vadd.f32 %v3626_v48, %v643_v37  ;;  %v855_v59 = vsel %vm3663_vm2, %v797_v47, 0  ;;  %v688_v60 = vmax.f32 %v668_v50, 0.0  ;;  %v3872_v61 = vsel %vm878_vm3, %v897_v51, %v898_v31  ;;  %v3355_v24 = vld [vmem:[%s4178_s3 + $0xb0] sm:$0xff]  }
  0x84   : > { %1216 = vmatprep.mubr.bf16.mxu0 %v3692_v42  ;;  %2987 = vmatpush3.bf16.msra.mxu0 %v3339_v13  ;;  %v3851_v44 = vsel %vm878_vm3, %v894_v25, %v895_v17  ;;  %v901_v63 = vrot.slane %v855_v59, 1  ;;  %v804_v0 = vrot.slane %v802_v52, 7  ;;  %v3883_v5 = vsel %vm3663_vm2, 0, %v800_v58  ;;  %v3345_v52 = vld [vmem:[%s4178_s3 + $0x88] sm:$0xff]   ;;  %v3348_v58 = vld [vmem:[%s4178_s3 + $0x90] sm:$0xff]  }
  0x85   : > { %2988 = vmatprep.subr.bf16.mxu0 %v3340_v14  ;;  %3082 = vmatprep.mubr.bf16.mxu1 %v3851_v44  ;;  %v689_v3 = vmax.f32 %v669_v55, 0.0  ;;  %v715_v7 = vsel %vm3803_vm4, 0.0, %v688_v60  ;;  %v900_v8 = vrot.slane %v3883_v5, 1  ;;  %v3336_v14 = vld [vmem:[%s4178_s3 + $0x78] sm:$0xff]  }
  0x86   : > { %2907 = vmatpush3.bf16.msra.mxu1 %v3328_v28  ;;  %v807_v10 = vor.u32 %v805_v53, %v804_v0  ;;  %v856_v28 = vsel %vm3663_vm2, %v804_v0, 0  ;;  %v615_v53 = vld [vmem:[%s3619_s28 + $0x48] sm:$0xff] }
  0x87   : > { %2908 = vmatprep.subr.bf16.mxu1 %v3330_v29  ;;  %3083 = vmatmul.mubr.bf16.gmra.mrb[8].mxu1 %v3872_v61  ;;  %v716_v11 = vsel %vm3803_vm4, 0.0, %v689_v3  ;;  %v904_v13 = vrot.slane %v856_v28, 1  ;;  %v3903_v18 = vsel %vm878_vm3, %v900_v8, %v901_v63  ;;  %v2650_v29 = vpack.c.bf16 %v689_v3, %v688_v60  ;;  %v3350_v3 = vld [vmem:[%s4178_s3 + $0x98] sm:$0xff]  }
  0x88   : > { %2989 = vmatpush3.bf16.msra.mxu0 %v3341_v41  ;;  %v735_v17 = vpack.c.bf16 %v716_v11, %v715_v7  ;;  %v3907_v20 = vsel %vm3663_vm2, 0, %v807_v10  ;;  %3086 = vmatprep.mubr.bf16.mxu1 %v3903_v18  ;;  %v634_v55 = vunpack.c.l.bf16 %v615_v53  ;;  %v713_v63 = vstv %s712_s24 }
  0x89   : > { %2990 = vmatprep.subr.bf16.mxu0 %v3343_v56  ;;  %v903_v23 = vrot.slane %v3907_v20, 1  ;;  %v635_v56 = vunpack.c.h.bf16 %v615_v53  ;;  %vm3960_vm7 = vcmp.eq.s32.totalorder %v713_v63, 1 }
  0x8a   : > { %2909 = vmatpush3.bf16.msra.mxu1 %v3331_v32  ;;  %v746_v25 = vshrl.u32 %v735_v17, 16  ;;  %v749_v26 = vshll.u32 %v735_v17, 16  ;;  %v3342_v32 = vld [vmem:[%s4178_s3 + $0x80] sm:$0xff]   ;;  %v660_v59 = vmul.f32 %v3617_v43, %v634_v55  ;;  %vm2724_vm8 = vmneg %vm3960_vm7 }
  0x8b   : > { %1217 = vmatmul.mubr.bf16.gmra.mrb[12].mxu0 %v3751_v22  ;;  %2910 = vmatprep.subr.bf16.mxu1 %v3332_v49  ;;  %v3922_v30 = vsel %vm878_vm3, %v903_v23, %v904_v13  ;;  %v661_v60 = vmul.f32 %v3617_v43, %v635_v56  ;;  %v3354_v13 = vld [vmem:[%s4178_s3 + $0xa8] sm:$0xff]   ;;  %vm2726_vm9 = vmpackc.low %vm2724_vm8, %vm2724_vm8 }
  0x8c   : > { %1224 = vmatprep.mubr.bf16.mxu0 %v3773_v35  ;;  %2991 = vmatpush3.bf16.msra.mxu0 %v3344_v4  ;;  %v748_v31 = vrot.slane %v746_v25, 7  ;;  %v686_v0 = vadd.f32 %v3626_v48, %v660_v59 }
  0x8d   : > { %2992 = vmatprep.subr.bf16.mxu0 %v3346_v12 }
  0x8e   : > { %2911 = vmatpush3.bf16.msra.mxu1 %v3334_v2  ;;  %v751_v37 = vor.u32 %v749_v26, %v748_v31  ;;  %v848_v41 = vsel %vm3663_vm2, %v748_v31, 0  ;;  %v687_v2 = vadd.f32 %v3626_v48, %v661_v60  ;;  %v706_v4 = vmax.f32 %v686_v0, 0.0 }
  0x8f   : > { %2912 = vmatprep.subr.bf16.mxu1 %v3336_v14  ;;  %3087 = vmatmul.mubr.bf16.gmra.mrb[12].mxu1 %v3922_v30  ;;  %v880_v47 = vrot.slane %v848_v41, 1 }
  0x90   : > { %2993 = vmatpush3.bf16.msra.mxu0 %v3347_v1  ;;  %2651 = vmatprep.mubr.msk.bf16.mxu1 %vm3914_vm6, %v2650_v29  ;;  %v838_v49 = vsel %vm3663_vm2, 0, %v751_v37  ;;  %v707_v7 = vmax.f32 %v687_v2, 0.0  ;;  %v733_v43 = vsel %vm3960_vm7, 0.0, %v706_v4  ;;  %v3359_v29 = vld [vmem:[%s4178_s3 + $0x228] sm:$0xff]  }
  0x91   : > { %3122 = vmatprep.subr.bf16.mxu0 %v3930_v34  ;;  %v879_v50 = vrot.slane %v838_v49, 1 }
  0x92   : > { %2913 = vmatpush3.bf16.msra.mxu1 %v3337_v27  ;;  %v734_v48 = vsel %vm3960_vm7, 0.0, %v707_v7  ;;  %v3975_v8 = vpack.c.bf16 %v707_v7, %v706_v4  ;;  %v3353_v27 = vld [vmem:[%s4178_s3 + $0x210] sm:$0xff]  }
  0x93   : > { %1225 = vmatmul.mubr.bf16.gmra.mrb[16].mxu0 %v3829_v21  ;;  %3090 = vmatprep.subr.bf16.mxu1 %v3342_v32  ;;  %v3944_v51 = vsel %vm878_vm3, %v879_v50, %v880_v47  ;;  %v744_v10 = vpack.c.bf16 %v734_v48, %v733_v43 }
  0x94   : > { %1232 = vmatprep.mubr.bf16.mxu0 %v3791_v54 }
  0x95   : > { %v809_v28 = vshrl.u32 %v744_v10, 16  ;;  %v812_v11 = vshll.u32 %v744_v10, 16 }
  0x97   : > { %1531 = vmatmul.mubr.bf16.vlgmr.msra.gmra.mrb[16].mxu1 %v838_v49  ;;  %v811_v12 = vrot.slane %v809_v28, 7 }
  0x98   : > { %1538 = vmatprep.mubr.bf16.mxu1 %v3647_v6  ;;  %3091 = vmatpush3.bf16.msra.mxu1 %v3342_v32 }
  0x99   : > { %3092 = vmatprep.subr.bf16.mxu1 %v3345_v52  ;;  %v814_v14 = vor.u32 %v812_v11, %v811_v12  ;;  %v857_v17 = vsel %vm3663_vm2, %v811_v12, 0 }
  0x9a   : > { %v907_v1 = vrot.slane %v857_v17, 1 }
  0x9b   : > { %1233 = vmatmul.mubr.bf16.gmra.mrb[20].mxu0 %v3855_v45  ;;  %v3991_v23 = vsel %vm3663_vm2, 0, %v814_v14 }
  0x9c   : > { %1240 = vmatprep.mubr.bf16.mxu0 %v3825_v19  ;;  %3093 = vmatpush3.bf16.msra.mxu1 %v3345_v52  ;;  %v906_v25 = vrot.slane %v3991_v23, 1 }
  0x9d   : > { %3094 = vmatprep.subr.bf16.mxu1 %v3348_v58 }
  0x9e   : > { %v3998_v26 = vsel %vm878_vm3, %v906_v25, %v907_v1 }
  0x9f   : > { %1539 = vmatmul.mubr.bf16.gmra.mrb[20].mxu1 %v3690_v40  ;;  %v3352_v40 = vld [vmem:[%s4178_s3 + $0xa0] sm:$0xff]  }
  0xa0   : > { %1546 = vmatprep.mubr.bf16.mxu1 %v3649_v9  ;;  %3095 = vmatpush3.bf16.msra.mxu1 %v3348_v58 }
  0xa1   : > { %3096 = vmatprep.subr.bf16.mxu1 %v3350_v3 }
  0xa3   : > { %1241 = vmatmul.mubr.bf16.gmra.mrb[24].mxu0 %v3883_v5 }
  0xa4   : > { %1248 = vmatprep.mubr.bf16.mxu0 %v3844_v36  ;;  %3097 = vmatpush3.bf16.msra.mxu1 %v3350_v3 }
  0xa5   : > { %3098 = vmatprep.subr.bf16.mxu1 %v3352_v40 }
  0xa7   : > { %1547 = vmatmul.mubr.bf16.gmra.mrb[24].mxu1 %v3698_v46 }
  0xa8   : > { %1554 = vmatprep.mubr.bf16.mxu1 %v3686_v39  ;;  %3099 = vmatpush3.bf16.msra.mxu1 %v3352_v40 }
  0xa9   : > { %3100 = vmatprep.subr.bf16.mxu1 %v3354_v13 }
  0xab   : > { %1249 = vmatmul.mubr.bf16.gmra.mrb[28].mxu0 %v3907_v20 }
  0xac   : > { %1917 = vmatprep.mubr.bf16.mxu0 %v3649_v9  ;;  %v3351_v9 = vld [vmem:[%s4178_s3 + $0x208] sm:$0xff]   ;;  %3101 = vmatpush3.bf16.msra.mxu1 %v3354_v13 }
  0xad   : > { %3102 = vmatprep.subr.bf16.mxu1 %v3355_v24 }
  0xaf   : > { %1555 = vmatmul.mubr.bf16.gmra.mrb[28].mxu1 %v3744_v15 }
  0xb0   : > { %1562 = vmatprep.mubr.bf16.mxu1 %v3692_v42  ;;  %3103 = vmatpush3.bf16.msra.mxu1 %v3355_v24 }
  0xb1   : > { %3104 = vmatprep.subr.bf16.mxu1 %v3357_v16 }
  0xb3   : > { %1918 = vmatmul.mubr.bf16.vlgmr.msra.gmra.mrb[32].mxu0 %v3698_v46  ;;  %v3356_v46 = vld [vmem:[%s4178_s3 + $0x218] sm:$0xff]  }
  0xb4   : > { %3123 = vmatpush3.bf16.msra.mxu0 %v3930_v34  ;;  %1925 = vmatprep.mubr.bf16.mxu0 %v3686_v39  ;;  %v3358_v39 = vld [vmem:[%s4178_s3 + $0x220] sm:$0xff]  }
  0xb5   : > { %3124 = vmatprep.subr.bf16.mxu0 %v3351_v9  ;;  %3105 = vmatpush3.bf16.msra.mxu1 %v3357_v16 }
  0xb6   : > { %3154 = vmatprep.subr.bf16.mxu1 %v3930_v34 }
  0xb7   : > { %1563 = vmatmul.mubr.bf16.gmra.mrb[32].mxu1 %v3751_v22 }
  0xb8   : > { %3125 = vmatpush3.bf16.msra.mxu0 %v3351_v9  ;;  %1570 = vmatprep.mubr.bf16.mxu1 %v3773_v35 }
  0xb9   : > { %3126 = vmatprep.subr.bf16.mxu0 %v3353_v27 }
  0xbb   : > { %1926 = vmatmul.mubr.bf16.gmra.mrb[36].mxu0 %v3744_v15  ;;  %v3361_v15 = vld [vmem:[%s4178_s3 + $0x238] sm:$0xff]  }
  0xbc   : > { %1933 = vmatprep.mubr.bf16.mxu0 %v3692_v42  ;;  %3127 = vmatpush3.bf16.msra.mxu0 %v3353_v27  ;;  %v3360_v42 = vld [vmem:[%s4178_s3 + $0x230] sm:$0xff]  }
  0xbd   : > { %3128 = vmatprep.subr.bf16.mxu0 %v3356_v46 }
  0xbf   : > { %1571 = vmatmul.mubr.bf16.gmra.mrb[36].mxu1 %v3829_v21 }
  0xc0   : > { %3129 = vmatpush3.bf16.msra.mxu0 %v3356_v46  ;;  %1578 = vmatprep.mubr.bf16.mxu1 %v3791_v54 }
  0xc1   : > { %3130 = vmatprep.subr.bf16.mxu0 %v3358_v39 }
  0xc3   : > { %1934 = vmatmul.mubr.bf16.gmra.mrb[40].mxu0 %v3751_v22 }
  0xc4   : > { %1941 = vmatprep.mubr.bf16.mxu0 %v3773_v35  ;;  %3131 = vmatpush3.bf16.msra.mxu0 %v3358_v39 }
  0xc5   : > { %3132 = vmatprep.subr.bf16.mxu0 %v3359_v29 }
  0xc7   : > { %1579 = vmatmul.mubr.bf16.gmra.mrb[40].mxu1 %v3855_v45 }
  0xc8   : > { %3133 = vmatpush3.bf16.msra.mxu0 %v3359_v29  ;;  %1586 = vmatprep.mubr.bf16.mxu1 %v3825_v19 }
  0xc9   : > { %3134 = vmatprep.subr.bf16.mxu0 %v3360_v42 }
  0xcb   : > { %1942 = vmatmul.mubr.bf16.gmra.mrb[44].mxu0 %v3829_v21 }
  0xcc   : > { %1949 = vmatprep.mubr.bf16.mxu0 %v3791_v54  ;;  %3135 = vmatpush3.bf16.msra.mxu0 %v3360_v42 }
  0xcd   : > { %3136 = vmatprep.subr.bf16.mxu0 %v3361_v15 }
  0xcf   : > { %1587 = vmatmul.mubr.bf16.gmra.mrb[44].mxu1 %v3883_v5 }
  0xd0   : > { %3137 = vmatpush3.bf16.msra.mxu0 %v3361_v15  ;;  %3106 = vmatprep.mubr.bf16.mxu1 %v3944_v51 }
  0xd3   : > { %1950 = vmatmul.mubr.bf16.gmra.mrb[48].mxu0 %v3855_v45 }
  0xd4   : > { %1957 = vmatprep.mubr.bf16.mxu0 %v3825_v19 }
  0xd7   : > { %3107 = vmatmul.mubr.bf16.vlgmr.msra.gmra.mrb[0].mxu1 %v3716_v57 }
  0xd8   : > { %3162 = vmatpush3.bf16.msra.mxu1 %v3930_v34  ;;  %3110 = vmatprep.mubr.bf16.mxu1 %v3724_v62 }
  0xd9   : > { %3155 = vmatprep.subr.bf16.mxu1 %v3351_v9 }
  0xdb   : > { %1958 = vmatmul.mubr.bf16.gmra.mrb[52].mxu0 %v3883_v5 }
  0xdc   : > { %1965 = vmatprep.mubr.bf16.mxu0 %v3844_v36  ;;  %3163 = vmatpush3.bf16.msra.mxu1 %v3351_v9 }
  0xdd   : > { %3156 = vmatprep.subr.bf16.mxu1 %v3353_v27 }
  0xdf   : > { %3111 = vmatmul.mubr.bf16.gmra.mrb[4].mxu1 %v3767_v33 }
  0xe0   : > { %3164 = vmatpush3.bf16.msra.mxu1 %v3353_v27  ;;  %3114 = vmatprep.mubr.bf16.mxu1 %v3777_v38 }
  0xe1   : > { %3157 = vmatprep.subr.bf16.mxu1 %v3356_v46 }
  0xe3   : > { %1966 = vmatmul.mubr.bf16.gmra.mrb[56].mxu0 %v3907_v20 }
  0xe4   : > { %2728 = vmatprep.mubr.msk.bf16.mxu0 %vm2726_vm9, %v3975_v8  ;;  %3165 = vmatpush3.bf16.msra.mxu1 %v3356_v46 }
  0xe5   : > { %3158 = vmatprep.subr.bf16.mxu1 %v3358_v39 }
  0xe7   : > { %3115 = vmatmul.mubr.bf16.gmra.mrb[8].mxu1 %v3851_v44 }
  0xe8   : > { %3166 = vmatpush3.bf16.msra.mxu1 %v3358_v39  ;;  %3118 = vmatprep.mubr.bf16.mxu1 %v3872_v61 }
  0xe9   : > { %3159 = vmatprep.subr.bf16.mxu1 %v3359_v29 }
  0xeb   : > { %1974 = vmatmul.mubr.bf16.gmra.mrb[60].mxu0 %v3991_v23 }
  0xec   : > { %3138 = vmatprep.mubr.bf16.mxu0 %v3724_v62  ;;  %3167 = vmatpush3.bf16.msra.mxu1 %v3359_v29 }
  0xed   : > { %3160 = vmatprep.subr.bf16.mxu1 %v3360_v42 }
  0xef   : > { %3119 = vmatmul.mubr.bf16.gmra.mrb[12].mxu1 %v3903_v18 }
  0xf0   : > { %3168 = vmatpush3.bf16.msra.mxu1 %v3360_v42  ;;  %3146 = vmatprep.mubr.bf16.mxu1 %v3872_v61 }
  0xf1   : > { %3161 = vmatprep.subr.bf16.mxu1 %v3361_v15 }
  0xf3   : > { %3139 = vmatmul.mubr.bf16.vlgmr.msra.gmra.mrb[64].mxu0 %v3767_v33 }
  0xf4   : > { %3142 = vmatprep.mubr.bf16.mxu0 %v3777_v38  ;;  %3169 = vmatpush3.bf16.msra.mxu1 %v3361_v15 }
  0xf7   : > { %3147 = vmatmul.mubr.bf16.vlgmr.msra.gmra.mrb[8].mxu1 %v3903_v18 }
  0xf8   : > { %3150 = vmatprep.mubr.bf16.mxu1 %v3922_v30 }
  0xfb   : > { %3143 = vmatmul.mubr.bf16.gmra.mrb[68].mxu0 %v3851_v44 }
  0xff   : > { %3151 = vmatmul.mubr.bf16.gmra.mrb[12].mxu1 %v3998_v26 }
 0x146   : > { %v2834_v57 = vpop.f32.mrb[0].mxu0 }
 0x147   : > { %v2835_v62 = vpop.f32.mrb[1].mxu0 }
 0x148   : > { %v2836_v22 = vadd.f32 %v2835_v62, %v2834_v57  ;;  %v2837_v35 = vpop.f32.mrb[2].mxu0 }
 0x149   : > { %v2838_v33 = vpop.f32.mrb[3].mxu0 }
 0x14a   : > { %v2839_v54 = vadd.f32 %v2838_v33, %v2837_v35 }
 0x14e   : > { %v2840_v19 = vpop.f32.mrb[4].mxu0 }
 0x14f   : > { %v2841_v21 = vpop.f32.mrb[5].mxu0 }
 0x150   : > { %v2842_v36 = vadd.f32 %v2841_v21, %v2840_v19  ;;  %v2843_v45 = vpop.f32.mrb[6].mxu0 }
 0x151   : > { %v2844_v38 = vpop.f32.mrb[7].mxu0 }
 0x152   : > { %v2845_v61 = vadd.f32 %v2844_v38, %v2843_v45 }
 0x156   : > { %v2846_v5 = vpop.f32.mrb[8].mxu0 }
 0x157   : > { %v2847_v18 = vpop.f32.mrb[9].mxu0 }
 0x158   : > { %v2848_v20 = vadd.f32 %v2847_v18, %v2846_v5  ;;  %v2849_v44 = vpop.f32.mrb[10].mxu0 }
 0x159   : > { %v2850_v31 = vpop.f32.mrb[11].mxu0 }
 0x15a   : > { %v2851_v30 = vadd.f32 %v2850_v31, %v2849_v44 }
 0x15e   : > { %v2852_v32 = vpop.f32.mrb[12].mxu0 }
 0x15f   : > { %v2853_v34 = vpop.f32.mrb[13].mxu0 }
 0x160   : > { %v4069_v37 = vadd.f32 %v2853_v34, %v2852_v32  ;;  %v2855_v41 = vpop.f32.mrb[14].mxu0 }
 0x161   : > { %v2856_v47 = vpop.f32.mrb[15].mxu0 }
 0x162   : > { %v2857_v49 = vadd.f32 %v2856_v47, %v2855_v41 }
 0x166   : > { %v2858_v50 = vpop.f32.mrb[16].mxu0 }
 0x167   : > { %v2859_v51 = vpop.f32.mrb[17].mxu0 }
 0x168   : > { %v4071_v52 = vadd.f32 %v2859_v51, %v2858_v50  ;;  %v2861_v53 = vpop.f32.mrb[18].mxu0 }
 0x169   : > { %v2862_v55 = vpop.f32.mrb[19].mxu0 }
 0x16a   : > { %v4073_v56 = vadd.f32 %v2862_v55, %v2861_v53  ;;  %v2914_v58 = vpop.f32.mrb[16].mxu1 }
 0x16b   : > { %v2915_v60 = vpop.f32.mrb[17].mxu1 }
 0x16c   : > { %v2916_v0 = vadd.f32 %v2915_v60, %v2914_v58  ;;  %v2917_v2 = vpop.f32.mrb[18].mxu1 }
 0x16d   : > { %v2918_v4 = vpop.f32.mrb[19].mxu1 }
 0x16e   : > { %v2864_v59 = vpop.f32.mrb[20].mxu0  ;;  %v2919_v43 = vadd.f32 %v2918_v4, %v2917_v2  ;;  %v4079_v8 = vadd.f32 %v2916_v0, %v2836_v22 }
 0x16f   : > { %v2865_v63 = vpop.f32.mrb[21].mxu0 }
 0x170   : > { %v4075_v6 = vadd.f32 %v2865_v63, %v2864_v59  ;;  %v2867_v3 = vpop.f32.mrb[22].mxu0  ;;  %v4081_v10 = vadd.f32 %v2919_v43, %v2839_v54 }
 0x171   : > { %v2868_v7 = vpop.f32.mrb[23].mxu0 }
 0x172   : > { %v4077_v48 = vadd.f32 %v2868_v7, %v2867_v3  ;;  %v2920_v40 = vpop.f32.mrb[20].mxu1 }
 0x173   : > { %v2921_v11 = vpop.f32.mrb[21].mxu1 }
 0x174   : > { %v2922_v13 = vadd.f32 %v2921_v11, %v2920_v40  ;;  %v2923_v14 = vpop.f32.mrb[22].mxu1 }
 0x175   : > { %v2924_v23 = vpop.f32.mrb[23].mxu1 }
 0x176   : > { %v2870_v28 = vpop.f32.mrb[24].mxu0  ;;  %v2925_v25 = vadd.f32 %v2924_v23, %v2923_v14  ;;  %v4087_v9 = vadd.f32 %v2922_v13, %v2842_v36 }
 0x177   : > { %v2871_v12 = vpop.f32.mrb[25].mxu0 }
 0x178   : > { %v4083_v17 = vadd.f32 %v2871_v12, %v2870_v28  ;;  %v2873_v1 = vpop.f32.mrb[26].mxu0  ;;  %v4089_v16 = vadd.f32 %v2925_v25, %v2845_v61 }
 0x179   : > { %v2874_v24 = vpop.f32.mrb[27].mxu0 }
 0x17a   : > { %v4085_v26 = vadd.f32 %v2874_v24, %v2873_v1  ;;  %v2926_v27 = vpop.f32.mrb[24].mxu1 }
 0x17b   : > { %v2927_v39 = vpop.f32.mrb[25].mxu1 }
 0x17c   : > { %v2928_v42 = vadd.f32 %v2927_v39, %v2926_v27  ;;  %v2929_v15 = vpop.f32.mrb[26].mxu1 }
 0x17d   : > { %v2930_v22 = vpop.f32.mrb[27].mxu1 }
 0x17e   : > { %v2876_v46 = vpop.f32.mrb[28].mxu0  ;;  %v2931_v33 = vadd.f32 %v2930_v22, %v2929_v15  ;;  %v4095_v19 = vadd.f32 %v2928_v42, %v2848_v20 }
 0x17f   : > { %v2877_v29 = vpop.f32.mrb[29].mxu0 }
 0x180   : > { %v4091_v57 = vadd.f32 %v2877_v29, %v2876_v46  ;;  %v2879_v62 = vpop.f32.mrb[30].mxu0  ;;  %v4097_v21 = vadd.f32 %v2931_v33, %v2851_v30 }
 0x181   : > { %v2880_v35 = vpop.f32.mrb[31].mxu0 }
 0x182   : > { %v4093_v54 = vadd.f32 %v2880_v35, %v2879_v62  ;;  %v2932_v36 = vpop.f32.mrb[28].mxu1 }
 0x183   : > { %v2933_v38 = vpop.f32.mrb[29].mxu1 }
 0x184   : > { %v2934_v5 = vadd.f32 %v2933_v38, %v2932_v36  ;;  %v2935_v18 = vpop.f32.mrb[30].mxu1 }
 0x185   : > { %v2936_v32 = vpop.f32.mrb[31].mxu1 }
 0x186   : > { %v2994_v45 = vpop.f32.mrb[32].mxu0  ;;  %v2937_v41 = vadd.f32 %v2936_v32, %v2935_v18  ;;  %v4104_v50 = vadd.f32 %v2934_v5, %v4069_v37 }
 0x187   : > { %v2995_v61 = vpop.f32.mrb[33].mxu0 }
 0x188   : > { %v4099_v44 = vadd.f32 %v2995_v61, %v2994_v45  ;;  %v2997_v31 = vpop.f32.mrb[34].mxu0  ;;  %v4106_v20 = vadd.f32 %v2937_v41, %v2857_v49 }
 0x189   : > { %v2998_v34 = vpop.f32.mrb[35].mxu0 }
 0x18a   : > { %v4101_v47 = vadd.f32 %v2998_v34, %v2997_v31  ;;  %v2938_v30 = vpop.f32.mrb[32].mxu1 }
 0x18b   : > { %v2939_v53 = vpop.f32.mrb[33].mxu1 }
 0x18c   : > { %v2940_v58 = vadd.f32 %v2939_v53, %v2938_v30  ;;  %v2941_v59 = vpop.f32.mrb[34].mxu1 }
 0x18d   : > { %v2942_v0 = vpop.f32.mrb[35].mxu1 }
 0x18e   : > { %v3000_v51 = vpop.f32.mrb[36].mxu0  ;;  %v3205_v3 = vadd.f32 %v2940_v58, %v4071_v52  ;;  %v2943_v4 = vadd.f32 %v2942_v0, %v2941_v59 }
 0x18f   : > { %v3001_v55 = vpop.f32.mrb[37].mxu0 }
 0x190   : > { %v4108_v60 = vadd.f32 %v3001_v55, %v3000_v51  ;;  %v3003_v63 = vpop.f32.mrb[38].mxu0  ;;  %v3211_v37 = vadd.f32 %v2943_v4, %v4073_v56 }
 0x191   : > { %v3004_v2 = vpop.f32.mrb[39].mxu0 }
 0x192   : > { %v4111_v7 = vadd.f32 %v3004_v2, %v3003_v63  ;;  %v2944_v49 = vpop.f32.mrb[36].mxu1 }
 0x193   : > { %v2945_v40 = vpop.f32.mrb[37].mxu1 }
 0x194   : > { %v2946_v11 = vadd.f32 %v2945_v40, %v2944_v49  ;;  %v2947_v12 = vpop.f32.mrb[38].mxu1 }
 0x195   : > { %v2948_v1 = vpop.f32.mrb[39].mxu1 }
 0x196   : > { %v3006_v43 = vpop.f32.mrb[40].mxu0  ;;  %v3202_v24 = vadd.f32 %v2946_v11, %v4075_v6  ;;  %v2949_v25 = vadd.f32 %v2948_v1, %v2947_v12 }
 0x197   : > { %v3007_v28 = vpop.f32.mrb[41].mxu0 }
 0x198   : > { %v4114_v13 = vadd.f32 %v3007_v28, %v3006_v43  ;;  %v3009_v14 = vpop.f32.mrb[42].mxu0  ;;  %v3208_v27 = vadd.f32 %v2949_v25, %v4077_v48 }
 0x199   : > { %v3010_v23 = vpop.f32.mrb[43].mxu0 }
 0x19a   : > { %v4117_v52 = vadd.f32 %v3010_v23, %v3009_v14  ;;  %v2950_v46 = vpop.f32.mrb[40].mxu1 }
 0x19b   : > { %v2951_v39 = vpop.f32.mrb[41].mxu1 }
 0x19c   : > { %v2952_v42 = vadd.f32 %v2951_v39, %v2950_v46  ;;  %v2953_v15 = vpop.f32.mrb[42].mxu1 }
 0x19d   : > { %v2954_v35 = vpop.f32.mrb[43].mxu1 }
 0x19e   : > { %v3012_v56 = vpop.f32.mrb[44].mxu0  ;;  %v3217_v36 = vadd.f32 %v2952_v42, %v4083_v17  ;;  %v2955_v45 = vadd.f32 %v2954_v35, %v2953_v15 }
 0x19f   : > { %v3013_v29 = vpop.f32.mrb[45].mxu0 }
 0x1a0   : > { %v3014_v62 = vadd.f32 %v3013_v29, %v3012_v56  ;;  %v3015_v22 = vpop.f32.mrb[46].mxu0  ;;  %v3223_v6 = vadd.f32 %v2955_v45, %v4085_v26 }
 0x1a1   : > { %v3016_v33 = vpop.f32.mrb[47].mxu0 }
 0x1a2   : > { %v3017_v38 = vadd.f32 %v3016_v33, %v3015_v22  ;;  %v2956_v61 = vpop.f32.mrb[44].mxu1 }
 0x1a3   : > { %v2957_v18 = vpop.f32.mrb[45].mxu1 }
 0x1a4   : > { %v2958_v31 = vadd.f32 %v2957_v18, %v2956_v61  ;;  %v2959_v32 = vpop.f32.mrb[46].mxu1 }
 0x1a5   : > { %v2960_v30 = vpop.f32.mrb[47].mxu1 }
 0x1a6   : > { %v3018_v5 = vpop.f32.mrb[48].mxu0  ;;  %v3214_v53 = vadd.f32 %v2958_v31, %v4091_v57  ;;  %v2961_v55 = vadd.f32 %v2960_v30, %v2959_v32 }
 0x1a7   : > { %v3019_v48 = vpop.f32.mrb[49].mxu0 }
 0x1a8   : > { %v3020_v34 = vadd.f32 %v3019_v48, %v3018_v5  ;;  %v3021_v41 = vpop.f32.mrb[50].mxu0  ;;  %v3220_v17 = vadd.f32 %v2961_v55, %v4093_v54 }
 0x1a9   : > { %v3022_v51 = vpop.f32.mrb[51].mxu0 }
 0x1aa   : > { %v3023_v58 = vadd.f32 %v3022_v51, %v3021_v41  ;;  %v4123_v59 = vadd.f32 %v3205_v3, %v3020_v34  ;;  %v3108_v26 = vpop.f32.mrb[0].mxu1 }
 0x1ab   : > { %v3171_v2 = vadd.f32 %v4087_v9, %v3108_v26  ;;  %v1629_v4 = vpop.f32.mrb[1].mxu1 }
 0x1ac   : > { %v4126_v63 = vadd.f32 %v3211_v37, %v3023_v58  ;;  %v3175_v43 = vadd.f32 %v4079_v8, %v1629_v4  ;;  %v3109_v40 = vpop.f32.mrb[2].mxu1 }
 0x1ad   : > { %v3179_v57 = vadd.f32 %v4089_v16, %v3109_v40  ;;  %v1632_v12 = vpop.f32.mrb[3].mxu1  ;;  %v3172_v14 = vadd.f32 %v3171_v2, %v4108_v60 }
 0x1ae   : > { %v3024_v0 = vpop.f32.mrb[52].mxu0  ;;  %v3183_v54 = vadd.f32 %v4081_v10, %v1632_v12  ;;  %v3176_v23 = vadd.f32 %v3175_v43, %v4099_v44 }
 0x1af   : > { %v3025_v49 = vpop.f32.mrb[53].mxu0  ;;  %v3180_v9 = vadd.f32 %v3179_v57, %v4111_v7 }
 0x1b0   : > { %v3026_v28 = vadd.f32 %v3025_v49, %v3024_v0  ;;  %v3027_v11 = vpop.f32.mrb[54].mxu0  ;;  %v3184_v8 = vadd.f32 %v3183_v54, %v4101_v47 }
 0x1b1   : > { %v3028_v3 = vpop.f32.mrb[55].mxu0 }
 0x1b2   : > { %v3029_v37 = vadd.f32 %v3028_v3, %v3027_v11  ;;  %v3203_v1 = vadd.f32 %v3202_v24, %v3026_v28  ;;  %v3112_v46 = vpop.f32.mrb[4].mxu1 }
 0x1b3   : > { %v3187_v39 = vadd.f32 %v4104_v50, %v3112_v46  ;;  %v1645_v16 = vpop.f32.mrb[5].mxu1 }
 0x1b4   : > { %v3209_v25 = vadd.f32 %v3208_v27, %v3029_v37  ;;  %v3191_v42 = vadd.f32 %v4095_v19, %v1645_v16  ;;  %v3113_v60 = vpop.f32.mrb[6].mxu1 }
 0x1b5   : > { %v3195_v24 = vadd.f32 %v4106_v20, %v3113_v60  ;;  %v1648_v22 = vpop.f32.mrb[7].mxu1  ;;  %v3188_v35 = vadd.f32 %v3187_v39, %v3014_v62 }
 0x1b6   : > { %v3030_v56 = vpop.f32.mrb[56].mxu0  ;;  %v3199_v7 = vadd.f32 %v4097_v21, %v1648_v22  ;;  %v3192_v47 = vadd.f32 %v3191_v42, %v4114_v13 }
 0x1b7   : > { %v3031_v29 = vpop.f32.mrb[57].mxu0  ;;  %v3196_v50 = vadd.f32 %v3195_v24, %v3017_v38 }
 0x1b8   : > { %v3032_v15 = vadd.f32 %v3031_v29, %v3030_v56  ;;  %v3033_v10 = vpop.f32.mrb[58].mxu0  ;;  %v3200_v45 = vadd.f32 %v3199_v7, %v4117_v52 }
 0x1b9   : > { %v3034_v44 = vpop.f32.mrb[59].mxu0 }
 0x1ba   : > { %v3035_v27 = vadd.f32 %v3034_v44, %v3033_v10  ;;  %v4141_v33 = vadd.f32 %v3217_v36, %v3032_v15 }
 0x1bc   : > { %v4144_v61 = vadd.f32 %v3223_v6, %v3035_v27 }
 0x1be   : > { %v3036_v19 = vpop.f32.mrb[60].mxu0 }
 0x1bf   : > { %v3037_v5 = vpop.f32.mrb[61].mxu0 }
 0x1c0   : > { %v3038_v18 = vadd.f32 %v3037_v5, %v3036_v19  ;;  %v3039_v48 = vpop.f32.mrb[62].mxu0 }
 0x1c1   : > { %v3040_v20 = vpop.f32.mrb[63].mxu0 }
 0x1c2   : > { %v3041_v31 = vadd.f32 %v3040_v20, %v3039_v48  ;;  %v3215_v62 = vadd.f32 %v3214_v53, %v3038_v18 }
 0x1c4   : > { %v3221_v32 = vadd.f32 %v3220_v17, %v3041_v31 }
 0x1c6   : > { %v3140_v21 = vpop.f32.mrb[64].mxu0 }
 0x1c7   : > { %v3173_v34 = vadd.f32 %v3172_v14, %v3140_v21  ;;  %v2016_v13 = vpop.f32.mrb[65].mxu0 }
 0x1c8   : > { %v3177_v36 = vadd.f32 %v3176_v23, %v2016_v13  ;;  %v3141_v41 = vpop.f32.mrb[66].mxu0 }
 0x1c9   : > { %v3181_v38 = vadd.f32 %v3180_v9, %v3141_v41  ;;  %v2019_v30 = vpop.f32.mrb[67].mxu0  ;;  %v2199_v0 = vmul.f32 %v3173_v34, %v3173_v34 }
 0x1ca   : > { %v3185_v52 = vadd.f32 %v3184_v8, %v2019_v30  ;;  %v2197_v51 = vmul.f32 %v3177_v36, %v3177_v36  ;;  %v3148_v2 = vpop.f32.mrb[8].mxu1 }
 0x1cb   : > { %v2779_v6 = vpack.c.bf16 %v3181_v38, %v3173_v34  ;;  %v3204_v49 = vadd.f32 %v3203_v1, %v3148_v2  ;;  %v2048_v43 = vpop.f32.mrb[9].mxu1  ;;  %v2200_v37 = vmul.f32 %v3181_v38, %v3181_v38 }
 0x1cc   : > { %v2774_v55 = vpack.c.bf16 %v3185_v52, %v3177_v36  ;;  %v2175_v58 = vadd.f32 %v3185_v52, %v3177_v36  ;;  %v2198_v26 = vmul.f32 %v3185_v52, %v3185_v52  ;;  %v3207_v11 = vadd.f32 %v4123_v59, %v2048_v43  ;;  %v3149_v57 = vpop.f32.mrb[10].mxu1 }
 0x1cd   : > { %2811 = vst [vmem:[%s3481_s12 + $0x8] sm:$0xff] %v2779_v6   ;;  %v3210_v23 = vadd.f32 %v3209_v25, %v3149_v57  ;;  %v2051_v9 = vpop.f32.mrb[11].mxu1 }
 0x1ce   : > { %2775 = vst [vmem:[%s3481_s12] sm:$0xff] %v2774_v55   ;;  %v2176_v53 = vadd.f32 %v3173_v34, %v2175_v58  ;;  %v2213_v17 = vadd.f32 %v2198_v26, %v2197_v51  ;;  %v3144_v4 = vpop.f32.mrb[68].mxu0  ;;  %v3213_v1 = vadd.f32 %v4126_v63, %v2051_v9  ;;  %v2205_v21 = vmul.f32 %v3207_v11, %v3207_v11 }
 0x1cf   : > { %v3189_v40 = vadd.f32 %v3188_v35, %v3144_v4  ;;  %v2032_v28 = vpop.f32.mrb[69].mxu0  ;;  %v2799_v16 = vpack.c.bf16 %v3210_v23, %v3204_v49 }
 0x1d0   : > { %v2214_v12 = vadd.f32 %v2213_v17, %v2199_v0  ;;  %v3193_v3 = vadd.f32 %v3192_v47, %v2032_v28  ;;  %v2177_v14 = vadd.f32 %v3181_v38, %v2176_v53  ;;  %v3145_v54 = vpop.f32.mrb[70].mxu0  ;;  %v2794_v42 = vpack.c.bf16 %v3213_v1, %v3207_v11 }
 0x1d1   : > { %v3197_v8 = vadd.f32 %v3196_v50, %v3145_v54  ;;  %v2035_v46 = vpop.f32.mrb[71].mxu0  ;;  %2815 = vst [vmem:[%s3481_s12 + $0x28] sm:$0xff] %v2799_v16   ;;  %v2203_v7 = vmul.f32 %v3189_v40, %v3189_v40  ;;  %v2207_v38 = vmul.f32 %v3204_v49, %v3204_v49 }
 0x1d2   : > { %v2178_v56 = vadd.f32 %v3193_v3, %v2177_v14  ;;  %v2201_v39 = vmul.f32 %v3193_v3, %v3193_v3  ;;  %v2215_v29 = vadd.f32 %v2214_v12, %v2200_v37  ;;  %v3201_v60 = vadd.f32 %v3200_v45, %v2035_v46  ;;  %2814 = vst [vmem:[%s3481_s12 + $0x20] sm:$0xff] %v2794_v42   ;;  %v3152_v10 = vpop.f32.mrb[12].mxu1 }
 0x1d3   : > { %v2789_v59 = vpack.c.bf16 %v3197_v8, %v3189_v40  ;;  %v3216_v44 = vadd.f32 %v3215_v62, %v3152_v10  ;;  %v2064_v35 = vpop.f32.mrb[13].mxu1  ;;  %v2204_v5 = vmul.f32 %v3197_v8, %v3197_v8 }
 0x1d4   : > { %v2216_v15 = vadd.f32 %v2215_v29, %v2201_v39  ;;  %v2784_v24 = vpack.c.bf16 %v3201_v60, %v3193_v3  ;;  %v2179_v25 = vadd.f32 %v3201_v60, %v2178_v56  ;;  %v2202_v22 = vmul.f32 %v3201_v60, %v3201_v60  ;;  %v3153_v27 = vpop.f32.mrb[14].mxu1 }
 0x1d5   : > { %2813 = vst [vmem:[%s3481_s12 + $0x18] sm:$0xff] %v2789_v59   ;;  %v3219_v63 = vadd.f32 %v4141_v33, %v2064_v35  ;;  %v3222_v45 = vadd.f32 %v3221_v32, %v3153_v27  ;;  %v2067_v19 = vpop.f32.mrb[15].mxu1  ;;  %v2206_v33 = vmul.f32 %v3213_v1, %v3213_v1  ;;  %v2208_v32 = vmul.f32 %v3210_v23, %v3210_v23 }
 0x1d6   : > { %2812 = vst [vmem:[%s3481_s12 + $0x10] sm:$0xff] %v2784_v24   ;;  %v2180_v47 = vadd.f32 %v3189_v40, %v2179_v25  ;;  %v2217_v50 = vadd.f32 %v2216_v15, %v2202_v22  ;;  %v3225_v20 = vadd.f32 %v4144_v61, %v2067_v19  ;;  %v2211_v53 = vmul.f32 %v3216_v44, %v3216_v44 }
 0x1d7   : > { %v2809_v31 = vpack.c.bf16 %v3222_v45, %v3216_v44  ;;  %v2209_v55 = vmul.f32 %v3219_v63, %v3219_v63  ;;  %v2212_v43 = vmul.f32 %v3222_v45, %v3222_v45 }
 0x1d8   : > { %v2181_v18 = vadd.f32 %v3197_v8, %v2180_v47  ;;  %v2218_v48 = vadd.f32 %v2217_v50, %v2203_v7  ;;  %v2804_v13 = vpack.c.bf16 %v3225_v20, %v3219_v63  ;;  %v2210_v0 = vmul.f32 %v3225_v20, %v3225_v20 }
 0x1d9   : > { %2817 = vst [vmem:[%s3481_s12 + $0x38] sm:$0xff] %v2809_v31  }
 0x1da   : > { %v2182_v62 = vadd.f32 %v3207_v11, %v2181_v18  ;;  %v2219_v34 = vadd.f32 %v2218_v48, %v2204_v5  ;;  %2816 = vst [vmem:[%s3481_s12 + $0x30] sm:$0xff] %v2804_v13  }
 0x1dc   : > { %v2220_v36 = vadd.f32 %v2219_v34, %v2205_v21  ;;  %v2183_v41 = vadd.f32 %v3213_v1, %v2182_v62 }
 0x1de   : > { %v2184_v30 = vadd.f32 %v3204_v49, %v2183_v41  ;;  %v2221_v52 = vadd.f32 %v2220_v36, %v2206_v33 }
 0x1e0   : > { %v2185_v6 = vadd.f32 %v3210_v23, %v2184_v30  ;;  %v2222_v51 = vadd.f32 %v2221_v52, %v2207_v38 }
 0x1e2   : > { %v2186_v58 = vadd.f32 %v3219_v63, %v2185_v6  ;;  %v2223_v26 = vadd.f32 %v2222_v51, %v2208_v32 }
 0x1e4   : > { %v2187_v61 = vadd.f32 %v3225_v20, %v2186_v58  ;;  %v2224_v2 = vadd.f32 %v2223_v26, %v2209_v55 }
 0x1e6   : > { %v2188_v17 = vadd.f32 %v3216_v44, %v2187_v61  ;;  %v2225_v4 = vadd.f32 %v2224_v2, %v2210_v0 }
 0x1e8   : > { %v2189_v40 = vadd.f32 %v3222_v45, %v2188_v17  ;;  %v2226_v28 = vadd.f32 %v2225_v4, %v2211_v53 }
 0x1ea   : > { %v2190_v11 = vrot.slane %v2189_v40, 4  ;;  %v2227_v49 = vadd.f32 %v2226_v28, %v2212_v43 }
 0x1ec   : > { %v2191_v57 = vadd.f32 %v2190_v11, %v2189_v40  ;;  %v2228_v12 = vrot.slane %v2227_v49, 4 }
 0x1ee   : > { %v2192_v3 = vrot.slane %v2191_v57, 2  ;;  %v2229_v14 = vadd.f32 %v2228_v12, %v2227_v49 }
 0x1f0   : > { %v2193_v54 = vadd.f32 %v2192_v3, %v2191_v57  ;;  %v2230_v37 = vrot.slane %v2229_v14, 2 }
 0x1f2   : > { %v2194_v23 = vrot.slane %v2193_v54, 1  ;;  %v2231_v9 = vadd.f32 %v2230_v37, %v2229_v14 }
 0x1f4   : > { %v2195_v8 = vadd.f32 %v2194_v23, %v2193_v54  ;;  %v2232_v46 = vrot.slane %v2231_v9, 1 }
 0x1f6   : > { %2196 = vst [vmem:[%s3489_s26] sm:$0x1] %v2195_v8  ;;  %v2233_v1 = vadd.f32 %v2232_v46, %v2231_v9 }
 0x1f8   : > { %2234 = vst [vmem:[%s3489_s26 + $0x1] sm:$0x1] %v2233_v1 }
 0x1f9 PF: > { %s16_s22 = sadd.s32 1, %s3402_s22   ;;  %s4193_s12 = sld [smem:[#allocation11_spill]] }
 0x1fa   : > { %p13_p4 = scmp.ge.s32.totalorder %s16_s22, 6   ;;  %s4194_s30 = sld [smem:[#allocation12_spill]] }
 0x1fb   : > { %s4195_s18 = smov %s3394_s20  ;;  %s4196_s19 = smov %s3398_s21 }
 0x1fc   :  { %15 = sbr.rel (!%p13_p4) target bundleno = 3 (0x3), region = 350 }
 0x1ff   : > { %s4197_s20 = smov %s4193_s12 }
 0x200   : > { %s4198_s21 = smov %s4194_s30 }
 0x203   :  { %2289 = vsyncmov [#allocation3] }
 0x206   :  { %s2290_s26 = vpop.sfrf %2289 }
 0x207   :  { %p2747_p5 = scmp.ne.s32.totalorder %s2290_s26, 0 }
 0x209   :  { %2294 = shalt.err (%p2747_p5)  }
 0x20a   :  { %2296 = vsyncmov [#allocation3 + $0x1] }
 0x20d   :  { %s2297_s17 = vpop.sfrf %2296 }
 0x20e   :  { %p2748_p6 = scmp.ne.s32.totalorder %s2297_s17, 0 }
 0x210   :  { %2301 = shalt.err (%p2748_p6)  }

// kernel: decoder_block_forward.5
= control target key start
LH: loop header
LB: loop body
LE: loop exit
PB: predicated region body
PF: predicated region fallthrough
CT: control target
= control target key end

     0   :  { %s5836_s18 = smov 0   ;;  %s5838_s19 = smov 0   ;;  %s7214_s0 = inlined_call_operand.vmem [shape: bf16[2,16,16,128], index: 0, kind: input, shape index: {}]   ;;  %s7215_s1 = inlined_call_operand.vmem [shape: bf16[2,16,16,128], index: 1, kind: input, shape index: {}]   ;;  %s7216_s2 = inlined_call_operand.vmem [shape: bf16[3,384,128], index: 2, kind: input, shape index: {}]   ;;  %s7217_s3 = inlined_call_operand.vmem [shape: bf16[3,384,128], index: 3, kind: input, shape index: {}]   ;;  %s7218_s4 = inlined_call_operand.vmem [shape: bf16[2,16,16,128], index: 4, kind: output, shape index: {0}]   ;;  %s7219_s5 = inlined_call_operand.vmem [shape: f32[2,2,2,128], index: 5, kind: output, shape index: {1}]  }
   0x1   :  { %s5840_s20 = smov 0   ;;  %s5842_s21 = smov 0  }
   0x2   :  { %s5844_s22 = smov 0  }
   0x3 LB: > { %s25_s23 = sadd.s32 1, %s5796_s20  ;;  %s28_s24 = sadd.s32 1, %s5800_s21  ;;  %s5804_s22 = sphi %s5844_s22, %s16_s22   ;;  %s5800_s21 = sphi %s5842_s21, %s7239_s21   ;;  %s5796_s20 = sphi %s5840_s20, %s7238_s20   ;;  %s5792_s19 = sphi %s5838_s19, %s7237_s19   ;;  %s5788_s18 = sphi %s5836_s18, %s7236_s18  }
   0x4   : > { %p26_p0 = scmp.ge.s32.totalorder %s25_s23, 2  ;;  %p4177_p1 = scmp.ge.s32.totalorder %s5804_s22, 1 }
   0x5   : > { %p148_p2 = scmp.lt.s32.totalorder %s5804_s22, 5 }
   0x6   : > { %s7241_s23 = smov (%p26_p0, %s25_s23), 0  ;;  %s7243_s24 = smov (!%p26_p0, %s28_s24), %s5800_s21 }
   0x7   : > { %7223 = sst [smem:[#allocation19_spill]] %s7241_s23  ;;  %p149_p3 = pnand %p4177_p1, %p148_p2 }
   0x8   : > { %p30_p4 = scmp.ge.s32.totalorder %s7243_s24, 2  ;;  %s5871_s25 = sshll.u32 (!%p149_p3), %s5788_s18, 3 }
   0x9   : > { %152 = sbr.rel (%p149_p3) target bundleno = 664 (0x298), region = 28  ;;  %p181_p5 = scmp.lt.s32.totalorder (!%p149_p3), %s5792_s19, 1 }
   0xa   : > { %s7245_s24 = smov (%p30_p4, %s7243_s24), 0  ;;  %p183_p6 = scmp.lt.s32.totalorder (!%p149_p3), %s5871_s25, 15 }
   0xb   : > { %7224 = sst [smem:[#allocation20_spill]] %s7245_s24  ;;  %p193_p7 = scmp.lt.s32.totalorder (!%p149_p3), %s5788_s18, 1 }
   0xc   : > { %s201_s7 = ssub.s32 (!%p149_p3), 0, %s5788_s18  ;;  %p200_p8 = scmp.lt.s32.totalorder (!%p149_p3), %s5788_s18, 0 }
   0xd   : > { %s4184_s9 = smin.u32 (!%p149_p3), %s5788_s18, %s201_s7  ;;  %p212_p9 = scmp.eq.s32.totalorder (!%p149_p3), %s5788_s18, 0 }
   0xe   : > { %s203_s13 = sand.u32 (!%p149_p3), 1, %s4184_s9   ;;  %p4187_p11 = scmp.ne.s32.totalorder (!%p149_p3), %s5788_s18, 0 }
   0xf   : > { %s204_s16 = ssub.s32 (!%p149_p3), 0, %s203_s13 }
  0x10   : > { %s182_s26 = scalar_select %p181_p5, %s5792_s19, 1 }
  0x11   : > { %s184_s27 = scalar_select %p183_p6, %s5871_s25, 15 }
  0x12   : > { %s4180_s28 = sshll.u32 %s182_s26, 5  ;;  %s4182_s30 = sshll.u32 %s182_s26, 1 }
  0x13   : > { %s4179_s29 = sshll.u32 %s184_s27, 1  ;;  %s7247_s16 = smov (!%p200_p8, %s204_s16), %s203_s13 }
  0x14   : > { %s187_s6 = sadd.s32 %s4180_s28, %s4179_s29  ;;  %p4186_p10 = scmp.lt.s32.totalorder %s7247_s16, 0 }
  0x15   : > { %s4181_s8 = sshll.u32 %s187_s6, 2  ;;  %s210_s27 = sadd.s32 2, %s7247_s16 }
  0x16   : > { %s5883_s12 = scalar_lea.vmem %s7218_s4, %s4181_s8  ;;  %s7249_s27 = smov (!%p4186_p10, %s210_s27), %s7247_s16 }
  0x17   : > { %s194_s14 = scalar_select %p193_p7, %s5788_s18, 1 }
  0x18   : > { %215 = sbr.rel (%p4187_p11) target bundleno = 66 (0x42), region = 32  ;;  %s4189_s28 = sadd.s32 (!%p4187_p11), 4294967295, %s5871_s25 }
  0x19   : > { %s196_s15 = sadd.s32 %s4182_s30, %s194_s14  ;;  %s220_s29 = sadd.s32 (!%p4187_p11), 8, %s5871_s25 }
  0x1a   : > { %s4183_s17 = sshll.u32 %s196_s15, 1  ;;  %p218_p12 = scmp.gt.s32.totalorder (!%p4187_p11), %s4189_s28, 0 }
  0x1b   : > { %s5891_s26 = scalar_lea.vmem %s7219_s5, %s4183_s17  ;;  %p221_p13 = scmp.lt.s32.totalorder (!%p4187_p11), %s220_s29, 15 }
  0x1c   : > { %s4658_s23 = sshll.u32 (!%p4187_p11), %s5788_s18, 4  ;;  %s5900_s24 = sshll.u32 (!%p4187_p11), %s5792_s19, 5 }
  0x1d   : > { %s5905_s30 = sadd.s32 (!%p4187_p11), %s4658_s23, %s5900_s24  ;;  %s7220_s6 = smul.u32 (!%p4187_p11), 80, %s7249_s27 }
  0x1e   : > { %s7221_s7 = sshll.u32 (!%p4187_p11), %s5905_s30, 2  ;;  %s232_s13 = scalar_lea.sflag (!%p4187_p11), [#allocation4], %s7249_s27 }
  0x1f   : > { %s7251_s28 = smov (!%p218_p12, %s4189_s28), 0  ;;  %s7253_s29 = smov (!%p221_p13, %s220_s29), 15 }
  0x20   : > { %s227_s10 = scalar_lea.vmem %s7214_s0, %s7221_s7  ;;  %s3917_s11 = scalar_lea.vmem [#allocation2], %s7220_s6 }
  0x21   : > { %v265_v0 = vld [vmem:[%s227_s10] sm:$0xff]  ;;  %v267_v1 = vld [vmem:[%s227_s10 + $0x8] sm:$0xff]  ;;  %v269_v2 = vld [vmem:[%s227_s10 + $0x10] sm:$0xff] }
  0x22   : > { %4194 = vst [vmem:[%s3917_s11 + $0x8] sm:$0xff] %v265_v0  ;;  %4195 = vst [vmem:[%s3917_s11 + $0x10] sm:$0xff] %v267_v1  ;;  %v271_v3 = vld [vmem:[%s227_s10 + $0x18] sm:$0xff]  ;;  %v273_v4 = vld [vmem:[%s227_s10 + $0x20] sm:$0xff] }
  0x23   : > { %4196 = vst [vmem:[%s3917_s11 + $0x18] sm:$0xff] %v269_v2  ;;  %v275_v5 = vld [vmem:[%s227_s10 + $0x28] sm:$0xff]  ;;  %4197 = vst [vmem:[%s3917_s11 + $0x20] sm:$0xff] %v271_v3  ;;  %v277_v6 = vld [vmem:[%s227_s10 + $0x30] sm:$0xff] }
  0x24   : > { %4198 = vst [vmem:[%s3917_s11 + $0x28] sm:$0xff] %v273_v4  ;;  %4199 = vst [vmem:[%s3917_s11 + $0x30] sm:$0xff] %v275_v5  ;;  %v279_v7 = vld [vmem:[%s227_s10 + $0x38] sm:$0xff] }
  0x25   : > { %4200 = vst [vmem:[%s3917_s11 + $0x38] sm:$0xff] %v277_v6  ;;  %4201 = vst [vmem:[%s3917_s11 + $0x40] sm:$0xff] %v279_v7 }
  0x26   : > { %288 = vsyncadd %s232_s13, 1024  ;;  %s4203_s14 = sshll.u32 %s7251_s28, 1 }
  0x27   : > { %s5918_s15 = sadd.s32 %s4203_s14, %s5900_s24 }
  0x28   : > { %s7222_s16 = sshll.u32 %s5918_s15, 2 }
  0x29   : > { %s292_s8 = scalar_lea.vmem %s7214_s0, %s7222_s16 }
  0x2a   : > { %v327_v8 = vld [vmem:[%s292_s8] sm:$0xff] }
  0x2b   : > { %328 = vst [vmem:[%s3917_s11] sm:$0xff] %v327_v8 }
  0x2c   : > { %336 = vsyncadd %s232_s13, 128  ;;  %s4206_s9 = sshll.u32 %s7253_s29, 1 }
  0x2d   : > { %s5928_s10 = sadd.s32 %s4206_s9, %s5900_s24 }
  0x2e   : > { %s4207_s28 = sshll.u32 %s5928_s10, 2 }
  0x2f   : > { %s340_s7 = scalar_lea.vmem %s7214_s0, %s4207_s28 }
  0x30   : > { %v376_v9 = vld [vmem:[%s340_s7] sm:$0xff] }
  0x31   : > { %4209 = vst [vmem:[%s3917_s11 + $0x48] sm:$0xff] %v376_v9 }
  0x32   : > { %385 = vsyncadd %s232_s13, 128  ;;  %s7225_s17 = sshll.u32 %s5905_s30, 2  ;;  %s3946_s24 = scalar_lea.sflag %s232_s13, 2 [#allocation4] }
  0x33   : > { %s387_s29 = scalar_lea.vmem %s7215_s1, %s7225_s17  ;;  %s7226_s9 = smul.u32 80, %s7249_s27 }
  0x34   : > { %v424_v10 = vld [vmem:[%s387_s29] sm:$0xff]  ;;  %v426_v11 = vld [vmem:[%s387_s29 + $0x8] sm:$0xff]  ;;  %v428_v12 = vld [vmem:[%s387_s29 + $0x10] sm:$0xff] }
  0x35   : > { %s3943_s16 = scalar_lea.vmem [#allocation3], %s7226_s9  ;;  %v430_v13 = vld [vmem:[%s387_s29 + $0x18] sm:$0xff]  ;;  %v432_v14 = vld [vmem:[%s387_s29 + $0x20] sm:$0xff]  ;;  %v434_v15 = vld [vmem:[%s387_s29 + $0x28] sm:$0xff] }
  0x36   : > { %4213 = vst [vmem:[%s3943_s16 + $0x8] sm:$0xff] %v424_v10  ;;  %4214 = vst [vmem:[%s3943_s16 + $0x10] sm:$0xff] %v426_v11  ;;  %v436_v16 = vld [vmem:[%s387_s29 + $0x30] sm:$0xff]  ;;  %v438_v17 = vld [vmem:[%s387_s29 + $0x38] sm:$0xff] }
  0x37   : > { %4215 = vst [vmem:[%s3943_s16 + $0x18] sm:$0xff] %v428_v12  ;;  %4216 = vst [vmem:[%s3943_s16 + $0x20] sm:$0xff] %v430_v13 }
  0x38   : > { %4217 = vst [vmem:[%s3943_s16 + $0x28] sm:$0xff] %v432_v14  ;;  %4218 = vst [vmem:[%s3943_s16 + $0x30] sm:$0xff] %v434_v15 }
  0x39   : > { %4219 = vst [vmem:[%s3943_s16 + $0x38] sm:$0xff] %v436_v16  ;;  %4220 = vst [vmem:[%s3943_s16 + $0x40] sm:$0xff] %v438_v17 }
  0x3a   : > { %447 = vsyncadd %s3946_s24, 1024  ;;  %s7227_s30 = sshll.u32 %s5918_s15, 2 }
  0x3b   : > { %s449_s11 = scalar_lea.vmem %s7215_s1, %s7227_s30 }
  0x3c   : > { %v484_v18 = vld [vmem:[%s449_s11] sm:$0xff] }
  0x3d   : > { %485 = vst [vmem:[%s3943_s16] sm:$0xff] %v484_v18 }
  0x3e   : > { %493 = vsyncadd %s3946_s24, 128  ;;  %s495_s17 = scalar_lea.vmem %s7215_s1, %s4207_s28 }
  0x3f   : > { %v530_v19 = vld [vmem:[%s495_s17] sm:$0xff] }
  0x40   : > { %4226 = vst [vmem:[%s3943_s16 + $0x48] sm:$0xff] %v530_v19 }
  0x41   : > { %539 = vsyncadd %s3946_s24, 128 }
  0x42 PF: > { %s540_s23 = sadd.s32 1, %s5788_s18 }
  0x43   : > { %p4228_p0 = scmp.ge.s32.totalorder %s540_s23, 2 }
  0x44   : > { %s545_s15 = ssub.s32 (!%p4228_p0), 1, %s7249_s27  ;;  %s4662_s8 = sadd.s32 (!%p4228_p0), 8, %s5871_s25 }
  0x45   : > { %544 = sbr.rel (%p4228_p0) target bundleno = 106 (0x6a), region = 240  ;;  %s4230_s10 = sadd.s32 (!%p4228_p0), 4294967295, %s4662_s8 }
  0x46   : > { %s550_s29 = sadd.s32 (!%p4228_p0), 8, %s4662_s8  ;;  %p548_p1 = scmp.gt.s32.totalorder (!%p4228_p0), %s4230_s10, 0 }
  0x47   : > { %p551_p2 = scmp.lt.s32.totalorder (!%p4228_p0), %s550_s29, 15  ;;  %s5957_s28 = sshll.u32 (!%p4228_p0), %s5792_s19, 5 }
  0x48   : > { %s4232_s16 = sshll.u32 (!%p4228_p0), %s5788_s18, 4  ;;  %s5967_s9 = smul.u32 (!%p4228_p0), 80, %s545_s15 }
  0x49   : > { %s5963_s24 = sadd.s32 (!%p4228_p0), %s4232_s16, %s5957_s28  ;;  %s562_s11 = scalar_lea.sflag (!%p4228_p0), [#allocation4], %s545_s15 }
  0x4a   : > { %s4234_s25 = sshll.u32 (!%p4228_p0), %s5963_s24, 2  ;;  %s3971_s7 = scalar_lea.vmem (!%p4228_p0), [#allocation2], %s5967_s9 }
  0x4b   : > { %s3967_s19 = scalar_lea.vmem (!%p4228_p0), %s7214_s0, %s4234_s25 }
  0x4c   : > { %s7255_s10 = smov (!%p548_p1, %s4230_s10), 0  ;;  %s7257_s29 = smov (!%p551_p2, %s550_s29), 15  ;;  %v4236_v20 = vld [vmem:[%s3967_s19 + $0x40] sm:$0xff]  ;;  %v4238_v21 = vld [vmem:[%s3967_s19 + $0x48] sm:$0xff]  ;;  %v4240_v22 = vld [vmem:[%s3967_s19 + $0x50] sm:$0xff] }
  0x4d   : > { %4237 = vst [vmem:[%s3971_s7 + $0x8] sm:$0xff] %v4236_v20  ;;  %4239 = vst [vmem:[%s3971_s7 + $0x10] sm:$0xff] %v4238_v21  ;;  %v4242_v23 = vld [vmem:[%s3967_s19 + $0x58] sm:$0xff]  ;;  %v4244_v24 = vld [vmem:[%s3967_s19 + $0x60] sm:$0xff] }
  0x4e   : > { %4241 = vst [vmem:[%s3971_s7 + $0x18] sm:$0xff] %v4240_v22  ;;  %v4246_v25 = vld [vmem:[%s3967_s19 + $0x68] sm:$0xff]  ;;  %4243 = vst [vmem:[%s3971_s7 + $0x20] sm:$0xff] %v4242_v23  ;;  %v4248_v26 = vld [vmem:[%s3967_s19 + $0x70] sm:$0xff] }
  0x4f   : > { %4245 = vst [vmem:[%s3971_s7 + $0x28] sm:$0xff] %v4244_v24  ;;  %4247 = vst [vmem:[%s3971_s7 + $0x30] sm:$0xff] %v4246_v25  ;;  %v4250_v27 = vld [vmem:[%s3967_s19 + $0x78] sm:$0xff] }
  0x50   : > { %4249 = vst [vmem:[%s3971_s7 + $0x38] sm:$0xff] %v4248_v26  ;;  %4251 = vst [vmem:[%s3971_s7 + $0x40] sm:$0xff] %v4250_v27 }
  0x51   : > { %618 = vsyncadd %s562_s11, 1024  ;;  %s4254_s13 = sshll.u32 %s7255_s10, 1 }
  0x52   : > { %s5979_s14 = sadd.s32 %s4254_s13, %s5957_s28 }
  0x53   : > { %s4255_s17 = sshll.u32 %s5979_s14, 2 }
  0x54   : > { %s622_s16 = scalar_lea.vmem %s7214_s0, %s4255_s17 }
  0x55   : > { %v657_v28 = vld [vmem:[%s622_s16] sm:$0xff] }
  0x56   : > { %658 = vst [vmem:[%s3971_s7] sm:$0xff] %v657_v28 }
  0x57   : > { %666 = vsyncadd %s562_s11, 128  ;;  %s4257_s30 = sshll.u32 %s7257_s29, 1 }
  0x58   : > { %s5989_s15 = sadd.s32 %s4257_s30, %s5957_s28 }
  0x59   : > { %s4258_s10 = sshll.u32 %s5989_s15, 2 }
  0x5a   : > { %s670_s13 = scalar_lea.vmem %s7214_s0, %s4258_s10 }
  0x5b   : > { %v706_v29 = vld [vmem:[%s670_s13] sm:$0xff] }
  0x5c   : > { %4260 = vst [vmem:[%s3971_s7 + $0x48] sm:$0xff] %v706_v29 }
  0x5d   : > { %715 = vsyncadd %s562_s11, 128  ;;  %s3994_s29 = scalar_lea.vmem %s7215_s1, %s4234_s25  ;;  %s4001_s28 = scalar_lea.sflag %s562_s11, 2 [#allocation4] }
  0x5e   : > { %v4266_v30 = vld [vmem:[%s3994_s29 + $0x40] sm:$0xff]  ;;  %v4268_v31 = vld [vmem:[%s3994_s29 + $0x48] sm:$0xff]  ;;  %v4270_v32 = vld [vmem:[%s3994_s29 + $0x50] sm:$0xff]  ;;  %s3998_s16 = scalar_lea.vmem [#allocation3], %s5967_s9 }
  0x5f   : > { %4267 = vst [vmem:[%s3998_s16 + $0x8] sm:$0xff] %v4266_v30  ;;  %4269 = vst [vmem:[%s3998_s16 + $0x10] sm:$0xff] %v4268_v31  ;;  %v4272_v33 = vld [vmem:[%s3994_s29 + $0x58] sm:$0xff]  ;;  %v4274_v34 = vld [vmem:[%s3994_s29 + $0x60] sm:$0xff] }
  0x60   : > { %4271 = vst [vmem:[%s3998_s16 + $0x18] sm:$0xff] %v4270_v32  ;;  %v4276_v35 = vld [vmem:[%s3994_s29 + $0x68] sm:$0xff]  ;;  %4273 = vst [vmem:[%s3998_s16 + $0x20] sm:$0xff] %v4272_v33  ;;  %v4278_v36 = vld [vmem:[%s3994_s29 + $0x70] sm:$0xff] }
  0x61   : > { %4275 = vst [vmem:[%s3998_s16 + $0x28] sm:$0xff] %v4274_v34  ;;  %4277 = vst [vmem:[%s3998_s16 + $0x30] sm:$0xff] %v4276_v35  ;;  %v4280_v37 = vld [vmem:[%s3994_s29 + $0x78] sm:$0xff] }
  0x62   : > { %4279 = vst [vmem:[%s3998_s16 + $0x38] sm:$0xff] %v4278_v36  ;;  %4281 = vst [vmem:[%s3998_s16 + $0x40] sm:$0xff] %v4280_v37 }
  0x63   : > { %777 = vsyncadd %s4001_s28, 1024  ;;  %s779_s9 = scalar_lea.vmem %s7215_s1, %s4255_s17 }
  0x64   : > { %v814_v38 = vld [vmem:[%s779_s9] sm:$0xff] }
  0x65   : > { %815 = vst [vmem:[%s3998_s16] sm:$0xff] %v814_v38 }
  0x66   : > { %823 = vsyncadd %s4001_s28, 128  ;;  %s825_s30 = scalar_lea.vmem %s7215_s1, %s4258_s10 }
  0x67   : > { %v860_v39 = vld [vmem:[%s825_s30] sm:$0xff] }
  0x68   : > { %4288 = vst [vmem:[%s3998_s16 + $0x48] sm:$0xff] %v860_v39 }
  0x69   : > { %869 = vsyncadd %s4001_s28, 128 }
  0x6a PF: > { %s870_s6 = scalar_lea.sflag [#allocation4], %s7249_s27 }
  0x6b   : > { %5782 = dma.done.wait %s870_s6, 1280 }
  0x6c   : > { %5783 = vsyncadd %s870_s6, 4294966016  ;;  %s4020_s14 = scalar_lea.sflag %s870_s6, 2 [#allocation4] }
  0x6d   : > { %5784 = dma.done.wait %s4020_s14, 1280 }
  0x6e   : > { %5785 = vsyncadd %s4020_s14, 4294966016  ;;  %s6016_s17 = scalar_select %p212_p9, 1, 0  ;;  %v5618_v40 = vld [vmem:[%s7216_s2 + $0x100] sm:$0xff]   ;;  %v5622_v44 = vld [vmem:[%s7216_s2 + $0x108] sm:$0xff]   ;;  %vm1033_vm3 = vcmask 1040384  }
  0x6f   : > { %v5619_v41 = vld [vmem:[%s7216_s2 + $0x40] sm:$0xff]   ;;  %4730 = vmatprep.subr.bf16.mxu0 %v5618_v40  ;;  %v5623_v45 = vld [vmem:[%s7216_s2 + $0x48] sm:$0xff]   ;;  %v5626_v48 = vld [vmem:[%s7216_s2 + $0x110] sm:$0xff]   ;;  %vm1034_vm1 = vsmask.f32 256  ;;  %s4665_s15 = smul.u32 80, %s7249_s27 }
  0x70   : > { %v5620_v42 = vld [vmem:[%s7216_s2 + $0xc0] sm:$0xff]   ;;  %4810 = vmatprep.subr.bf16.mxu1 %v5619_v41  ;;  %v5624_v46 = vld [vmem:[%s7216_s2 + $0xc8] sm:$0xff]   ;;  %v5627_v49 = vld [vmem:[%s7216_s2 + $0x50] sm:$0xff]   ;;  %v905_v60 = vstv %s6016_s17  ;;  %vm1076_vm5 = vcmask 1046528   ;;  %p907_p3 = scmp.eq.s32.totalorder %s5788_s18, 1 }
  0x71   : > { %v5621_v43 = vld [vmem:[%s7216_s2] sm:$0xff]   ;;  %4731 = vmatpush3.bf16.msra.mxu0 %v5620_v42  ;;  %v5625_v47 = vld [vmem:[%s7216_s2 + $0x8] sm:$0xff]   ;;  %v5628_v50 = vld [vmem:[%s7216_s2 + $0xd0] sm:$0xff]   ;;  %vm6088_vm0 = vcmp.eq.s32.totalorder %v905_v60, 1  ;;  %s6124_s7 = scalar_lea.vmem [#allocation2], %s4665_s15  ;;  %s6448_s8 = scalar_lea.vmem [#allocation3], %s4665_s15 }
  0x72   : > { %4811 = vmatpush3.bf16.msra.mxu1 %v5621_v43  ;;  %4732 = vmatprep.subr.bf16.mxu0 %v5622_v44  ;;  %v5629_v51 = vld [vmem:[%s7216_s2 + $0x10] sm:$0xff]   ;;  %v5630_v52 = vld [vmem:[%s7216_s2 + $0x118] sm:$0xff]   ;;  %v5634_v56 = vld [vmem:[%s7216_s2 + $0x120] sm:$0xff]   ;;  %s6432_s30 = scalar_select %p907_p3, 1, 0 }
  0x73   : > { %4812 = vmatprep.subr.bf16.mxu1 %v5623_v45  ;;  %v5631_v53 = vld [vmem:[%s7216_s2 + $0x58] sm:$0xff]   ;;  %v5635_v57 = vld [vmem:[%s7216_s2 + $0x60] sm:$0xff]   ;;  %v5638_v61 = vld [vmem:[%s7216_s2 + $0x128] sm:$0xff]  }
  0x74   : > { %v5632_v54 = vld [vmem:[%s7216_s2 + $0xd8] sm:$0xff]   ;;  %v5636_v58 = vld [vmem:[%s7216_s2 + $0xe0] sm:$0xff]   ;;  %v5639_v62 = vld [vmem:[%s7216_s2 + $0x68] sm:$0xff]  }
  0x75   : > { %4733 = vmatpush3.bf16.msra.mxu0 %v5624_v46  ;;  %v5633_v55 = vld [vmem:[%s7216_s2 + $0x18] sm:$0xff]   ;;  %v5637_v59 = vld [vmem:[%s7216_s2 + $0x20] sm:$0xff]   ;;  %v5640_v63 = vld [vmem:[%s7216_s2 + $0xe8] sm:$0xff]  }
  0x76   : > { %4813 = vmatpush3.bf16.msra.mxu1 %v5625_v47  ;;  %4734 = vmatprep.subr.bf16.mxu0 %v5626_v48  ;;  %v5641_v1 = vld [vmem:[%s7216_s2 + $0x28] sm:$0xff]   ;;  %vm4388_vm2 = vmneg %vm6088_vm0  ;;  %v5642_v2 = vld [vmem:[%s7216_s2 + $0x130] sm:$0xff]  }
  0x77   : > { %4814 = vmatprep.subr.bf16.mxu1 %v5627_v49  ;;  %v5643_v3 = vld [vmem:[%s7216_s2 + $0x70] sm:$0xff]   ;;  %v5646_v6 = vld [vmem:[%s7216_s2 + $0x138] sm:$0xff]   ;;  %vm6131_vm4 = vmand %vm1033_vm3, %vm1034_vm1 }
  0x78   : > { %v5644_v4 = vld [vmem:[%s7216_s2 + $0xf0] sm:$0xff]   ;;  %v5647_v7 = vld [vmem:[%s7216_s2 + $0x78] sm:$0xff]   ;;  %v5650_v19 = vld [vmem:[%s7216_s2 + $0x140] sm:$0xff]  }
  0x79   : > { %4735 = vmatpush3.bf16.msra.mxu0 %v5628_v50  ;;  %v5645_v5 = vld [vmem:[%s7216_s2 + $0x30] sm:$0xff]   ;;  %v5648_v8 = vld [vmem:[%s7216_s2 + $0xf8] sm:$0xff]   ;;  %v5651_v21 = vld [vmem:[%s7216_s2 + $0x80] sm:$0xff]  }
  0x7a   : > { %4815 = vmatpush3.bf16.msra.mxu1 %v5629_v51  ;;  %4736 = vmatprep.subr.bf16.mxu0 %v5630_v52  ;;  %v5649_v9 = vld [vmem:[%s7216_s2 + $0x38] sm:$0xff]   ;;  %v894_v11 = vld [vmem:[%s6124_s7] sm:$0xff]  ;;  %v6149_v22 = vld [vmem:[%s6124_s7 + $0x10] sm:$0xff] }
  0x7b   : > { %4816 = vmatprep.subr.bf16.mxu1 %v5631_v53  ;;  %v895_v10 = vld [vmem:[%s6124_s7 + $0x8] sm:$0xff]  ;;  %v911_v12 = vsel %vm6088_vm0, 0, %v894_v11  ;;  %4389 = vmatprep.mubr.msk.bf16.mxu1 %vm4388_vm2, %v894_v11  ;;  %v958_v24 = vshrl.u32 %v6149_v22, 16  ;;  %v961_v25 = vshll.u32 %v6149_v22, 16  ;;  %v6156_v27 = vld [vmem:[%s6124_s7 + $0x18] sm:$0xff]  ;;  %v5654_v35 = vld [vmem:[%s7216_s2 + $0x150] sm:$0xff]  }
  0x7c   : > { %1390 = vmatprep.mubr.bf16.mxu0 %v895_v10  ;;  %v951_v13 = vshrl.u32 %v895_v10, 16  ;;  %v954_v14 = vshll.u32 %v895_v10, 16  ;;  %v944_v15 = vshrl.u32 %v911_v12, 16  ;;  %v947_v16 = vshll.u32 %v911_v12, 16  ;;  %v5652_v30 = vld [vmem:[%s7216_s2 + $0x148] sm:$0xff]   ;;  %v5655_v36 = vld [vmem:[%s7216_s2 + $0x90] sm:$0xff]  }
  0x7d   : > { %4737 = vmatpush3.bf16.msra.mxu0 %v5632_v54  ;;  %v6162_v29 = vrot.slane %v958_v24, 7  ;;  %v5653_v32 = vld [vmem:[%s7216_s2 + $0x88] sm:$0xff]   ;;  %v965_v34 = vshrl.u32 %v6156_v27, 16  ;;  %v968_v39 = vshll.u32 %v6156_v27, 16  ;;  %v6193_v40 = vld [vmem:[%s6124_s7 + $0x20] sm:$0xff]  ;;  %v5656_v41 = vld [vmem:[%s7216_s2 + $0x158] sm:$0xff]  }
  0x7e   : > { %4817 = vmatpush3.bf16.msra.mxu1 %v5633_v55  ;;  %4738 = vmatprep.subr.bf16.mxu0 %v5634_v56  ;;  %v6138_v18 = vrot.slane %v951_v13, 7  ;;  %v6143_v20 = vrot.slane %v944_v15, 7  ;;  %v5657_v42 = vld [vmem:[%s7216_s2 + $0x98] sm:$0xff]   ;;  %v972_v44 = vshrl.u32 %v6193_v40, 16  ;;  %v5658_v45 = vld [vmem:[%s7216_s2 + $0x160] sm:$0xff]   ;;  %v975_v49 = vshll.u32 %v6193_v40, 16 }
  0x7f   : > { %4818 = vmatprep.subr.bf16.mxu1 %v5635_v57  ;;  %v963_v33 = vor.u32 %v961_v25, %v6162_v29  ;;  %v6189_v38 = vrot.slane %v965_v34, 7  ;;  %v5659_v46 = vld [vmem:[%s7216_s2 + $0xa0] sm:$0xff]   ;;  %v6221_v50 = vld [vmem:[%s6124_s7 + $0x28] sm:$0xff]  ;;  %v5662_v57 = vld [vmem:[%s7216_s2 + $0x170] sm:$0xff]  }
  0x80   : > { %v956_v23 = vor.u32 %v954_v14, %v6138_v18  ;;  %v949_v26 = vor.u32 %v947_v16, %v6143_v20  ;;  %v6217_v48 = vrot.slane %v972_v44, 7  ;;  %v5660_v51 = vld [vmem:[%s7216_s2 + $0x168] sm:$0xff]   ;;  %v979_v52 = vshrl.u32 %v6221_v50, 16  ;;  %v6236_v55 = vld [vmem:[%s6124_s7 + $0x30] sm:$0xff]  ;;  %v6296_v13 = vld [vmem:[%s6124_s7 + $0x40] sm:$0xff] }
  0x81   : > { %4739 = vmatpush3.bf16.msra.mxu0 %v5636_v58  ;;  %v6187_v37 = vsel %vm6131_vm4, 0, %v963_v33  ;;  %v970_v43 = vor.u32 %v968_v39, %v6189_v38  ;;  %v5661_v53 = vld [vmem:[%s7216_s2 + $0xa8] sm:$0xff]   ;;  %v982_v56 = vshll.u32 %v6221_v50, 16  ;;  %v1000_v15 = vshrl.u32 %v6296_v13, 16 }
  0x82   : > { %4819 = vmatpush3.bf16.msra.mxu1 %v5637_v59  ;;  %4740 = vmatprep.subr.bf16.mxu0 %v5638_v61  ;;  %v6160_v28 = vsel %vm6131_vm4, 0, %v956_v23  ;;  %v6170_v31 = vsel %vm6131_vm4, 0, %v949_v26  ;;  %v977_v54 = vor.u32 %v975_v49, %v6217_v48  ;;  %v6242_v58 = vrot.slane %v979_v52, 7  ;;  %v5663_v59 = vld [vmem:[%s7216_s2 + $0xb0] sm:$0xff]   ;;  %v5726_v0 = vld [vmem:[%s7217_s3 + $0x1c8] sm:$0xff]  }
  0x83   : > { %4820 = vmatprep.subr.bf16.mxu1 %v5639_v62  ;;  %v6215_v47 = vsel %vm6131_vm4, 0, %v970_v43  ;;  %v986_v61 = vshrl.u32 %v6236_v55, 16  ;;  %v5664_v62 = vld [vmem:[%s7216_s2 + $0x178] sm:$0xff]   ;;  %v1003_v16 = vshll.u32 %v6296_v13, 16  ;;  %v1047_v23 = vsel %vm6131_vm4, %v6138_v18, 0  ;;  %v5669_v43 = vld [vmem:[%s7216_s2 + $0x1c8] sm:$0xff]  }
  0x84   : > { %v6249_v60 = vsel %vm6131_vm4, 0, %v977_v54  ;;  %v1046_v24 = vsel %vm6131_vm4, %v6143_v20, 0  ;;  %v1080_v26 = vrot.slane %v6160_v28, 1  ;;  %v1077_v18 = vrot.slane %v6170_v31, 1  ;;  %v5672_v52 = vld [vmem:[%s7216_s2 + $0x1d0] sm:$0xff]  }
  0x85   : > { %4741 = vmatpush3.bf16.msra.mxu0 %v5640_v63  ;;  %v984_v63 = vor.u32 %v982_v56, %v6242_v58  ;;  %v1048_v33 = vsel %vm6131_vm4, %v6162_v29, 0  ;;  %v1086_v39 = vrot.slane %v6215_v47, 1  ;;  %v1050_v44 = vsel %vm6131_vm4, %v6217_v48, 0 }
  0x86   : > { %4821 = vmatpush3.bf16.msra.mxu1 %v5641_v1  ;;  %4742 = vmatprep.subr.bf16.mxu0 %v5642_v2  ;;  %v5665_v1 = vld [vmem:[%s7216_s2 + $0xb8] sm:$0xff]   ;;  %v6263_v2 = vrot.slane %v986_v61, 7  ;;  %v1089_v49 = vrot.slane %v6249_v60, 1  ;;  %v1051_v48 = vsel %vm6131_vm4, %v6242_v58, 0  ;;  %v5674_v58 = vld [vmem:[%s7216_s2 + $0x190] sm:$0xff]  }
  0x87   : > { %4822 = vmatprep.subr.bf16.mxu1 %v5643_v3  ;;  %v989_v3 = vshll.u32 %v6236_v55, 16  ;;  %v1093_v56 = vrot.slane %v1051_v48, 1 }
  0x88   : > { %v1052_v61 = vsel %vm6131_vm4, %v6263_v2, 0 }
  0x89   : > { %4743 = vmatpush3.bf16.msra.mxu0 %v5644_v4  ;;  %v5666_v4 = vld [vmem:[%s7216_s2 + $0x1c0] sm:$0xff]  }
  0x8a   : > { %4823 = vmatpush3.bf16.msra.mxu1 %v5645_v5  ;;  %4744 = vmatprep.subr.bf16.mxu0 %v5646_v6  ;;  %v6271_v5 = vsel %vm6131_vm4, 0, %v984_v63  ;;  %v6276_v6 = vld [vmem:[%s7216_s2 + $0x200] sm:$0xff]  }
  0x8b   : > { %4824 = vmatprep.subr.bf16.mxu1 %v5647_v7  ;;  %v6279_v7 = vld [vmem:[%s6124_s7 + $0x38] sm:$0xff]  ;;  %v1092_v54 = vrot.slane %v6271_v5, 1 }
  0x8d   : > { %4745 = vmatpush3.bf16.msra.mxu0 %v5648_v8  ;;  %v991_v8 = vor.u32 %v989_v3, %v6263_v2  ;;  %v6393_v63 = vsel %vm1076_vm5, %v1092_v54, %v1093_v56  ;;  %v1096_v3 = vrot.slane %v1052_v61, 1  ;;  %v5700_v56 = vld [vmem:[%s7217_s3 + $0x10] sm:$0xff]   ;;  %v6525_v61 = vld [vmem:[%s6448_s8 + $0x8] sm:$0xff] }
  0x8e   : > { %4825 = vmatpush3.bf16.msra.mxu1 %v5649_v9  ;;  %5210 = vmatprep.subr.bf16.mxu0 %v5650_v19  ;;  %v993_v9 = vshrl.u32 %v6279_v7, 16 }
  0x8f   : > { %5242 = vmatprep.subr.bf16.mxu1 %v5651_v21  ;;  %v6291_v11 = vsel %vm6131_vm4, 0, %v991_v8  ;;  %v5679_v8 = vld [vmem:[%s7216_s2 + $0x220] sm:$0xff]  }
  0x90   : > { %1391 = vmatmul.mubr.bf16.vlgmr.msra.gmra.mrb[0].mxu0 %v6160_v28  ;;  %v6293_v12 = vrot.slane %v993_v9, 7  ;;  %v1095_v2 = vrot.slane %v6291_v11, 1 }
  0x91   : > { %1729 = vmatmul.mubr.bf16.vlgmr.msra.gmra.mrb[0].mxu1 %v6170_v31  ;;  %5211 = vmatpush3.bf16.msra.mxu0 %v5650_v19  ;;  %v1049_v31 = vsel %vm6131_vm4, %v6189_v38, 0  ;;  %v5670_v38 = vld [vmem:[%s7216_s2 + $0x208] sm:$0xff]  }
  0x92   : > { %5243 = vmatpush3.bf16.msra.mxu1 %v5651_v21  ;;  %1398 = vmatprep.mubr.bf16.mxu0 %v6149_v22  ;;  %v6309_v21 = vrot.slane %v1000_v15, 7  ;;  %v1087_v29 = vrot.slane %v1049_v31, 1  ;;  %v5681_v15 = vld [vmem:[%s7216_s2 + $0x1e8] sm:$0xff]   ;;  %v909_v31 = vstv %s6432_s30 }
  0x93   : > { %1736 = vmatprep.mubr.bf16.mxu1 %v895_v10  ;;  %5212 = vmatprep.subr.bf16.mxu0 %v5652_v30  ;;  %v996_v10 = vshll.u32 %v6279_v7, 16  ;;  %vm6485_vm6 = vcmp.eq.s32.totalorder %v909_v31, 1 }
  0x94   : > { %5244 = vmatprep.subr.bf16.mxu1 %v5653_v32  ;;  %v1005_v25 = vor.u32 %v1003_v16, %v6309_v21  ;;  %v1054_v16 = vsel %vm6131_vm4, %v6309_v21, 0  ;;  %v5683_v21 = vld [vmem:[%s7216_s2 + $0x1a8] sm:$0xff]   ;;  %vm4462_vm7 = vmneg %vm6485_vm6 }
  0x95   : > { %5213 = vmatpush3.bf16.msra.mxu0 %v5652_v30  ;;  %v998_v14 = vor.u32 %v996_v10, %v6293_v12  ;;  %v1081_v30 = vrot.slane %v1047_v23, 1  ;;  %v5682_v23 = vld [vmem:[%s7216_s2 + $0x228] sm:$0xff]  }
  0x96   : > { %5245 = vmatpush3.bf16.msra.mxu1 %v5653_v32  ;;  %5214 = vmatprep.subr.bf16.mxu0 %v5654_v35  ;;  %v1078_v32 = vrot.slane %v1046_v24, 1  ;;  %v6326_v20 = vsel %vm6131_vm4, 0, %v1005_v25 }
  0x97   : > { %5246 = vmatprep.subr.bf16.mxu1 %v5655_v36  ;;  %v6307_v19 = vsel %vm6131_vm4, 0, %v998_v14  ;;  %v1082_v34 = vsel %vm1076_vm5, %v1080_v26, %v1081_v30  ;;  %v5680_v14 = vld [vmem:[%s7216_s2 + $0x1a0] sm:$0xff]   ;;  %v1101_v25 = vrot.slane %v6326_v20, 1  ;;  %v1102_v26 = vrot.slane %v1054_v16, 1  ;;  %v5684_v30 = vld [vmem:[%s7216_s2 + $0x1f0] sm:$0xff]   ;;  %v5710_v16 = vld [vmem:[%s7217_s3 + $0x68] sm:$0xff]  }
  0x98   : > { %1399 = vmatmul.mubr.bf16.gmra.mrb[4].mxu0 %v6187_v37  ;;  %v1098_v9 = vrot.slane %v6307_v19, 1 }
  0x99   : > { %1737 = vmatmul.mubr.bf16.gmra.mrb[4].mxu1 %v6160_v28  ;;  %1406 = vmatprep.mubr.bf16.mxu0 %v6156_v27  ;;  %v1083_v28 = vrot.slane %v6187_v37, 1 }
  0x9a   : > { %1744 = vmatprep.mubr.bf16.mxu1 %v6149_v22  ;;  %5215 = vmatpush3.bf16.msra.mxu0 %v5654_v35  ;;  %v1079_v35 = vsel %vm1076_vm5, %v1077_v18, %v1078_v32  ;;  %v5685_v32 = vld [vmem:[%s7216_s2 + $0x230] sm:$0xff]  }
  0x9b   : > { %5247 = vmatpush3.bf16.msra.mxu1 %v5655_v36  ;;  %5216 = vmatprep.subr.bf16.mxu0 %v5656_v41  ;;  %v1084_v36 = vrot.slane %v1048_v33, 1  ;;  %v6451_v18 = vld [vmem:[%s6448_s8] sm:$0xff]  ;;  %v6455_v33 = vsel %vm1076_vm5, %v1101_v25, %v1102_v26  ;;  %v6571_v26 = vld [vmem:[%s6448_s8 + $0x18] sm:$0xff] }
  0x9c   : > { %5248 = vmatprep.subr.bf16.mxu1 %v5657_v42 }
  0x9e   : > { %5217 = vmatpush3.bf16.msra.mxu0 %v5656_v41  ;;  %v6341_v41 = vsel %vm1076_vm5, %v1083_v28, %v1084_v36  ;;  %v5688_v28 = vld [vmem:[%s7216_s2 + $0x238] sm:$0xff]  }
  0x9f   : > { %5249 = vmatpush3.bf16.msra.mxu1 %v5657_v42  ;;  %5218 = vmatprep.subr.bf16.mxu0 %v5658_v45  ;;  %v5668_v42 = vld [vmem:[%s7216_s2 + $0x180] sm:$0xff]   ;;  %v5689_v36 = vld [vmem:[%s7216_s2 + $0x1b8] sm:$0xff]  }
  0xa0   : > { %1407 = vmatmul.mubr.bf16.gmra.mrb[8].mxu0 %v6215_v47  ;;  %5250 = vmatprep.subr.bf16.mxu1 %v5659_v46 }
  0xa1   : > { %1745 = vmatmul.mubr.bf16.gmra.mrb[8].mxu1 %v6187_v37  ;;  %1414 = vmatprep.mubr.bf16.mxu0 %v6193_v40 }
  0xa2   : > { %1752 = vmatprep.mubr.bf16.mxu1 %v6156_v27  ;;  %5219 = vmatpush3.bf16.msra.mxu0 %v5658_v45  ;;  %v5671_v45 = vld [vmem:[%s7216_s2 + $0x188] sm:$0xff]  }
  0xa3   : > { %5251 = vmatpush3.bf16.msra.mxu1 %v5659_v46  ;;  %5220 = vmatprep.subr.bf16.mxu0 %v5660_v51  ;;  %v6360_v46 = vsel %vm1076_vm5, %v1086_v39, %v1087_v29  ;;  %v933_v39 = vsel %vm6088_vm0, 0, %v6451_v18  ;;  %v5690_v29 = vld [vmem:[%s7217_s3 + $0x40] sm:$0xff]  }
  0xa4   : > { %5252 = vmatprep.subr.bf16.mxu1 %v5661_v53 }
  0xa6   : > { %5221 = vmatpush3.bf16.msra.mxu0 %v5660_v51  ;;  %v1090_v51 = vrot.slane %v1050_v44, 1 }
  0xa7   : > { %5253 = vmatpush3.bf16.msra.mxu1 %v5661_v53  ;;  %5222 = vmatprep.subr.bf16.mxu0 %v5662_v57  ;;  %v5673_v53 = vld [vmem:[%s7216_s2 + $0x210] sm:$0xff]  }
  0xa8   : > { %1415 = vmatmul.mubr.bf16.gmra.mrb[12].mxu0 %v6249_v60  ;;  %5254 = vmatprep.subr.bf16.mxu1 %v5663_v59 }
  0xa9   : > { %1753 = vmatmul.mubr.bf16.gmra.mrb[12].mxu1 %v6215_v47  ;;  %1422 = vmatprep.mubr.bf16.mxu0 %v6221_v50 }
  0xaa   : > { %1760 = vmatprep.mubr.bf16.mxu1 %v6193_v40  ;;  %5223 = vmatpush3.bf16.msra.mxu0 %v5662_v57  ;;  %v6377_v57 = vsel %vm1076_vm5, %v1089_v49, %v1090_v51  ;;  %v2297_v49 = vshll.u32 %v933_v39, 16  ;;  %v5693_v51 = vld [vmem:[%s7217_s3 + $0x88] sm:$0xff]  }
  0xab   : > { %5255 = vmatpush3.bf16.msra.mxu1 %v5663_v59  ;;  %5224 = vmatprep.subr.bf16.mxu0 %v5664_v62  ;;  %v5675_v59 = vld [vmem:[%s7216_s2 + $0x1d8] sm:$0xff]  }
  0xac   : > { %5256 = vmatprep.subr.bf16.mxu1 %v5665_v1 }
  0xae   : > { %5225 = vmatpush3.bf16.msra.mxu0 %v5664_v62  ;;  %v5676_v62 = vld [vmem:[%s7216_s2 + $0x218] sm:$0xff]  }
  0xaf   : > { %5257 = vmatpush3.bf16.msra.mxu1 %v5665_v1  ;;  %4890 = vmatprep.subr.bf16.mxu0 %v5666_v4  ;;  %v5677_v1 = vld [vmem:[%s7216_s2 + $0x198] sm:$0xff]   ;;  %v1053_v4 = vsel %vm6131_vm4, %v6293_v12, 0  ;;  %v6414_v12 = vsel %vm1076_vm5, %v1095_v2, %v1096_v3  ;;  %v5699_v2 = vld [vmem:[%s7217_s3 + $0xa0] sm:$0xff]  }
  0xb0   : > { %1423 = vmatmul.mubr.bf16.gmra.mrb[16].mxu0 %v6271_v5  ;;  %5274 = vmatprep.subr.bf16.mxu1 %v6276_v6  ;;  %v1099_v10 = vrot.slane %v1053_v4, 1 }
  0xb1   : > { %1761 = vmatmul.mubr.bf16.gmra.mrb[16].mxu1 %v6249_v60  ;;  %1430 = vmatprep.mubr.bf16.mxu0 %v6236_v55 }
  0xb2   : > { %1768 = vmatprep.mubr.bf16.mxu1 %v6221_v50  ;;  %v6430_v24 = vsel %vm1076_vm5, %v1098_v9, %v1099_v10  ;;  %v2304_v9 = vshll.u32 %v6525_v61, 16  ;;  %v5701_v10 = vld [vmem:[%s7217_s3 + $0xa8] sm:$0xff]  }
  0xb8   : > { %1431 = vmatmul.mubr.bf16.gmra.mrb[20].mxu0 %v6291_v11 }
  0xb9   : > { %1769 = vmatmul.mubr.bf16.gmra.mrb[20].mxu1 %v6271_v5  ;;  %1438 = vmatprep.mubr.bf16.mxu0 %v6279_v7 }
  0xba   : > { %1776 = vmatprep.mubr.bf16.mxu1 %v6236_v55 }
  0xc0   : > { %1439 = vmatmul.mubr.bf16.gmra.mrb[24].mxu0 %v6307_v19 }
  0xc1   : > { %1777 = vmatmul.mubr.bf16.gmra.mrb[24].mxu1 %v6291_v11  ;;  %1446 = vmatprep.mubr.bf16.mxu0 %v6296_v13 }
  0xc2   : > { %1784 = vmatprep.mubr.bf16.mxu1 %v6279_v7 }
  0xc8   : > { %1447 = vmatmul.mubr.bf16.gmra.mrb[28].mxu0 %v6326_v20 }
  0xc9   : > { %1785 = vmatmul.mubr.bf16.gmra.mrb[28].mxu1 %v6307_v19  ;;  %5226 = vmatprep.mubr.bf16.mxu0 %v1082_v34 }
  0xca   : > { %5258 = vmatprep.mubr.bf16.mxu1 %v1079_v35  ;;  %v5687_v35 = vld [vmem:[%s7216_s2 + $0x1f8] sm:$0xff]  }
  0xd0   : > { %5227 = vmatmul.mubr.bf16.vlgmr.msra.gmra.mrb[32].mxu0 %v6341_v41 }
  0xd1   : > { %5259 = vmatmul.mubr.bf16.vlgmr.msra.gmra.mrb[32].mxu1 %v1082_v34  ;;  %4891 = vmatpush3.bf16.msra.mxu0 %v5668_v42  ;;  %v5686_v34 = vld [vmem:[%s7216_s2 + $0x1b0] sm:$0xff]   ;;  %v5691_v42 = vld [vmem:[%s7217_s3 + $0x80] sm:$0xff]  }
  0xd2   : > { %5275 = vmatpush3.bf16.msra.mxu1 %v6276_v6  ;;  %4892 = vmatprep.subr.bf16.mxu0 %v5669_v43  ;;  %v5678_v6 = vld [vmem:[%s7216_s2 + $0x1e0] sm:$0xff]   ;;  %v6483_v43 = vld [vmem:[%s6124_s7 + $0x48] sm:$0xff] }
  0xd3   : > { %5276 = vmatprep.subr.bf16.mxu1 %v5670_v38  ;;  %5230 = vmatprep.mubr.bf16.mxu0 %v6360_v46 }
  0xd4   : > { %5262 = vmatprep.mubr.bf16.mxu1 %v6341_v41 }
  0xd5   : > { %4893 = vmatpush3.bf16.msra.mxu0 %v5671_v45  ;;  %v5692_v45 = vld [vmem:[%s7217_s3] sm:$0xff]  }
  0xd6   : > { %5277 = vmatpush3.bf16.msra.mxu1 %v5670_v38  ;;  %4894 = vmatprep.subr.bf16.mxu0 %v5672_v52  ;;  %v2294_v38 = vshrl.u32 %v933_v39, 16  ;;  %v5696_v52 = vld [vmem:[%s7217_s3 + $0x8] sm:$0xff]   ;;  %v5705_v39 = vld [vmem:[%s7217_s3 + $0xb8] sm:$0xff]  }
  0xd7   : > { %5278 = vmatprep.subr.bf16.mxu1 %v5673_v53 }
  0xd8   : > { %5231 = vmatmul.mubr.bf16.gmra.mrb[36].mxu0 %v6377_v57  ;;  %v2296_v48 = vrot.slane %v2294_v38, 7 }
  0xd9   : > { %5263 = vmatmul.mubr.bf16.gmra.mrb[36].mxu1 %v6360_v46  ;;  %4895 = vmatpush3.bf16.msra.mxu0 %v5674_v58 }
  0xda   : > { %5279 = vmatpush3.bf16.msra.mxu1 %v5673_v53  ;;  %4896 = vmatprep.subr.bf16.mxu0 %v5675_v59  ;;  %v2299_v54 = vor.u32 %v2297_v49, %v2296_v48  ;;  %v2393_v4 = vsel %vm6131_vm4, %v2296_v48, 0 }
  0xdb   : > { %5280 = vmatprep.subr.bf16.mxu1 %v5676_v62  ;;  %5234 = vmatprep.mubr.bf16.mxu0 %v6393_v63 }
  0xdc   : > { %5266 = vmatprep.mubr.bf16.mxu1 %v6377_v57 }
  0xdd   : > { %4897 = vmatpush3.bf16.msra.mxu0 %v5677_v1  ;;  %v6533_v1 = vld [vmem:[%s6448_s8 + $0x10] sm:$0xff] }
  0xde   : > { %5281 = vmatpush3.bf16.msra.mxu1 %v5676_v62  ;;  %4898 = vmatprep.subr.bf16.mxu0 %v5678_v6  ;;  %v6530_v62 = vsel %vm6131_vm4, 0, %v2299_v54  ;;  %v2301_v6 = vshrl.u32 %v6525_v61, 16  ;;  %v2311_v25 = vshll.u32 %v6533_v1, 16  ;;  %v6622_v54 = vld [vmem:[%s6448_s8 + $0x30] sm:$0xff] }
  0xdf   : > { %5282 = vmatprep.subr.bf16.mxu1 %v5679_v8 }
  0xe0   : > { %5235 = vmatmul.mubr.bf16.gmra.mrb[40].mxu0 %v6414_v12 }
  0xe1   : > { %5267 = vmatmul.mubr.bf16.gmra.mrb[40].mxu1 %v6393_v63  ;;  %4899 = vmatpush3.bf16.msra.mxu0 %v5680_v14  ;;  %v5708_v14 = vld [vmem:[%s7217_s3 + $0x20] sm:$0xff]  }
  0xe2   : > { %5283 = vmatpush3.bf16.msra.mxu1 %v5679_v8  ;;  %4900 = vmatprep.subr.bf16.mxu0 %v5681_v15  ;;  %v5706_v8 = vld [vmem:[%s7217_s3 + $0x60] sm:$0xff]   ;;  %v2303_v15 = vrot.slane %v2301_v6, 7 }
  0xe3   : > { %5284 = vmatprep.subr.bf16.mxu1 %v5682_v23  ;;  %5238 = vmatprep.mubr.bf16.mxu0 %v6430_v24 }
  0xe4   : > { %5270 = vmatprep.mubr.bf16.mxu1 %v6414_v12 }
  0xe5   : > { %4901 = vmatpush3.bf16.msra.mxu0 %v5683_v21  ;;  %v2423_v21 = vrot.slane %v6530_v62, 1 }
  0xe6   : > { %5285 = vmatpush3.bf16.msra.mxu1 %v5682_v23  ;;  %4902 = vmatprep.subr.bf16.mxu0 %v5684_v30  ;;  %v5703_v30 = vld [vmem:[%s7217_s3 + $0xb0] sm:$0xff]  }
  0xe7   : > { %5286 = vmatprep.subr.bf16.mxu1 %v5685_v32 }
  0xe8   : > { %5239 = vmatmul.mubr.bf16.gmra.mrb[44].mxu0 %v6455_v33 }
  0xe9   : > { %5271 = vmatmul.mubr.bf16.gmra.mrb[44].mxu1 %v6430_v24  ;;  %4903 = vmatpush3.bf16.msra.mxu0 %v5686_v34  ;;  %v6579_v34 = vld [vmem:[%s6448_s8 + $0x20] sm:$0xff] }
  0xea   : > { %5287 = vmatpush3.bf16.msra.mxu1 %v5685_v32  ;;  %4904 = vmatprep.subr.bf16.mxu0 %v5687_v35  ;;  %v2424_v32 = vrot.slane %v2393_v4, 1  ;;  %v2322_v31 = vshrl.u32 %v6579_v34, 16  ;;  %v2336_v4 = vshrl.u32 %v6622_v54, 16 }
  0xeb   : > { %5288 = vmatprep.subr.bf16.mxu1 %v5688_v28  ;;  %2115 = vmatprep.mubr.bf16.mxu0 %v6149_v22  ;;  %v920_v22 = vsel %vm6485_vm6, 0, %v6483_v43 }
  0xec   : > { %5290 = vmatprep.mubr.bf16.mxu1 %v6341_v41  ;;  %v5694_v41 = vld [vmem:[%s7217_s3 + $0x48] sm:$0xff]   ;;  %v1007_v53 = vshrl.u32 %v920_v22, 16  ;;  %v1010_v59 = vshll.u32 %v920_v22, 16  ;;  %v2425_v22 = vsel %vm1076_vm5, %v2423_v21, %v2424_v32  ;;  %v5711_v32 = vld [vmem:[%s7217_s3 + $0x150] sm:$0xff]  }
  0xed   : > { %4905 = vmatpush3.bf16.msra.mxu0 %v5689_v36  ;;  %v6662_v21 = vld [vmem:[%s6448_s8 + $0x38] sm:$0xff] }
  0xee   : > { %5289 = vmatpush3.bf16.msra.mxu1 %v5688_v28  ;;  %4970 = vmatprep.subr.bf16.mxu0 %v5690_v29  ;;  %v1009_v58 = vrot.slane %v1007_v53, 7  ;;  %v2306_v28 = vor.u32 %v2304_v9, %v2303_v15  ;;  %v2394_v29 = vsel %vm6131_vm4, %v2303_v15, 0  ;;  %v2325_v53 = vshll.u32 %v6579_v34, 16 }
  0xef   : > { %5306 = vmatprep.subr.bf16.mxu1 %v5691_v42 }
  0xf0   : > { %2116 = vmatmul.mubr.bf16.vlgmr.msra.gmra.mrb[48].mxu0 %v6187_v37  ;;  %v5698_v37 = vld [vmem:[%s7217_s3 + $0x50] sm:$0xff]   ;;  %v1012_v3 = vor.u32 %v1010_v59, %v1009_v58  ;;  %v6599_v38 = vsel %vm6131_vm4, 0, %v2306_v28 }
  0xf1   : > { %5291 = vmatmul.mubr.bf16.vlgmr.msra.gmra.mrb[32].mxu1 %v6360_v46  ;;  %4971 = vmatpush3.bf16.msra.mxu0 %v5692_v45  ;;  %v5695_v46 = vld [vmem:[%s7217_s3 + $0x90] sm:$0xff]   ;;  %v2318_v45 = vshll.u32 %v6571_v26, 16 }
  0xf2   : > { %5307 = vmatpush3.bf16.msra.mxu1 %v5691_v42  ;;  %2123 = vmatprep.mubr.bf16.mxu0 %v6156_v27  ;;  %v5697_v27 = vld [vmem:[%s7217_s3 + $0x98] sm:$0xff]  }
  0xf3   : > { %5308 = vmatprep.subr.bf16.mxu1 %v5693_v51  ;;  %5294 = vmatprep.mubr.bf16.mxu1 %v6377_v57  ;;  %v5702_v57 = vld [vmem:[%s7217_s3 + $0x58] sm:$0xff]  }
  0xf4   : > { %4972 = vmatprep.subr.bf16.mxu0 %v5694_v41  ;;  %v5716_v41 = vld [vmem:[%s7217_s3 + $0x30] sm:$0xff]  }
  0xf5   : > { %4973 = vmatpush3.bf16.msra.mxu0 %v5696_v52  ;;  %v2324_v52 = vrot.slane %v2322_v31, 7  ;;  %v5713_v31 = vld [vmem:[%s7217_s3 + $0x158] sm:$0xff]  }
  0xf6   : > { %5309 = vmatpush3.bf16.msra.mxu1 %v5693_v51  ;;  %4974 = vmatprep.subr.bf16.mxu0 %v5698_v37  ;;  %v6615_v37 = vld [vmem:[%s6448_s8 + $0x28] sm:$0xff] }
  0xf7   : > { %5310 = vmatprep.subr.bf16.mxu1 %v5695_v46 }
  0xf8   : > { %2124 = vmatmul.mubr.bf16.gmra.mrb[52].mxu0 %v6215_v47  ;;  %v5704_v47 = vld [vmem:[%s7217_s3 + $0x18] sm:$0xff]  }
  0xf9   : > { %5295 = vmatmul.mubr.bf16.gmra.mrb[36].mxu1 %v6393_v63  ;;  %2131 = vmatprep.mubr.bf16.mxu0 %v6193_v40  ;;  %v1055_v40 = vsel %vm6131_vm4, %v1009_v58, 0  ;;  %v2308_v63 = vshrl.u32 %v6533_v1, 16 }
  0xfa   : > { %5311 = vmatpush3.bf16.msra.mxu1 %v5695_v46  ;;  %5298 = vmatprep.mubr.bf16.mxu1 %v6414_v12  ;;  %v6559_v12 = vsel %vm6131_vm4, 0, %v1012_v3  ;;  %v1105_v35 = vrot.slane %v1055_v40, 1  ;;  %v5718_v46 = vld [vmem:[%s7217_s3 + $0x78] sm:$0xff]   ;;  %v2327_v3 = vor.u32 %v2325_v53, %v2324_v52 }
  0xfb   : > { %5312 = vmatprep.subr.bf16.mxu1 %v5697_v27  ;;  %4975 = vmatpush3.bf16.msra.mxu0 %v5700_v56  ;;  %v2310_v23 = vrot.slane %v2308_v63, 7  ;;  %v5707_v56 = vld [vmem:[%s7217_s3 + $0x140] sm:$0xff]   ;;  %v5709_v63 = vld [vmem:[%s7217_s3 + $0x148] sm:$0xff]  }
  0xfc   : > { %4976 = vmatprep.subr.bf16.mxu0 %v5702_v57  ;;  %v6656_v15 = vsel %vm6131_vm4, 0, %v2327_v3  ;;  %v6762_v3 = vld [vmem:[%s6448_s8 + $0x40] sm:$0xff] }
  0xfd   : > { %v2313_v36 = vor.u32 %v2311_v25, %v2310_v23  ;;  %v2395_v51 = vsel %vm6131_vm4, %v2310_v23, 0  ;;  %v2338_v23 = vrot.slane %v2336_v4, 7  ;;  %v2339_v25 = vshll.u32 %v6622_v54, 16  ;;  %v5730_v4 = vld [vmem:[%s7217_s3 + $0xc8] sm:$0xff]  }
  0xfe   : > { %5313 = vmatpush3.bf16.msra.mxu1 %v5697_v27  ;;  %v2426_v27 = vrot.slane %v6599_v38, 1  ;;  %v2430_v59 = vrot.slane %v2395_v51, 1 }
  0xff   : > { %5314 = vmatprep.subr.bf16.mxu1 %v5699_v2  ;;  %4977 = vmatpush3.bf16.msra.mxu0 %v5704_v47  ;;  %v6605_v49 = vsel %vm6131_vm4, 0, %v2313_v36  ;;  %v5722_v47 = vld [vmem:[%s7217_s3 + $0x100] sm:$0xff]   ;;  %v2343_v36 = vshrl.u32 %v6662_v21, 16 }
 0x100   : > { %2132 = vmatmul.mubr.bf16.gmra.mrb[56].mxu0 %v6249_v60  ;;  %4978 = vmatprep.subr.bf16.mxu0 %v5706_v8  ;;  %v1104_v60 = vrot.slane %v6559_v12, 1  ;;  %v2429_v58 = vrot.slane %v6605_v49, 1 }
 0x101   : > { %5299 = vmatmul.mubr.bf16.gmra.mrb[40].mxu1 %v6430_v24  ;;  %2139 = vmatprep.mubr.bf16.mxu0 %v6221_v50  ;;  %v2315_v24 = vshrl.u32 %v6571_v26, 16  ;;  %v5712_v50 = vld [vmem:[%s7217_s3 + $0x28] sm:$0xff]  }
 0x102   : > { %5315 = vmatpush3.bf16.msra.mxu1 %v5699_v2  ;;  %5302 = vmatprep.mubr.bf16.mxu1 %v6455_v33  ;;  %v5714_v33 = vld [vmem:[%s7217_s3 + $0x70] sm:$0xff]   ;;  %v1106_v42 = vsel %vm1076_vm5, %v1104_v60, %v1105_v35  ;;  %v2329_v2 = vshrl.u32 %v6615_v37, 16  ;;  %v6646_v8 = vsel %vm1076_vm5, %v2429_v58, %v2430_v59  ;;  %v2435_v60 = vrot.slane %v6656_v15, 1 }
 0x103   : > { %5316 = vmatprep.subr.bf16.mxu1 %v5701_v10  ;;  %4979 = vmatpush3.bf16.msra.mxu0 %v5708_v14  ;;  %v2317_v48 = vrot.slane %v2315_v24, 7  ;;  %v2332_v14 = vshll.u32 %v6615_v37, 16  ;;  %v2341_v24 = vor.u32 %v2339_v25, %v2338_v23  ;;  %v5740_v25 = vld [vmem:[%s7217_s3 + $0x118] sm:$0xff]  }
 0x104   : > { %4980 = vmatprep.subr.bf16.mxu0 %v5710_v16  ;;  %v2397_v16 = vsel %vm6131_vm4, %v2324_v52, 0 }
 0x105   : > { %v2320_v57 = vor.u32 %v2318_v45, %v2317_v48  ;;  %v2396_v40 = vsel %vm6131_vm4, %v2317_v48, 0  ;;  %v2436_v35 = vrot.slane %v2397_v16, 1  ;;  %v6692_v45 = vsel %vm6131_vm4, 0, %v2341_v24 }
 0x106   : > { %5317 = vmatpush3.bf16.msra.mxu1 %v5701_v10  ;;  %v2331_v10 = vrot.slane %v2329_v2, 7  ;;  %v5723_v2 = vld [vmem:[%s7217_s3 + $0x1c0] sm:$0xff]  }
 0x107   : > { %5318 = vmatprep.subr.bf16.mxu1 %v5703_v30  ;;  %4981 = vmatpush3.bf16.msra.mxu0 %v5712_v50  ;;  %v6650_v9 = vsel %vm6131_vm4, 0, %v2320_v57  ;;  %v5719_v57 = vld [vmem:[%s7217_s3 + $0x170] sm:$0xff]  }
 0x108   : > { %2140 = vmatmul.mubr.bf16.gmra.mrb[60].mxu0 %v6271_v5  ;;  %4982 = vmatprep.subr.bf16.mxu0 %v5714_v33  ;;  %v2427_v5 = vrot.slane %v2394_v29, 1  ;;  %v2334_v28 = vor.u32 %v2332_v14, %v2331_v10  ;;  %v2398_v50 = vsel %vm6131_vm4, %v2331_v10, 0  ;;  %v6682_v33 = vsel %vm1076_vm5, %v2435_v60, %v2436_v35  ;;  %v5732_v10 = vld [vmem:[%s7217_s3 + $0x1d8] sm:$0xff]   ;;  %v5736_v14 = vld [vmem:[%s7217_s3 + $0xd0] sm:$0xff]   ;;  %v5746_v35 = vld [vmem:[%s7217_s3 + $0x120] sm:$0xff]  }
 0x109   : > { %5303 = vmatmul.mubr.bf16.gmra.mrb[44].mxu1 %v1106_v42  ;;  %2147 = vmatprep.mubr.bf16.mxu0 %v6236_v55  ;;  %v5720_v55 = vld [vmem:[%s7217_s3 + $0x38] sm:$0xff]   ;;  %v2345_v29 = vrot.slane %v2343_v36, 7  ;;  %v2346_v42 = vshll.u32 %v6662_v21, 16  ;;  %v2439_v48 = vrot.slane %v2398_v50, 1  ;;  %v5738_v36 = vld [vmem:[%s7217_s3 + $0x1e8] sm:$0xff]  }
 0x10a   : > { %5319 = vmatpush3.bf16.msra.mxu1 %v5703_v30  ;;  %5322 = vmatprep.mubr.bf16.mxu1 %v2425_v22  ;;  %v6638_v6 = vsel %vm1076_vm5, %v2426_v27, %v2427_v5  ;;  %v2433_v30 = vrot.slane %v2396_v40, 1  ;;  %v2399_v22 = vsel %vm6131_vm4, %v2338_v23, 0  ;;  %v2350_v40 = vshrl.u32 %v6762_v3, 16  ;;  %v5742_v60 = vld [vmem:[%s7217_s3 + $0xd8] sm:$0xff]  }
 0x10b   : > { %5320 = vmatprep.subr.bf16.mxu1 %v5705_v39  ;;  %4983 = vmatpush3.bf16.msra.mxu0 %v5716_v41  ;;  %v2441_v41 = vrot.slane %v6692_v45, 1  ;;  %v2442_v52 = vrot.slane %v2399_v22, 1  ;;  %v2348_v53 = vor.u32 %v2346_v42, %v2345_v29  ;;  %v2353_v23 = vshll.u32 %v6762_v3, 16  ;;  %v5739_v42 = vld [vmem:[%s7217_s3 + $0x1a8] sm:$0xff]  }
 0x10c   : > { %4984 = vmatprep.subr.bf16.mxu0 %v5718_v46  ;;  %v2352_v16 = vrot.slane %v2350_v40, 7 }
 0x10d   : > { %v6713_v27 = vsel %vm1076_vm5, %v2441_v41, %v2442_v52  ;;  %v6717_v5 = vsel %vm6131_vm4, 0, %v2348_v53  ;;  %v5752_v41 = vld [vmem:[%s7217_s3 + $0x130] sm:$0xff]  }
 0x10e   : > { %5321 = vmatpush3.bf16.msra.mxu1 %v5705_v39  ;;  %v6686_v39 = vsel %vm6131_vm4, 0, %v2334_v28  ;;  %v2444_v58 = vrot.slane %v6717_v5, 1  ;;  %v5737_v28 = vld [vmem:[%s7217_s3 + $0x1a0] sm:$0xff]   ;;  %v2401_v50 = vsel %vm6131_vm4, %v2352_v16, 0  ;;  %v5743_v53 = vld [vmem:[%s7217_s3 + $0x1b0] sm:$0xff]  }
 0x10f   : > { %5338 = vmatprep.subr.bf16.mxu1 %v5707_v56  ;;  %4985 = vmatpush3.bf16.msra.mxu0 %v5720_v55  ;;  %v2438_v51 = vrot.slane %v6686_v39, 1  ;;  %v5724_v55 = vld [vmem:[%s7217_s3 + $0xc0] sm:$0xff]  }
 0x110   : > { %2148 = vmatmul.mubr.bf16.gmra.mrb[64].mxu0 %v6291_v11  ;;  %5050 = vmatprep.subr.bf16.mxu0 %v5722_v47  ;;  %v2432_v11 = vrot.slane %v6650_v9, 1  ;;  %v5727_v47 = vld [vmem:[%s7217_s3 + $0x188] sm:$0xff]  }
 0x111   : > { %5323 = vmatmul.mubr.bf16.vlgmr.msra.gmra.mrb[32].mxu1 %v6638_v6  ;;  %2155 = vmatprep.mubr.bf16.mxu0 %v6279_v7  ;;  %v6705_v46 = vsel %vm1076_vm5, %v2438_v51, %v2439_v48  ;;  %v2448_v51 = vrot.slane %v2401_v50, 1  ;;  %v5741_v48 = vld [vmem:[%s7217_s3 + $0x1f0] sm:$0xff]  }
 0x112   : > { %5339 = vmatpush3.bf16.msra.mxu1 %v5707_v56  ;;  %5326 = vmatprep.mubr.bf16.mxu1 %v6646_v8  ;;  %v6674_v7 = vsel %vm1076_vm5, %v2432_v11, %v2433_v30  ;;  %v2400_v56 = vsel %vm6131_vm4, %v2345_v29, 0  ;;  %v5733_v11 = vld [vmem:[%s7217_s3 + $0x198] sm:$0xff]   ;;  %v5735_v30 = vld [vmem:[%s7217_s3 + $0x1e0] sm:$0xff]   ;;  %v5749_v29 = vld [vmem:[%s7217_s3 + $0x128] sm:$0xff]  }
 0x113   : > { %5340 = vmatprep.subr.bf16.mxu1 %v5709_v63  ;;  %v2445_v59 = vrot.slane %v2400_v56, 1  ;;  %v5753_v56 = vld [vmem:[%s7217_s3 + $0xf0] sm:$0xff]  }
 0x116   : > { %5341 = vmatpush3.bf16.msra.mxu1 %v5709_v63  ;;  %v5731_v63 = vld [vmem:[%s7217_s3 + $0x190] sm:$0xff]  }
 0x117   : > { %5342 = vmatprep.subr.bf16.mxu1 %v5711_v32 }
 0x118   : > { %2156 = vmatmul.mubr.bf16.gmra.mrb[68].mxu0 %v6307_v19  ;;  %v5715_v19 = vld [vmem:[%s7217_s3 + $0x160] sm:$0xff]  }
 0x119   : > { %5327 = vmatmul.mubr.bf16.gmra.mrb[36].mxu1 %v6674_v7  ;;  %2163 = vmatprep.mubr.bf16.mxu0 %v6296_v13  ;;  %v5717_v13 = vld [vmem:[%s7217_s3 + $0x168] sm:$0xff]  }
 0x11a   : > { %5343 = vmatpush3.bf16.msra.mxu1 %v5711_v32  ;;  %5330 = vmatprep.mubr.bf16.mxu1 %v6682_v33  ;;  %v2355_v32 = vor.u32 %v2353_v23, %v2352_v16 }
 0x11b   : > { %5344 = vmatprep.subr.bf16.mxu1 %v5713_v31 }
 0x11c   : > { %v6817_v24 = vsel %vm6131_vm4, 0, %v2355_v32 }
 0x11d   : > { %v2447_v22 = vrot.slane %v6817_v24, 1 }
 0x11e   : > { %5345 = vmatpush3.bf16.msra.mxu1 %v5713_v31  ;;  %v5747_v31 = vld [vmem:[%s7217_s3 + $0xe0] sm:$0xff]  }
 0x11f   : > { %5346 = vmatprep.subr.bf16.mxu1 %v5715_v19  ;;  %v6845_v52 = vsel %vm1076_vm5, %v2447_v22, %v2448_v51 }
 0x120   : > { %2164 = vmatmul.mubr.bf16.gmra.mrb[72].mxu0 %v6326_v20  ;;  %v6733_v20 = vsel %vm1076_vm5, %v2444_v58, %v2445_v59  ;;  %v5755_v58 = vld [vmem:[%s7217_s3 + $0x138] sm:$0xff]  }
 0x121   : > { %5331 = vmatmul.mubr.bf16.gmra.mrb[40].mxu1 %v6705_v46  ;;  %4463 = vmatprep.mubr.msk.bf16.mxu0 %vm4462_vm7, %v6483_v43  ;;  %v5721_v43 = vld [vmem:[%s7217_s3 + $0x178] sm:$0xff]  }
 0x122   : > { %5347 = vmatpush3.bf16.msra.mxu1 %v5715_v19  ;;  %5334 = vmatprep.mubr.bf16.mxu1 %v6713_v27  ;;  %v5750_v19 = vld [vmem:[%s7217_s3 + $0xe8] sm:$0xff]   ;;  %v5745_v59 = vld [vmem:[%s7217_s3 + $0x1b8] sm:$0xff]  }
 0x123   : > { %5348 = vmatprep.subr.bf16.mxu1 %v5717_v13 }
 0x126   : > { %5349 = vmatpush3.bf16.msra.mxu1 %v5717_v13  ;;  %v5744_v13 = vld [vmem:[%s7217_s3 + $0x1f8] sm:$0xff]  }
 0x127   : > { %5350 = vmatprep.subr.bf16.mxu1 %v5719_v57 }
 0x128   : > { %2172 = vmatmul.mubr.bf16.gmra.mrb[76].mxu0 %v6559_v12  ;;  %v5725_v12 = vld [vmem:[%s7217_s3 + $0x180] sm:$0xff]  }
 0x129   : > { %5335 = vmatmul.mubr.bf16.gmra.mrb[44].mxu1 %v6733_v20  ;;  %4489 = vmatprep.mubr.msk.bf16.mxu0 %vm4388_vm2, %v6451_v18  ;;  %v5728_v18 = vld [vmem:[%s7217_s3 + $0x108] sm:$0xff]  }
 0x12a   : > { %5351 = vmatpush3.bf16.msra.mxu1 %v5719_v57  ;;  %5354 = vmatprep.mubr.bf16.mxu1 %v6638_v6  ;;  %v5729_v6 = vld [vmem:[%s7217_s3 + $0x1d0] sm:$0xff]   ;;  %v5748_v57 = vld [vmem:[%s7217_s3 + $0x200] sm:$0xff]  }
 0x12b   : > { %5352 = vmatprep.subr.bf16.mxu1 %v5721_v43 }
 0x12e   : > { %5353 = vmatpush3.bf16.msra.mxu1 %v5721_v43  ;;  %v5756_v43 = vld [vmem:[%s7217_s3 + $0xf8] sm:$0xff]  }
 0x12f   : > { %5130 = vmatprep.subr.bf16.mxu1 %v5723_v2  ;;  %v5751_v2 = vld [vmem:[%s7217_s3 + $0x208] sm:$0xff]  }
 0x130   : > { %2688 = vmatmul.mubr.bf16.vlgmr.msra.gmra.mrb[80].mxu0 %v6530_v62  ;;  %v5734_v62 = vld [vmem:[%s7217_s3 + $0x110] sm:$0xff]  }
 0x131   : > { %5355 = vmatmul.mubr.bf16.vlgmr.msra.gmra.mrb[32].mxu1 %v6646_v8  ;;  %5051 = vmatpush3.bf16.msra.mxu0 %v5724_v55  ;;  %v5754_v55 = vld [vmem:[%s7217_s3 + $0x210] sm:$0xff]  }
 0x132   : > { %5131 = vmatpush3.bf16.msra.mxu1 %v5725_v12  ;;  %2695 = vmatprep.mubr.bf16.mxu0 %v6525_v61  ;;  %v5757_v12 = vld [vmem:[%s7217_s3 + $0x218] sm:$0xff]  }
 0x133   : > { %5132 = vmatprep.subr.bf16.mxu1 %v5726_v0  ;;  %5358 = vmatprep.mubr.bf16.mxu1 %v6674_v7  ;;  %v5758_v0 = vld [vmem:[%s7217_s3 + $0x220] sm:$0xff]  }
 0x134   : > { %5052 = vmatprep.subr.bf16.mxu0 %v5728_v18  ;;  %v5759_v18 = vld [vmem:[%s7217_s3 + $0x228] sm:$0xff]  }
 0x135   : > { %5053 = vmatpush3.bf16.msra.mxu0 %v5730_v4 }
 0x136   : > { %5133 = vmatpush3.bf16.msra.mxu1 %v5727_v47  ;;  %5054 = vmatprep.subr.bf16.mxu0 %v5734_v62  ;;  %v5760_v47 = vld [vmem:[%s7217_s3 + $0x230] sm:$0xff]  }
 0x137   : > { %5134 = vmatprep.subr.bf16.mxu1 %v5729_v6 }
 0x138   : > { %2696 = vmatmul.mubr.bf16.gmra.mrb[84].mxu0 %v6599_v38 }
 0x139   : > { %5359 = vmatmul.mubr.bf16.gmra.mrb[36].mxu1 %v6682_v33  ;;  %2703 = vmatprep.mubr.bf16.mxu0 %v6533_v1 }
 0x13a   : > { %5135 = vmatpush3.bf16.msra.mxu1 %v5731_v63  ;;  %5362 = vmatprep.mubr.bf16.mxu1 %v6705_v46 }
 0x13b   : > { %5136 = vmatprep.subr.bf16.mxu1 %v5732_v10  ;;  %5055 = vmatpush3.bf16.msra.mxu0 %v5736_v14 }
 0x13c   : > { %5056 = vmatprep.subr.bf16.mxu0 %v5740_v25 }
 0x13e   : > { %5137 = vmatpush3.bf16.msra.mxu1 %v5733_v11 }
 0x13f   : > { %5138 = vmatprep.subr.bf16.mxu1 %v5735_v30  ;;  %5057 = vmatpush3.bf16.msra.mxu0 %v5742_v60  ;;  %v5761_v30 = vld [vmem:[%s7217_s3 + $0x238] sm:$0xff]  }
 0x140   : > { %2704 = vmatmul.mubr.bf16.gmra.mrb[88].mxu0 %v6605_v49  ;;  %5058 = vmatprep.subr.bf16.mxu0 %v5746_v35 }
 0x141   : > { %5363 = vmatmul.mubr.bf16.gmra.mrb[40].mxu1 %v6713_v27  ;;  %2711 = vmatprep.mubr.bf16.mxu0 %v6571_v26 }
 0x142   : > { %5139 = vmatpush3.bf16.msra.mxu1 %v5737_v28  ;;  %5366 = vmatprep.mubr.bf16.mxu1 %v6733_v20 }
 0x143   : > { %5140 = vmatprep.subr.bf16.mxu1 %v5738_v36  ;;  %5059 = vmatpush3.bf16.msra.mxu0 %v5747_v31 }
 0x144   : > { %5060 = vmatprep.subr.bf16.mxu0 %v5749_v29 }
 0x146   : > { %5141 = vmatpush3.bf16.msra.mxu1 %v5739_v42 }
 0x147   : > { %5142 = vmatprep.subr.bf16.mxu1 %v5741_v48  ;;  %5061 = vmatpush3.bf16.msra.mxu0 %v5750_v19 }
 0x148   : > { %2712 = vmatmul.mubr.bf16.gmra.mrb[92].mxu0 %v6650_v9  ;;  %5062 = vmatprep.subr.bf16.mxu0 %v5752_v41 }
 0x149   : > { %5367 = vmatmul.mubr.bf16.gmra.mrb[44].mxu1 %v6845_v52  ;;  %2719 = vmatprep.mubr.bf16.mxu0 %v6579_v34 }
 0x14a   : > { %5143 = vmatpush3.bf16.msra.mxu1 %v5743_v53  ;;  %3493 = vmatprep.mubr.bf16.mxu1 %v6533_v1 }
 0x14b   : > { %5144 = vmatprep.subr.bf16.mxu1 %v5744_v13  ;;  %5063 = vmatpush3.bf16.msra.mxu0 %v5753_v56  ;;  %v932_v13 = vld [vmem:[%s6448_s8 + $0x48] sm:$0xff] }
 0x14c   : > { %5064 = vmatprep.subr.bf16.mxu0 %v5755_v58 }
 0x14e   : > { %5145 = vmatpush3.bf16.msra.mxu1 %v5745_v59 }
 0x14f   : > { %5370 = vmatprep.subr.bf16.mxu1 %v5748_v57  ;;  %5065 = vmatpush3.bf16.msra.mxu0 %v5756_v43 }
 0x150   : > { %2720 = vmatmul.mubr.bf16.gmra.mrb[96].mxu0 %v6656_v15 }
 0x151   : > { %3494 = vmatmul.mubr.bf16.vlgmr.msra.gmra.mrb[48].mxu1 %v6605_v49  ;;  %2727 = vmatprep.mubr.bf16.mxu0 %v6615_v37 }
 0x152   : > { %5371 = vmatpush3.bf16.msra.mxu1 %v5748_v57  ;;  %3501 = vmatprep.mubr.bf16.mxu1 %v6571_v26 }
 0x153   : > { %5372 = vmatprep.subr.bf16.mxu1 %v5751_v2 }
 0x156   : > { %5373 = vmatpush3.bf16.msra.mxu1 %v5751_v2 }
 0x157   : > { %5374 = vmatprep.subr.bf16.mxu1 %v5754_v55 }
 0x158   : > { %2728 = vmatmul.mubr.bf16.gmra.mrb[100].mxu0 %v6686_v39 }
 0x159   : > { %3502 = vmatmul.mubr.bf16.gmra.mrb[52].mxu1 %v6650_v9  ;;  %2735 = vmatprep.mubr.bf16.mxu0 %v6622_v54 }
 0x15a   : > { %3509 = vmatprep.mubr.bf16.mxu1 %v6579_v34  ;;  %5375 = vmatpush3.bf16.msra.mxu1 %v5754_v55 }
 0x15b   : > { %5376 = vmatprep.subr.bf16.mxu1 %v5757_v12 }
 0x15e   : > { %5377 = vmatpush3.bf16.msra.mxu1 %v5757_v12 }
 0x15f   : > { %5378 = vmatprep.subr.bf16.mxu1 %v5758_v0 }
 0x160   : > { %2736 = vmatmul.mubr.bf16.gmra.mrb[104].mxu0 %v6692_v45 }
 0x161   : > { %3510 = vmatmul.mubr.bf16.gmra.mrb[56].mxu1 %v6656_v15  ;;  %2743 = vmatprep.mubr.bf16.mxu0 %v6662_v21 }
 0x162   : > { %3517 = vmatprep.mubr.bf16.mxu1 %v6615_v37  ;;  %5379 = vmatpush3.bf16.msra.mxu1 %v5758_v0 }
 0x163   : > { %v4746_v4 = vpop.f32.mrb[0].mxu0  ;;  %5380 = vmatprep.subr.bf16.mxu1 %v5759_v18 }
 0x164   : > { %v4826_v62 = vpop.f32.mrb[0].mxu1  ;;  %v4747_v6 = vpop.f32.mrb[1].mxu0 }
 0x165   : > { %v6902_v40 = vadd.f32 %v4747_v6, %v4746_v4  ;;  %v4827_v63 = vpop.f32.mrb[1].mxu1  ;;  %v4749_v10 = vpop.f32.mrb[2].mxu0 }
 0x166   : > { %v6904_v14 = vadd.f32 %v4827_v63, %v4826_v62  ;;  %v4829_v16 = vpop.f32.mrb[2].mxu1  ;;  %v4750_v23 = vpop.f32.mrb[3].mxu0  ;;  %5381 = vmatpush3.bf16.msra.mxu1 %v5759_v18 }
 0x167   : > { %v6906_v25 = vadd.f32 %v4750_v23, %v4749_v10  ;;  %v4830_v11 = vpop.f32.mrb[3].mxu1  ;;  %5382 = vmatprep.subr.bf16.mxu1 %v5760_v47 }
 0x168   : > { %v6911_v32 = vadd.f32 %v4830_v11, %v4829_v16  ;;  %2744 = vmatmul.mubr.bf16.gmra.mrb[108].mxu0 %v6717_v5 }
 0x169   : > { %3518 = vmatmul.mubr.bf16.gmra.mrb[60].mxu1 %v6686_v39  ;;  %3090 = vmatprep.mubr.bf16.mxu0 %v6525_v61 }
 0x16a   : > { %3525 = vmatprep.mubr.bf16.mxu1 %v6622_v54  ;;  %5383 = vmatpush3.bf16.msra.mxu1 %v5760_v47 }
 0x16b   : > { %v4752_v60 = vpop.f32.mrb[4].mxu0  ;;  %5384 = vmatprep.subr.bf16.mxu1 %v5761_v30 }
 0x16c   : > { %v4832_v35 = vpop.f32.mrb[4].mxu1  ;;  %v4753_v28 = vpop.f32.mrb[5].mxu0 }
 0x16d   : > { %v6917_v36 = vadd.f32 %v4753_v28, %v4752_v60  ;;  %v4833_v50 = vpop.f32.mrb[5].mxu1  ;;  %v4755_v31 = vpop.f32.mrb[6].mxu0 }
 0x16e   : > { %v6919_v29 = vadd.f32 %v4833_v50, %v4832_v35  ;;  %v4835_v42 = vpop.f32.mrb[6].mxu1  ;;  %v4756_v22 = vpop.f32.mrb[7].mxu0  ;;  %5385 = vmatpush3.bf16.msra.mxu1 %v5761_v30 }
 0x16f   : > { %v6921_v51 = vadd.f32 %v4756_v22, %v4755_v31  ;;  %v4836_v61 = vpop.f32.mrb[7].mxu1 }
 0x170   : > { %v6923_v48 = vadd.f32 %v4836_v61, %v4835_v42  ;;  %3091 = vmatmul.mubr.bf16.vlgmr.msra.gmra.mrb[112].mxu0 %v6599_v38 }
 0x171   : > { %3526 = vmatmul.mubr.bf16.gmra.mrb[64].mxu1 %v6692_v45  ;;  %3098 = vmatprep.mubr.bf16.mxu0 %v6533_v1  ;;  %v942_v1 = vsel %vm6485_vm6, 0, %v932_v13 }
 0x172   : > { %3533 = vmatprep.mubr.bf16.mxu1 %v6662_v21  ;;  %v2357_v0 = vshrl.u32 %v942_v1, 16  ;;  %v2360_v11 = vshll.u32 %v942_v1, 16 }
 0x173   : > { %v4758_v19 = vpop.f32.mrb[8].mxu0 }
 0x174   : > { %v4838_v41 = vpop.f32.mrb[8].mxu1  ;;  %v4759_v53 = vpop.f32.mrb[9].mxu0 }
 0x175   : > { %v6930_v56 = vadd.f32 %v4759_v53, %v4758_v19  ;;  %v4839_v58 = vpop.f32.mrb[9].mxu1  ;;  %v4761_v59 = vpop.f32.mrb[10].mxu0 }
 0x176   : > { %v6932_v57 = vadd.f32 %v4839_v58, %v4838_v41  ;;  %v4841_v43 = vpop.f32.mrb[10].mxu1  ;;  %v4762_v2 = vpop.f32.mrb[11].mxu0 }
 0x177   : > { %v6934_v55 = vadd.f32 %v4762_v2, %v4761_v59  ;;  %v4842_v38 = vpop.f32.mrb[11].mxu1 }
 0x178   : > { %v6938_v12 = vadd.f32 %v4842_v38, %v4841_v43  ;;  %3099 = vmatmul.mubr.bf16.gmra.mrb[116].mxu0 %v6605_v49  ;;  %v6948_v49 = vrot.slane %v2357_v0, 7 }
 0x179   : > { %3534 = vmatmul.mubr.bf16.gmra.mrb[68].mxu1 %v6717_v5  ;;  %3106 = vmatprep.mubr.bf16.mxu0 %v6571_v26 }
 0x17a   : > { %3541 = vmatprep.mubr.bf16.mxu1 %v6762_v3  ;;  %v2362_v35 = vor.u32 %v2360_v11, %v6948_v49 }
 0x17b   : > { %v4764_v18 = vpop.f32.mrb[12].mxu0 }
 0x17c   : > { %v4844_v4 = vpop.f32.mrb[12].mxu1  ;;  %v4765_v47 = vpop.f32.mrb[13].mxu0 }
 0x17d   : > { %v6944_v62 = vadd.f32 %v4765_v47, %v4764_v18  ;;  %v4845_v6 = vpop.f32.mrb[13].mxu1  ;;  %v4767_v63 = vpop.f32.mrb[14].mxu0 }
 0x17e   : > { %v6946_v10 = vadd.f32 %v4845_v6, %v4844_v4  ;;  %v4847_v16 = vpop.f32.mrb[14].mxu1  ;;  %v4768_v23 = vpop.f32.mrb[15].mxu0 }
 0x17f   : > { %v6950_v30 = vadd.f32 %v4768_v23, %v4767_v63  ;;  %v4848_v26 = vpop.f32.mrb[15].mxu1 }
 0x180   : > { %v6952_v60 = vadd.f32 %v4848_v26, %v4847_v16  ;;  %3107 = vmatmul.mubr.bf16.gmra.mrb[120].mxu0 %v6650_v9 }
 0x181   : > { %3542 = vmatmul.mubr.bf16.gmra.mrb[72].mxu1 %v6817_v24  ;;  %3114 = vmatprep.mubr.bf16.mxu0 %v6579_v34  ;;  %v6967_v34 = vsel %vm6131_vm4, 0, %v2362_v35 }
 0x182   : > { %4635 = vmatprep.mubr.msk.bf16.mxu1 %vm4462_vm7, %v932_v13 }
 0x183   : > { %v4770_v28 = vpop.f32.mrb[16].mxu0 }
 0x184   : > { %v4850_v50 = vpop.f32.mrb[16].mxu1  ;;  %v4771_v31 = vpop.f32.mrb[17].mxu0 }
 0x185   : > { %v6961_v42 = vadd.f32 %v4771_v31, %v4770_v28  ;;  %v4851_v22 = vpop.f32.mrb[17].mxu1  ;;  %v4773_v61 = vpop.f32.mrb[18].mxu0 }
 0x186   : > { %v6963_v19 = vadd.f32 %v4851_v22, %v4850_v50  ;;  %v4853_v9 = vpop.f32.mrb[18].mxu1  ;;  %v4774_v41 = vpop.f32.mrb[19].mxu0 }
 0x187   : > { %v6969_v44 = vadd.f32 %v4774_v41, %v4773_v61  ;;  %v4854_v53 = vpop.f32.mrb[19].mxu1 }
 0x188   : > { %v6971_v13 = vadd.f32 %v4854_v53, %v4853_v9  ;;  %3115 = vmatmul.mubr.bf16.gmra.mrb[124].mxu0 %v6656_v15 }
 0x189   : > { %3550 = vmatmul.mubr.bf16.gmra.mrb[76].mxu1 %v6967_v34  ;;  %3122 = vmatprep.mubr.bf16.mxu0 %v6615_v37 }
 0x18a   : > { %5386 = vmatprep.mubr.bf16.mxu1 %v6646_v8 }
 0x18b   : > { %v4776_v58 = vpop.f32.mrb[20].mxu0 }
 0x18c   : > { %v4856_v59 = vpop.f32.mrb[20].mxu1  ;;  %v4777_v43 = vpop.f32.mrb[21].mxu0 }
 0x18d   : > { %v6977_v2 = vadd.f32 %v4777_v43, %v4776_v58  ;;  %v4857_v38 = vpop.f32.mrb[21].mxu1  ;;  %v4779_v1 = vpop.f32.mrb[22].mxu0 }
 0x18e   : > { %v6979_v0 = vadd.f32 %v4857_v38, %v4856_v59  ;;  %v4859_v18 = vpop.f32.mrb[22].mxu1  ;;  %v4780_v4 = vpop.f32.mrb[23].mxu0 }
 0x18f   : > { %v6981_v47 = vadd.f32 %v4780_v4, %v4779_v1  ;;  %v4860_v15 = vpop.f32.mrb[23].mxu1 }
 0x190   : > { %v6983_v6 = vadd.f32 %v4860_v15, %v4859_v18  ;;  %3123 = vmatmul.mubr.bf16.gmra.mrb[128].mxu0 %v6686_v39 }
 0x191   : > { %5387 = vmatmul.mubr.bf16.vlgmr.msra.gmra.mrb[32].mxu1 %v6674_v7  ;;  %3130 = vmatprep.mubr.bf16.mxu0 %v6622_v54 }
 0x192   : > { %5390 = vmatprep.mubr.bf16.mxu1 %v6682_v33 }
 0x193   : > { %v4782_v37 = vpop.f32.mrb[24].mxu0 }
 0x194   : > { %v4862_v8 = vpop.f32.mrb[24].mxu1  ;;  %v4783_v63 = vpop.f32.mrb[25].mxu0 }
 0x195   : > { %v6989_v16 = vadd.f32 %v4783_v63, %v4782_v37  ;;  %v4863_v23 = vpop.f32.mrb[25].mxu1  ;;  %v4785_v11 = vpop.f32.mrb[26].mxu0 }
 0x196   : > { %v6991_v26 = vadd.f32 %v4863_v23, %v4862_v8  ;;  %v4865_v35 = vpop.f32.mrb[26].mxu1  ;;  %v4786_v28 = vpop.f32.mrb[27].mxu0 }
 0x197   : > { %v6993_v50 = vadd.f32 %v4786_v28, %v4785_v11  ;;  %v4866_v39 = vpop.f32.mrb[27].mxu1 }
 0x198   : > { %v6995_v31 = vadd.f32 %v4866_v39, %v4865_v35  ;;  %3131 = vmatmul.mubr.bf16.gmra.mrb[132].mxu0 %v6692_v45  ;;  %v2402_v45 = vsel %vm6131_vm4, %v6948_v49, 0 }
 0x199   : > { %5391 = vmatmul.mubr.bf16.gmra.mrb[36].mxu1 %v6705_v46  ;;  %3138 = vmatprep.mubr.bf16.mxu0 %v6662_v21  ;;  %v2450_v21 = vrot.slane %v6967_v34, 1 }
 0x19a   : > { %5394 = vmatprep.mubr.bf16.mxu1 %v6713_v27  ;;  %v2451_v27 = vrot.slane %v2402_v45, 1 }
 0x19b   : > { %v4788_v54 = vpop.f32.mrb[28].mxu0 }
 0x19c   : > { %v4868_v7 = vpop.f32.mrb[28].mxu1  ;;  %v4789_v33 = vpop.f32.mrb[29].mxu0 }
 0x19d   : > { %v4790_v22 = vadd.f32 %v4789_v33, %v4788_v54  ;;  %v4869_v61 = vpop.f32.mrb[29].mxu1  ;;  %v4791_v9 = vpop.f32.mrb[30].mxu0 }
 0x19e   : > { %v4870_v41 = vadd.f32 %v4869_v61, %v4868_v7  ;;  %v4871_v53 = vpop.f32.mrb[30].mxu1  ;;  %v4792_v58 = vpop.f32.mrb[31].mxu0 }
 0x19f   : > { %v4793_v59 = vadd.f32 %v4792_v58, %v4791_v9  ;;  %v4872_v43 = vpop.f32.mrb[31].mxu1 }
 0x1a0   : > { %v4873_v46 = vadd.f32 %v4872_v43, %v4871_v53  ;;  %3139 = vmatmul.mubr.bf16.gmra.mrb[136].mxu0 %v6717_v5 }
 0x1a1   : > { %5395 = vmatmul.mubr.bf16.gmra.mrb[40].mxu1 %v6733_v20  ;;  %3146 = vmatprep.mubr.bf16.mxu0 %v6762_v3  ;;  %v2452_v20 = vsel %vm1076_vm5, %v2450_v21, %v2451_v27 }
 0x1a2   : > { %5398 = vmatprep.mubr.bf16.mxu1 %v6845_v52 }
 0x1a3   : > { %v5228_v38 = vpop.f32.mrb[32].mxu0 }
 0x1a4   : > { %v1498_v1 = vadd.f32 %v5228_v38, %v6917_v36  ;;  %v1489_v18 = vpop.f32.mrb[33].mxu0 }
 0x1a5   : > { %v1490_v4 = vadd.f32 %v6902_v40, %v1489_v18  ;;  %v5229_v17 = vpop.f32.mrb[34].mxu0 }
 0x1a6   : > { %v1739_v49 = vadd.f32 %v6919_v29, %v1498_v1  ;;  %v1501_v5 = vadd.f32 %v5229_v17, %v6921_v51  ;;  %v1492_v15 = vpop.f32.mrb[35].mxu0 }
 0x1a7   : > { %v1731_v3 = vadd.f32 %v6904_v14, %v1490_v4  ;;  %v1493_v34 = vadd.f32 %v6906_v25, %v1492_v15 }
 0x1a8   : > { %v1742_v52 = vadd.f32 %v6923_v48, %v1501_v5  ;;  %3147 = vmatmul.mubr.bf16.gmra.mrb[140].mxu0 %v6817_v24 }
 0x1a9   : > { %v1734_v36 = vadd.f32 %v6911_v32, %v1493_v34  ;;  %5399 = vmatmul.mubr.bf16.gmra.mrb[44].mxu1 %v2452_v20 }
 0x1ab   : > { %v5232_v40 = vpop.f32.mrb[36].mxu0 }
 0x1ac   : > { %v1514_v37 = vadd.f32 %v5232_v40, %v6944_v62  ;;  %v1505_v29 = vpop.f32.mrb[37].mxu0 }
 0x1ad   : > { %v1506_v51 = vadd.f32 %v6930_v56, %v1505_v29  ;;  %v5233_v8 = vpop.f32.mrb[38].mxu0 }
 0x1ae   : > { %v1755_v63 = vadd.f32 %v6946_v10, %v1514_v37  ;;  %v1517_v14 = vadd.f32 %v5233_v8, %v6950_v30  ;;  %v1508_v23 = vpop.f32.mrb[39].mxu0 }
 0x1af   : > { %v1747_v25 = vadd.f32 %v6932_v57, %v1506_v51  ;;  %v1509_v48 = vadd.f32 %v6934_v55, %v1508_v23 }
 0x1b0   : > { %v1758_v24 = vadd.f32 %v6952_v60, %v1517_v14 }
 0x1b1   : > { %v1750_v32 = vadd.f32 %v6938_v12, %v1509_v48 }
 0x1b3   : > { %v5236_v11 = vpop.f32.mrb[40].mxu0 }
 0x1b4   : > { %v1530_v62 = vadd.f32 %v5236_v11, %v6977_v2  ;;  %v1521_v35 = vpop.f32.mrb[41].mxu0 }
 0x1b5   : > { %v1522_v56 = vadd.f32 %v6961_v42, %v1521_v35  ;;  %v5237_v28 = vpop.f32.mrb[42].mxu0 }
 0x1b6   : > { %v7030_v10 = vadd.f32 %v6979_v0, %v1530_v62  ;;  %v1533_v30 = vadd.f32 %v5237_v28, %v6981_v47  ;;  %v1524_v39 = vpop.f32.mrb[43].mxu0 }
 0x1b7   : > { %v1763_v57 = vadd.f32 %v6963_v19, %v1522_v56  ;;  %v1525_v55 = vadd.f32 %v6969_v44, %v1524_v39 }
 0x1b8   : > { %v1774_v60 = vadd.f32 %v6983_v6, %v1533_v30 }
 0x1b9   : > { %v1766_v12 = vadd.f32 %v6971_v13, %v1525_v55 }
 0x1bb   : > { %v5240_v54 = vpop.f32.mrb[44].mxu0 }
 0x1bc   : > { %v1546_v2 = vadd.f32 %v5240_v54, %v4790_v22  ;;  %v1537_v7 = vpop.f32.mrb[45].mxu0 }
 0x1bd   : > { %v1538_v42 = vadd.f32 %v6989_v16, %v1537_v7  ;;  %v5241_v33 = vpop.f32.mrb[46].mxu0 }
 0x1be   : > { %v7038_v61 = vadd.f32 %v4870_v41, %v1546_v2  ;;  %v1549_v0 = vadd.f32 %v5241_v33, %v4793_v59  ;;  %v1540_v9 = vpop.f32.mrb[47].mxu0 }
 0x1bf   : > { %v1779_v47 = vadd.f32 %v6991_v26, %v1538_v42  ;;  %v1541_v19 = vadd.f32 %v6993_v50, %v1540_v9 }
 0x1c0   : > { %v7042_v53 = vadd.f32 %v4873_v46, %v1549_v0 }
 0x1c1   : > { %v1782_v44 = vadd.f32 %v6995_v31, %v1541_v19 }
 0x1c3   : > { %v4906_v6 = vpop.f32.mrb[48].mxu0 }
 0x1c4   : > { %v4907_v13 = vpop.f32.mrb[49].mxu0 }
 0x1c5   : > { %v4908_v58 = vadd.f32 %v4907_v13, %v4906_v6  ;;  %v4909_v22 = vpop.f32.mrb[50].mxu0 }
 0x1c6   : > { %v4910_v43 = vpop.f32.mrb[51].mxu0 }
 0x1c7   : > { %v7045_v45 = vadd.f32 %v4908_v58, %v1731_v3  ;;  %v4911_v16 = vadd.f32 %v4910_v43, %v4909_v22 }
 0x1c9   : > { %v7047_v41 = vadd.f32 %v4911_v16, %v1734_v36 }
 0x1cb   : > { %v4912_v59 = vpop.f32.mrb[52].mxu0 }
 0x1cc   : > { %v4913_v21 = vpop.f32.mrb[53].mxu0 }
 0x1cd   : > { %v4914_v27 = vadd.f32 %v4913_v21, %v4912_v59  ;;  %v4915_v26 = vpop.f32.mrb[54].mxu0 }
 0x1ce   : > { %v4916_v38 = vpop.f32.mrb[55].mxu0 }
 0x1cf   : > { %v7049_v50 = vadd.f32 %v4914_v27, %v1739_v49  ;;  %v4917_v46 = vadd.f32 %v4916_v38, %v4915_v26 }
 0x1d1   : > { %v7051_v1 = vadd.f32 %v4917_v46, %v1742_v52 }
 0x1d3   : > { %v4918_v31 = vpop.f32.mrb[56].mxu0 }
 0x1d4   : > { %v4919_v18 = vpop.f32.mrb[57].mxu0 }
 0x1d5   : > { %v4920_v4 = vadd.f32 %v4919_v18, %v4918_v31  ;;  %v4921_v17 = vpop.f32.mrb[58].mxu0 }
 0x1d6   : > { %v4922_v5 = vpop.f32.mrb[59].mxu0 }
 0x1d7   : > { %v7053_v15 = vadd.f32 %v4920_v4, %v1747_v25  ;;  %v4923_v20 = vadd.f32 %v4922_v5, %v4921_v17 }
 0x1d9   : > { %v7055_v3 = vadd.f32 %v4923_v20, %v1750_v32 }
 0x1db   : > { %v4924_v34 = vpop.f32.mrb[60].mxu0 }
 0x1dc   : > { %v4925_v36 = vpop.f32.mrb[61].mxu0 }
 0x1dd   : > { %v4926_v40 = vadd.f32 %v4925_v36, %v4924_v34  ;;  %v4927_v37 = vpop.f32.mrb[62].mxu0 }
 0x1de   : > { %v4928_v29 = vpop.f32.mrb[63].mxu0 }
 0x1df   : > { %v7057_v49 = vadd.f32 %v4926_v40, %v1755_v63  ;;  %v4929_v51 = vadd.f32 %v4928_v29, %v4927_v37 }
 0x1e1   : > { %v7059_v52 = vadd.f32 %v4929_v51, %v1758_v24 }
 0x1e3   : > { %v4930_v8 = vpop.f32.mrb[64].mxu0 }
 0x1e4   : > { %v4931_v14 = vpop.f32.mrb[65].mxu0 }
 0x1e5   : > { %v4932_v23 = vadd.f32 %v4931_v14, %v4930_v8  ;;  %v4933_v48 = vpop.f32.mrb[66].mxu0 }
 0x1e6   : > { %v4934_v11 = vpop.f32.mrb[67].mxu0 }
 0x1e7   : > { %v7061_v25 = vadd.f32 %v4932_v23, %v1763_v57  ;;  %v4935_v62 = vadd.f32 %v4934_v11, %v4933_v48 }
 0x1e9   : > { %v7063_v32 = vadd.f32 %v4935_v62, %v1766_v12 }
 0x1eb   : > { %v4936_v35 = vpop.f32.mrb[68].mxu0 }
 0x1ec   : > { %v4937_v56 = vpop.f32.mrb[69].mxu0 }
 0x1ed   : > { %v4938_v28 = vadd.f32 %v4937_v56, %v4936_v35  ;;  %v4939_v30 = vpop.f32.mrb[70].mxu0 }
 0x1ee   : > { %v4940_v39 = vpop.f32.mrb[71].mxu0 }
 0x1ef   : > { %v7066_v63 = vadd.f32 %v4938_v28, %v7030_v10  ;;  %v4941_v24 = vadd.f32 %v4940_v39, %v4939_v30 }
 0x1f1   : > { %v7068_v55 = vadd.f32 %v4941_v24, %v1774_v60 }
 0x1f3   : > { %v4942_v54 = vpop.f32.mrb[72].mxu0 }
 0x1f4   : > { %v4943_v2 = vpop.f32.mrb[73].mxu0 }
 0x1f5   : > { %v4944_v7 = vadd.f32 %v4943_v2, %v4942_v54  ;;  %v4945_v42 = vpop.f32.mrb[74].mxu0 }
 0x1f6   : > { %v4946_v57 = vpop.f32.mrb[75].mxu0 }
 0x1f7   : > { %v7070_v33 = vadd.f32 %v4944_v7, %v1779_v47  ;;  %v4947_v12 = vadd.f32 %v4946_v57, %v4945_v42 }
 0x1f9   : > { %v7072_v0 = vadd.f32 %v4947_v12, %v1782_v44 }
 0x1fb   : > { %v4948_v9 = vpop.f32.mrb[76].mxu0 }
 0x1fc   : > { %v4949_v19 = vpop.f32.mrb[77].mxu0 }
 0x1fd   : > { %v4950_v6 = vadd.f32 %v4949_v19, %v4948_v9  ;;  %v4951_v13 = vpop.f32.mrb[78].mxu0 }
 0x1fe   : > { %v4952_v58 = vpop.f32.mrb[79].mxu0 }
 0x1ff   : > { %v7075_v10 = vadd.f32 %v4950_v6, %v7038_v61  ;;  %v4953_v60 = vadd.f32 %v4952_v58, %v4951_v13 }
 0x201   : > { %v7078_v22 = vadd.f32 %v4953_v60, %v7042_v53 }
 0x203   : > { %v4986_v43 = vpop.f32.mrb[80].mxu0 }
 0x204   : > { %v4987_v16 = vpop.f32.mrb[81].mxu0 }
 0x205   : > { %v4988_v59 = vadd.f32 %v4987_v16, %v4986_v43  ;;  %v4989_v47 = vpop.f32.mrb[82].mxu0 }
 0x206   : > { %v4990_v21 = vpop.f32.mrb[83].mxu0 }
 0x207   : > { %v7081_v44 = vadd.f32 %v7045_v45, %v4988_v59  ;;  %v4991_v27 = vadd.f32 %v4990_v21, %v4989_v47 }
 0x209   : > { %v7084_v26 = vadd.f32 %v7047_v41, %v4991_v27 }
 0x20b   : > { %v4992_v38 = vpop.f32.mrb[84].mxu0 }
 0x20c   : > { %v4993_v46 = vpop.f32.mrb[85].mxu0 }
 0x20d   : > { %v4994_v61 = vadd.f32 %v4993_v46, %v4992_v38  ;;  %v4995_v31 = vpop.f32.mrb[86].mxu0 }
 0x20e   : > { %v4996_v18 = vpop.f32.mrb[87].mxu0 }
 0x20f   : > { %v7087_v53 = vadd.f32 %v7049_v50, %v4994_v61  ;;  %v4997_v4 = vadd.f32 %v4996_v18, %v4995_v31 }
 0x211   : > { %v7090_v17 = vadd.f32 %v7051_v1, %v4997_v4 }
 0x213   : > { %v4998_v5 = vpop.f32.mrb[88].mxu0 }
 0x214   : > { %v4999_v20 = vpop.f32.mrb[89].mxu0 }
 0x215   : > { %v5000_v45 = vadd.f32 %v4999_v20, %v4998_v5  ;;  %v5001_v34 = vpop.f32.mrb[90].mxu0 }
 0x216   : > { %v5002_v36 = vpop.f32.mrb[91].mxu0 }
 0x217   : > { %v7093_v41 = vadd.f32 %v7053_v15, %v5000_v45  ;;  %v5003_v40 = vadd.f32 %v5002_v36, %v5001_v34 }
 0x219   : > { %v7096_v37 = vadd.f32 %v7055_v3, %v5003_v40 }
 0x21b   : > { %v5004_v29 = vpop.f32.mrb[92].mxu0 }
 0x21c   : > { %v5005_v51 = vpop.f32.mrb[93].mxu0 }
 0x21d   : > { %v5006_v50 = vadd.f32 %v5005_v51, %v5004_v29  ;;  %v5007_v8 = vpop.f32.mrb[94].mxu0 }
 0x21e   : > { %v5008_v14 = vpop.f32.mrb[95].mxu0 }
 0x21f   : > { %v7099_v1 = vadd.f32 %v7057_v49, %v5006_v50  ;;  %v5009_v23 = vadd.f32 %v5008_v14, %v5007_v8 }
 0x221   : > { %v7102_v48 = vadd.f32 %v7059_v52, %v5009_v23 }
 0x223   : > { %v5010_v11 = vpop.f32.mrb[96].mxu0 }
 0x224   : > { %v5146_v62 = vpop.f32.mrb[48].mxu1  ;;  %v5011_v15 = vpop.f32.mrb[97].mxu0 }
 0x225   : > { %v5012_v35 = vadd.f32 %v5011_v15, %v5010_v11  ;;  %v5147_v56 = vpop.f32.mrb[49].mxu1  ;;  %v5013_v28 = vpop.f32.mrb[98].mxu0 }
 0x226   : > { %v7104_v3 = vadd.f32 %v5147_v56, %v5146_v62  ;;  %v5149_v30 = vpop.f32.mrb[50].mxu1  ;;  %v5014_v39 = vpop.f32.mrb[99].mxu0 }
 0x227   : > { %v7107_v24 = vadd.f32 %v7061_v25, %v5012_v35  ;;  %v5015_v54 = vadd.f32 %v5014_v39, %v5013_v28  ;;  %v5150_v49 = vpop.f32.mrb[51].mxu1 }
 0x228   : > { %v5151_v2 = vadd.f32 %v5150_v49, %v5149_v30 }
 0x229   : > { %v7110_v7 = vadd.f32 %v7063_v32, %v5015_v54 }
 0x22b   : > { %v5016_v52 = vpop.f32.mrb[100].mxu0 }
 0x22c   : > { %v5152_v42 = vpop.f32.mrb[52].mxu1  ;;  %v5017_v57 = vpop.f32.mrb[101].mxu0 }
 0x22d   : > { %v5018_v12 = vadd.f32 %v5017_v57, %v5016_v52  ;;  %v5153_v9 = vpop.f32.mrb[53].mxu1  ;;  %v5019_v19 = vpop.f32.mrb[102].mxu0 }
 0x22e   : > { %v7112_v6 = vadd.f32 %v5153_v9, %v5152_v42  ;;  %v5155_v13 = vpop.f32.mrb[54].mxu1  ;;  %v5020_v58 = vpop.f32.mrb[103].mxu0 }
 0x22f   : > { %v7115_v60 = vadd.f32 %v7066_v63, %v5018_v12  ;;  %v5021_v25 = vadd.f32 %v5020_v58, %v5019_v19  ;;  %v5156_v43 = vpop.f32.mrb[55].mxu1 }
 0x230   : > { %v5157_v16 = vadd.f32 %v5156_v43, %v5155_v13 }
 0x231   : > { %v7118_v59 = vadd.f32 %v7068_v55, %v5021_v25 }
 0x233   : > { %v5022_v32 = vpop.f32.mrb[104].mxu0 }
 0x234   : > { %v5158_v47 = vpop.f32.mrb[56].mxu1  ;;  %v5023_v21 = vpop.f32.mrb[105].mxu0 }
 0x235   : > { %v5024_v27 = vadd.f32 %v5023_v21, %v5022_v32  ;;  %v5159_v38 = vpop.f32.mrb[57].mxu1  ;;  %v5025_v46 = vpop.f32.mrb[106].mxu0 }
 0x236   : > { %v7120_v61 = vadd.f32 %v5159_v38, %v5158_v47  ;;  %v5161_v31 = vpop.f32.mrb[58].mxu1  ;;  %v5026_v18 = vpop.f32.mrb[107].mxu0 }
 0x237   : > { %v7123_v4 = vadd.f32 %v7070_v33, %v5024_v27  ;;  %v5027_v63 = vadd.f32 %v5026_v18, %v5025_v46  ;;  %v5162_v5 = vpop.f32.mrb[59].mxu1 }
 0x238   : > { %v7125_v20 = vadd.f32 %v5162_v5, %v5161_v31 }
 0x239   : > { %v7128_v55 = vadd.f32 %v7072_v0, %v5027_v63 }
 0x23b   : > { %v5028_v45 = vpop.f32.mrb[108].mxu0 }
 0x23c   : > { %v5164_v34 = vpop.f32.mrb[60].mxu1  ;;  %v5029_v36 = vpop.f32.mrb[109].mxu0 }
 0x23d   : > { %v5030_v40 = vadd.f32 %v5029_v36, %v5028_v45  ;;  %v5165_v29 = vpop.f32.mrb[61].mxu1  ;;  %v5031_v51 = vpop.f32.mrb[110].mxu0 }
 0x23e   : > { %v7130_v50 = vadd.f32 %v5165_v29, %v5164_v34  ;;  %v5167_v8 = vpop.f32.mrb[62].mxu1  ;;  %v5032_v14 = vpop.f32.mrb[111].mxu0 }
 0x23f   : > { %v7133_v33 = vadd.f32 %v7075_v10, %v5030_v40  ;;  %v5033_v23 = vadd.f32 %v5032_v14, %v5031_v51  ;;  %v5168_v11 = vpop.f32.mrb[63].mxu1 }
 0x240   : > { %v7135_v62 = vadd.f32 %v5168_v11, %v5167_v8 }
 0x241   : > { %v7138_v0 = vadd.f32 %v7078_v22, %v5033_v23 }
 0x243   : > { %v5066_v15 = vpop.f32.mrb[112].mxu0 }
 0x244   : > { %v5170_v35 = vpop.f32.mrb[64].mxu1  ;;  %v5067_v56 = vpop.f32.mrb[113].mxu0 }
 0x245   : > { %v5068_v28 = vadd.f32 %v5067_v56, %v5066_v15  ;;  %v5171_v30 = vpop.f32.mrb[65].mxu1  ;;  %v5069_v39 = vpop.f32.mrb[114].mxu0 }
 0x246   : > { %v7140_v54 = vadd.f32 %v5171_v30, %v5170_v35  ;;  %v5173_v49 = vpop.f32.mrb[66].mxu1  ;;  %v5070_v52 = vpop.f32.mrb[115].mxu0 }
 0x247   : > { %v5413_v10 = vadd.f32 %v7081_v44, %v5068_v28  ;;  %v5071_v42 = vadd.f32 %v5070_v52, %v5069_v39  ;;  %v5174_v57 = vpop.f32.mrb[67].mxu1 }
 0x248   : > { %v7143_v12 = vadd.f32 %v5174_v57, %v5173_v49 }
 0x249   : > { %v5427_v9 = vadd.f32 %v7084_v26, %v5071_v42  ;;  %v5414_v22 = vadd.f32 %v5413_v10, %v7104_v3 }
 0x24b   : > { %v5072_v19 = vpop.f32.mrb[116].mxu0  ;;  %v5428_v13 = vadd.f32 %v5427_v9, %v5151_v2 }
 0x24c   : > { %v5176_v58 = vpop.f32.mrb[68].mxu1  ;;  %v5073_v25 = vpop.f32.mrb[117].mxu0 }
 0x24d   : > { %v5074_v43 = vadd.f32 %v5073_v25, %v5072_v19  ;;  %v5177_v32 = vpop.f32.mrb[69].mxu1  ;;  %v5075_v47 = vpop.f32.mrb[118].mxu0 }
 0x24e   : > { %v7147_v21 = vadd.f32 %v5177_v32, %v5176_v58  ;;  %v5179_v27 = vpop.f32.mrb[70].mxu1  ;;  %v5076_v38 = vpop.f32.mrb[119].mxu0 }
 0x24f   : > { %v5406_v44 = vadd.f32 %v7087_v53, %v5074_v43  ;;  %v5077_v46 = vadd.f32 %v5076_v38, %v5075_v47  ;;  %v5180_v31 = vpop.f32.mrb[71].mxu1 }
 0x250   : > { %v7150_v18 = vadd.f32 %v5180_v31, %v5179_v27 }
 0x251   : > { %v5420_v26 = vadd.f32 %v7090_v17, %v5077_v46  ;;  %v5407_v3 = vadd.f32 %v5406_v44, %v7112_v6 }
 0x253   : > { %v5078_v2 = vpop.f32.mrb[120].mxu0  ;;  %v5421_v63 = vadd.f32 %v5420_v26, %v5157_v16 }
 0x254   : > { %v5182_v5 = vpop.f32.mrb[72].mxu1  ;;  %v5079_v45 = vpop.f32.mrb[121].mxu0 }
 0x255   : > { %v5080_v34 = vadd.f32 %v5079_v45, %v5078_v2  ;;  %v5183_v36 = vpop.f32.mrb[73].mxu1  ;;  %v5081_v40 = vpop.f32.mrb[122].mxu0 }
 0x256   : > { %v7154_v29 = vadd.f32 %v5183_v36, %v5182_v5  ;;  %v5185_v51 = vpop.f32.mrb[74].mxu1  ;;  %v5082_v8 = vpop.f32.mrb[123].mxu0 }
 0x257   : > { %v5441_v53 = vadd.f32 %v7093_v41, %v5080_v34  ;;  %v5083_v14 = vadd.f32 %v5082_v8, %v5081_v40  ;;  %v5186_v23 = vpop.f32.mrb[75].mxu1 }
 0x258   : > { %v7157_v11 = vadd.f32 %v5186_v23, %v5185_v51 }
 0x259   : > { %v5455_v17 = vadd.f32 %v7096_v37, %v5083_v14  ;;  %v5442_v6 = vadd.f32 %v5441_v53, %v7120_v61 }
 0x25b   : > { %v5084_v16 = vpop.f32.mrb[124].mxu0  ;;  %v7162_v15 = vadd.f32 %v5455_v17, %v7125_v20 }
 0x25c   : > { %v5188_v35 = vpop.f32.mrb[76].mxu1  ;;  %v5085_v56 = vpop.f32.mrb[125].mxu0 }
 0x25d   : > { %v5086_v28 = vadd.f32 %v5085_v56, %v5084_v16  ;;  %v5189_v30 = vpop.f32.mrb[77].mxu1  ;;  %v5087_v39 = vpop.f32.mrb[126].mxu0 }
 0x25e   : > { %v7164_v49 = vadd.f32 %v5189_v30, %v5188_v35  ;;  %v5191_v41 = vpop.f32.mrb[78].mxu1  ;;  %v5088_v52 = vpop.f32.mrb[127].mxu0 }
 0x25f   : > { %v5434_v10 = vadd.f32 %v7099_v1, %v5086_v28  ;;  %v5089_v42 = vadd.f32 %v5088_v52, %v5087_v39  ;;  %v5192_v57 = vpop.f32.mrb[79].mxu1 }
 0x260   : > { %v7167_v37 = vadd.f32 %v5192_v57, %v5191_v41 }
 0x261   : > { %v5448_v61 = vadd.f32 %v7102_v48, %v5089_v42  ;;  %v5435_v20 = vadd.f32 %v5434_v10, %v7130_v50 }
 0x263   : > { %v5090_v9 = vpop.f32.mrb[128].mxu0  ;;  %v5449_v19 = vadd.f32 %v5448_v61, %v7135_v62 }
 0x264   : > { %v5388_v58 = vpop.f32.mrb[32].mxu1  ;;  %v5091_v25 = vpop.f32.mrb[129].mxu0 }
 0x265   : > { %v5408_v43 = vadd.f32 %v5407_v3, %v5388_v58  ;;  %v5092_v32 = vadd.f32 %v5091_v25, %v5090_v9  ;;  %v3592_v47 = vpop.f32.mrb[33].mxu1  ;;  %v5093_v27 = vpop.f32.mrb[130].mxu0 }
 0x266   : > { %v5415_v38 = vadd.f32 %v5414_v22, %v3592_v47  ;;  %v5389_v1 = vpop.f32.mrb[34].mxu1  ;;  %v5094_v44 = vpop.f32.mrb[131].mxu0 }
 0x267   : > { %v5469_v46 = vadd.f32 %v7107_v24, %v5092_v32  ;;  %v5422_v31 = vadd.f32 %v5421_v63, %v5389_v1  ;;  %v5095_v48 = vadd.f32 %v5094_v44, %v5093_v27  ;;  %v3595_v26 = vpop.f32.mrb[35].mxu1  ;;  %v3775_v51 = vmul.f32 %v5408_v43, %v5408_v43 }
 0x268   : > { %v5429_v50 = vadd.f32 %v5428_v13, %v3595_v26  ;;  %v3773_v3 = vmul.f32 %v5415_v38, %v5415_v38 }
 0x269   : > { %v4691_v2 = vpack.c.bf16 %v5422_v31, %v5408_v43  ;;  %v5483_v62 = vadd.f32 %v7110_v7, %v5095_v48  ;;  %v5470_v5 = vadd.f32 %v5469_v46, %v7140_v54  ;;  %v3776_v17 = vmul.f32 %v5422_v31, %v5422_v31 }
 0x26a   : > { %v4686_v45 = vpack.c.bf16 %v5429_v50, %v5415_v38  ;;  %v3751_v34 = vadd.f32 %v5429_v50, %v5415_v38  ;;  %v3774_v36 = vmul.f32 %v5429_v50, %v5429_v50 }
 0x26b   : > { %4723 = vst [vmem:[%s5883_s12 + $0x8] sm:$0xff] %v4691_v2   ;;  %v5096_v22 = vpop.f32.mrb[132].mxu0  ;;  %v5484_v40 = vadd.f32 %v5483_v62, %v7143_v12 }
 0x26c   : > { %4687 = vst [vmem:[%s5883_s12] sm:$0xff] %v4686_v45   ;;  %v3752_v24 = vadd.f32 %v5408_v43, %v3751_v34  ;;  %v3789_v63 = vadd.f32 %v3774_v36, %v3773_v3  ;;  %v5392_v8 = vpop.f32.mrb[36].mxu1  ;;  %v5097_v53 = vpop.f32.mrb[133].mxu0 }
 0x26d   : > { %v5436_v13 = vadd.f32 %v5435_v20, %v5392_v8  ;;  %v5098_v14 = vadd.f32 %v5097_v53, %v5096_v22  ;;  %v3608_v23 = vpop.f32.mrb[37].mxu1  ;;  %v5099_v7 = vpop.f32.mrb[134].mxu0 }
 0x26e   : > { %v3790_v54 = vadd.f32 %v3789_v63, %v3775_v51  ;;  %v5443_v16 = vadd.f32 %v5442_v6, %v3608_v23  ;;  %v3753_v35 = vadd.f32 %v5422_v31, %v3752_v24  ;;  %v5393_v56 = vpop.f32.mrb[38].mxu1  ;;  %v5100_v28 = vpop.f32.mrb[135].mxu0 }
 0x26f   : > { %v5462_v30 = vadd.f32 %v7115_v60, %v5098_v14  ;;  %v5450_v12 = vadd.f32 %v5449_v19, %v5393_v56  ;;  %v5101_v39 = vadd.f32 %v5100_v28, %v5099_v7  ;;  %v3611_v41 = vpop.f32.mrb[39].mxu1  ;;  %v3779_v32 = vmul.f32 %v5436_v13, %v5436_v13 }
 0x270   : > { %v3754_v52 = vadd.f32 %v5443_v16, %v3753_v35  ;;  %v3777_v10 = vmul.f32 %v5443_v16, %v5443_v16  ;;  %v3791_v42 = vadd.f32 %v3790_v54, %v3776_v17  ;;  %v5457_v57 = vadd.f32 %v7162_v15, %v3611_v41 }
 0x271   : > { %v4701_v61 = vpack.c.bf16 %v5450_v12, %v5436_v13  ;;  %v5476_v20 = vadd.f32 %v7118_v59, %v5101_v39  ;;  %v5463_v6 = vadd.f32 %v5462_v30, %v7147_v21  ;;  %v3780_v31 = vmul.f32 %v5450_v12, %v5450_v12 }
 0x272   : > { %v3792_v9 = vadd.f32 %v3791_v42, %v3777_v10  ;;  %v4696_v58 = vpack.c.bf16 %v5457_v57, %v5443_v16  ;;  %v3755_v25 = vadd.f32 %v5457_v57, %v3754_v52  ;;  %v3778_v43 = vmul.f32 %v5457_v57, %v5457_v57 }
 0x273   : > { %4725 = vst [vmem:[%s5883_s12 + $0x18] sm:$0xff] %v4701_v61   ;;  %v5102_v60 = vpop.f32.mrb[136].mxu0  ;;  %v5477_v19 = vadd.f32 %v5476_v20, %v7150_v18 }
 0x274   : > { %4724 = vst [vmem:[%s5883_s12 + $0x10] sm:$0xff] %v4696_v58   ;;  %v3756_v47 = vadd.f32 %v5436_v13, %v3755_v25  ;;  %v3793_v27 = vadd.f32 %v3792_v9, %v3778_v43  ;;  %v5396_v38 = vpop.f32.mrb[40].mxu1  ;;  %v5103_v1 = vpop.f32.mrb[137].mxu0 }
 0x275   : > { %v5464_v15 = vadd.f32 %v5463_v6, %v5396_v38  ;;  %v5104_v44 = vadd.f32 %v5103_v1, %v5102_v60  ;;  %v3624_v46 = vpop.f32.mrb[41].mxu1  ;;  %v5105_v59 = vpop.f32.mrb[138].mxu0 }
 0x276   : > { %v3794_v21 = vadd.f32 %v3793_v27, %v3779_v32  ;;  %v5471_v48 = vadd.f32 %v5470_v5, %v3624_v46  ;;  %v3757_v26 = vadd.f32 %v5450_v12, %v3756_v47  ;;  %v5397_v50 = vpop.f32.mrb[42].mxu1  ;;  %v5106_v2 = vpop.f32.mrb[139].mxu0 }
 0x277   : > { %v5497_v62 = vadd.f32 %v7123_v4, %v5104_v44  ;;  %v5478_v18 = vadd.f32 %v5477_v19, %v5397_v50  ;;  %v5107_v3 = vadd.f32 %v5106_v2, %v5105_v59  ;;  %v3627_v45 = vpop.f32.mrb[43].mxu1  ;;  %v3783_v7 = vmul.f32 %v5464_v15, %v5464_v15 }
 0x278   : > { %v3758_v34 = vadd.f32 %v5471_v48, %v3757_v26  ;;  %v3781_v36 = vmul.f32 %v5471_v48, %v5471_v48  ;;  %v3795_v22 = vadd.f32 %v3794_v21, %v3780_v31  ;;  %v5485_v51 = vadd.f32 %v5484_v40, %v3627_v45 }
 0x279   : > { %v4711_v24 = vpack.c.bf16 %v5478_v18, %v5464_v15  ;;  %v5511_v63 = vadd.f32 %v7128_v55, %v5107_v3  ;;  %v5498_v8 = vadd.f32 %v5497_v62, %v7154_v29  ;;  %v3784_v55 = vmul.f32 %v5478_v18, %v5478_v18 }
 0x27a   : > { %v3796_v5 = vadd.f32 %v3795_v22, %v3781_v36  ;;  %v4706_v53 = vpack.c.bf16 %v5485_v51, %v5471_v48  ;;  %v3759_v13 = vadd.f32 %v5485_v51, %v3758_v34  ;;  %v3782_v14 = vmul.f32 %v5485_v51, %v5485_v51 }
 0x27b   : > { %4727 = vst [vmem:[%s5883_s12 + $0x28] sm:$0xff] %v4711_v24   ;;  %v5108_v23 = vpop.f32.mrb[140].mxu0  ;;  %v5512_v4 = vadd.f32 %v5511_v63, %v7157_v11 }
 0x27c   : > { %4726 = vst [vmem:[%s5883_s12 + $0x20] sm:$0xff] %v4706_v53   ;;  %v3760_v17 = vadd.f32 %v5464_v15, %v3759_v13  ;;  %v3797_v54 = vadd.f32 %v3796_v5, %v3782_v14  ;;  %v5400_v16 = vpop.f32.mrb[44].mxu1  ;;  %v5109_v35 = vpop.f32.mrb[141].mxu0 }
 0x27d   : > { %v5110_v40 = vadd.f32 %v5109_v35, %v5108_v23  ;;  %v3640_v56 = vpop.f32.mrb[45].mxu1  ;;  %v5111_v28 = vpop.f32.mrb[142].mxu0 }
 0x27e   : > { %v3798_v30 = vadd.f32 %v3797_v54, %v3783_v7  ;;  %v5499_v29 = vadd.f32 %v5498_v8, %v3640_v56  ;;  %v3761_v12 = vadd.f32 %v5478_v18, %v3760_v17  ;;  %v5401_v39 = vpop.f32.mrb[46].mxu1  ;;  %v5112_v41 = vpop.f32.mrb[143].mxu0 }
 0x27f   : > { %v5490_v52 = vadd.f32 %v7133_v33, %v5110_v40  ;;  %v5113_v10 = vadd.f32 %v5112_v41, %v5111_v28  ;;  %v3643_v11 = vpop.f32.mrb[47].mxu1 }
 0x280   : > { %v3762_v42 = vadd.f32 %v5499_v29, %v3761_v12  ;;  %v3785_v57 = vmul.f32 %v5499_v29, %v5499_v29  ;;  %v3799_v61 = vadd.f32 %v3798_v30, %v3784_v55  ;;  %v5513_v20 = vadd.f32 %v5512_v4, %v3643_v11 }
 0x281   : > { %v5491_v6 = vadd.f32 %v5490_v52, %v7164_v49  ;;  %v5504_v9 = vadd.f32 %v7138_v0, %v5113_v10 }
 0x282   : > { %v3800_v58 = vadd.f32 %v3799_v61, %v3785_v57  ;;  %v4716_v25 = vpack.c.bf16 %v5513_v20, %v5499_v29  ;;  %v3763_v43 = vadd.f32 %v5513_v20, %v3762_v42  ;;  %v3786_v60 = vmul.f32 %v5513_v20, %v5513_v20 }
 0x283   : > { %v5492_v19 = vadd.f32 %v5491_v6, %v5400_v16  ;;  %v5505_v32 = vadd.f32 %v5504_v9, %v7167_v37 }
 0x284   : > { %4728 = vst [vmem:[%s5883_s12 + $0x30] sm:$0xff] %v4716_v25   ;;  %v3801_v33 = vadd.f32 %v3800_v58, %v3786_v60 }
 0x285   : > { %v5506_v47 = vadd.f32 %v5505_v32, %v5401_v39  ;;  %v3764_v27 = vadd.f32 %v5492_v19, %v3763_v43  ;;  %v3787_v38 = vmul.f32 %v5492_v19, %v5492_v19 }
 0x287   : > { %v4721_v1 = vpack.c.bf16 %v5506_v47, %v5492_v19  ;;  %v3788_v15 = vmul.f32 %v5506_v47, %v5506_v47  ;;  %v3765_v44 = vadd.f32 %v5506_v47, %v3764_v27  ;;  %v3802_v49 = vadd.f32 %v3801_v33, %v3787_v38 }
 0x289   : > { %4729 = vst [vmem:[%s5883_s12 + $0x38] sm:$0xff] %v4721_v1   ;;  %v3766_v0 = vrot.slane %v3765_v44, 4  ;;  %v3803_v46 = vadd.f32 %v3802_v49, %v3788_v15 }
 0x28b   : > { %v3767_v59 = vadd.f32 %v3766_v0, %v3765_v44  ;;  %v3804_v31 = vrot.slane %v3803_v46, 4 }
 0x28d   : > { %v3768_v21 = vrot.slane %v3767_v59, 2  ;;  %v3805_v48 = vadd.f32 %v3804_v31, %v3803_v46 }
 0x28f   : > { %v3769_v26 = vadd.f32 %v3768_v21, %v3767_v59  ;;  %v3806_v37 = vrot.slane %v3805_v48, 2 }
 0x291   : > { %v3770_v50 = vrot.slane %v3769_v26, 1  ;;  %v3807_v2 = vadd.f32 %v3806_v37, %v3805_v48 }
 0x293   : > { %v3771_v62 = vadd.f32 %v3770_v50, %v3769_v26  ;;  %v3808_v18 = vrot.slane %v3807_v2, 1 }
 0x295   : > { %3772 = vst [vmem:[%s5891_s26] sm:$0x1] %v3771_v62  ;;  %v3809_v3 = vadd.f32 %v3808_v18, %v3807_v2 }
 0x297   : > { %3810 = vst [vmem:[%s5891_s26 + $0x1] sm:$0x1] %v3809_v3 }
 0x298 PF: > { %s16_s22 = sadd.s32 1, %s5804_s22   ;;  %s7234_s12 = sld [smem:[#allocation19_spill]] }
 0x299   : > { %p13_p4 = scmp.ge.s32.totalorder %s16_s22, 6   ;;  %s7235_s8 = sld [smem:[#allocation20_spill]] }
 0x29a   : > { %s7236_s18 = smov %s5796_s20  ;;  %s7237_s19 = smov %s5800_s21 }
 0x29b   :  { %15 = sbr.rel (!%p13_p4) target bundleno = 3 (0x3), region = 618 }
 0x29e   : > { %s7238_s20 = smov %s7234_s12 }
 0x29f   : > { %s7239_s21 = smov %s7235_s8 }
 0x2a2   :  { %3865 = vsyncmov [#allocation4] }
 0x2a5   :  { %s3866_s26 = vpop.sfrf %3865 }
 0x2a6   :  { %p4654_p5 = scmp.ne.s32.totalorder %s3866_s26, 0 }
 0x2a8   :  { %3870 = shalt.err (%p4654_p5)  }
 0x2a9   :  { %3872 = vsyncmov [#allocation4 + $0x1] }
 0x2ac   :  { %s3873_s29 = vpop.sfrf %3872 }
 0x2ad   :  { %p4655_p6 = scmp.ne.s32.totalorder %s3873_s29, 0 }
 0x2af   :  { %3877 = shalt.err (%p4655_p6)  }
 0x2b0   :  { %3879 = vsyncmov [#allocation4 + $0x2] }
 0x2b3   :  { %s3880_s28 = vpop.sfrf %3879 }
 0x2b4   :  { %p4656_p7 = scmp.ne.s32.totalorder %s3880_s28, 0 }
 0x2b6   :  { %3884 = shalt.err (%p4656_p7)  }
 0x2b7   :  { %3886 = vsyncmov [#allocation4 + $0x3] }
 0x2ba   :  { %s3887_s16 = vpop.sfrf %3886 }
 0x2bb   :  { %p4657_p8 = scmp.ne.s32.totalorder %s3887_s16, 0 }
 0x2bd   :  { %3891 = shalt.err (%p4657_p8)  }

</bundles_post_ra>
